<compile_context>
chip_gen: v7x
topology: tpu7x:2x2x1
jax: 0.10.0
libtpu: 0.0.40
codegen_flags: <defaults>
</compile_context>

<pallas_src>
import functools
import math

import jax
import jax.numpy as jnp
from jax import lax
from jax.experimental import pallas as pl
from jax.experimental.pallas import tpu as pltpu


# Safe on all of v5e / v6e (128 MiB physical) and v7x (64 MiB physical).
_VMEM_LIMIT = 48 * 1024 * 1024

_COMPILER_PARAMS_1D = pltpu.CompilerParams(
    dimension_semantics=("parallel",),
    vmem_limit_bytes=_VMEM_LIMIT,
)


# --------------------------------------------------------------------------
# Tile-size helpers
# --------------------------------------------------------------------------

def _row_tile(M, floats_per_row, budget_bytes=4 * 1024 * 1024):
    """Row tile: whole array if it fits the budget, else the largest multiple
    of 8 (<=1024) that does.  Full-dim blocks are always layout-legal."""
    per_row = max(1, floats_per_row) * 4
    t = max(1, budget_bytes // per_row)
    if t >= M:
        return M
    t = max(8, (min(t, 1024) // 8) * 8)
    return min(t, M)


def _bh_tile(BH, n, hd, hdv, budget_bytes=4 * 1024 * 1024):
    """How many (batch*head) attention slices per grid step."""
    per = (2 * n * hd + 2 * n * hdv + 2 * n * n + n) * 4 * 2
    t = max(1, budget_bytes // max(per, 1))
    if t >= BH:
        return BH
    t = max(8, (min(t, 256) // 8) * 8)
    return min(t, BH)


# --------------------------------------------------------------------------
# In-kernel math helpers
# --------------------------------------------------------------------------

def _ln(x, g, b, eps=1e-5):
    """LayerNorm in f32 (torch default eps=1e-5, biased variance)."""
    x = x.astype(jnp.float32)
    mu = jnp.mean(x, axis=-1, keepdims=True)
    xc = x - mu
    var = jnp.mean(xc * xc, axis=-1, keepdims=True)
    return xc * lax.rsqrt(var + eps) * g.astype(jnp.float32) + b.astype(jnp.float32)


def _gelu(x):
    return 0.5 * x * (1.0 + lax.erf(x * (1.0 / math.sqrt(2.0))))


# --------------------------------------------------------------------------
# Pallas kernels
# --------------------------------------------------------------------------

def _ln_matmul_kernel(x_ref, g_ref, b_ref, w_ref, o_ref):
    """o = LayerNorm(x) @ W           (no bias: qkv_bias=False)"""
    xn = _ln(x_ref[...], g_ref[...], b_ref[...])
    o_ref[...] = jnp.dot(xn.astype(w_ref.dtype), w_ref[...],
                         preferred_element_type=jnp.float32).astype(o_ref.dtype)


def _ln_mlp_residual_kernel(x_ref, g_ref, b_ref, w1_ref, b1_ref, w2_ref, b2_ref, o_ref):
    """o = x + MLP(LayerNorm(x))   (fc1 -> exact-erf GELU -> fc2, f32 accum)"""
    x = x_ref[...]
    xn = _ln(x, g_ref[...], b_ref[...])
    h = jnp.dot(xn.astype(w1_ref.dtype), w1_ref[...],
                preferred_element_type=jnp.float32) + b1_ref[...].astype(jnp.float32)
    h = _gelu(h)
    y = jnp.dot(h.astype(w2_ref.dtype), w2_ref[...],
                preferred_element_type=jnp.float32) + b2_ref[...].astype(jnp.float32)
    o_ref[...] = (x.astype(jnp.float32) + y).astype(o_ref.dtype)


def _linear_residual_kernel(x_ref, w_ref, b_ref, res_ref, o_ref):
    """o = res + x @ W + b   (attention output projection + residual)"""
    y = jnp.dot(x_ref[...].astype(w_ref.dtype), w_ref[...],
                preferred_element_type=jnp.float32)
    o_ref[...] = (res_ref[...].astype(jnp.float32) + y
                  + b_ref[...].astype(jnp.float32)).astype(o_ref.dtype)


def _ln_proj_residual_kernel(x_ref, g_ref, b_ref, w_ref, bias_ref, res_ref, o_ref,
                             *, num_pixel, cin):
    """o = res + LayerNorm(x).reshape(M, P*Cin) @ W + bias
    LN is per-pixel (Cin features); the (P*Cin, O) matmul is decomposed into P
    (Cin, O) matmuls so no in-kernel reshape/relayout is needed."""
    g = g_ref[...]
    b = b_ref[...]
    w = w_ref[...]
    acc = res_ref[...].astype(jnp.float32) + bias_ref[...].astype(jnp.float32)
    for p in range(num_pixel):                      # static, small trip count
        xn = _ln(x_ref[:, p, :], g, b)
        acc = acc + jnp.dot(xn.astype(w.dtype), w[p * cin:(p + 1) * cin, :],
                            preferred_element_type=jnp.float32)
    o_ref[...] = acc.astype(o_ref.dtype)


def _attn_kernel_nomask(q_ref, k_ref, v_ref, o_ref, *, scale):
    """Batched attention over a tile of (batch*head) slices, no mask."""
    s = jnp.einsum('bqd,bkd->bqk', q_ref[...], k_ref[...],
                   preferred_element_type=jnp.float32) * scale
    s = s - jnp.max(s, axis=-1, keepdims=True)            # stable softmax
    p = jnp.exp(s)
    p = p * pl.reciprocal(jnp.sum(p, axis=-1, keepdims=True), approx=True)
    o = jnp.einsum('bqk,bkd->bqd', p.astype(v_ref.dtype), v_ref[...],
                   preferred_element_type=jnp.float32)
    o_ref[...] = o.astype(o_ref.dtype)


def _attn_kernel_masked(q_ref, k_ref, v_ref, m_ref, o_ref, *, scale):
    """Batched attention with per-sequence mask; the (N,N) mask matrix is
    built in-kernel from the (tile, 1, N) mask vector (never DMA'd)."""
    s = jnp.einsum('bqd,bkd->bqk', q_ref[...], k_ref[...],
                   preferred_element_type=jnp.float32) * scale
    m = m_ref[:, 0, :].astype(jnp.float32)                 # (tile, N)
    mm = m[:, :, None] * m[:, None, :]                     # (tile, N, N)
    s = jnp.where(mm == 0.0, -60000.0, s)                  # masked_fill(mask==0,-60000.)
    s = s - jnp.max(s, axis=-1, keepdims=True)
    p = jnp.exp(s)
    p = p * pl.reciprocal(jnp.sum(p, axis=-1, keepdims=True), approx=True)
    o = jnp.einsum('bqk,bkd->bqd', p.astype(v_ref.dtype), v_ref[...],
                   preferred_element_type=jnp.float32)
    o_ref[...] = o.astype(o_ref.dtype)


# --------------------------------------------------------------------------
# pallas_call wrappers (row-tiled, parallel grids)
# --------------------------------------------------------------------------

def ln_matmul(x2d, g, b, w):
    M, C = x2d.shape
    O = w.shape[1]
    tm = _row_tile(M, 2 * (C + O) + C)
    return pl.pallas_call(
        _ln_matmul_kernel,
        out_shape=jax.ShapeDtypeStruct((M, O), x2d.dtype),
        grid=(pl.cdiv(M, tm),),
        in_specs=[
            pl.BlockSpec((tm, C), lambda i: (i, 0)),
            pl.BlockSpec((1, C), lambda i: (0, 0)),
            pl.BlockSpec((1, C), lambda i: (0, 0)),
            pl.BlockSpec((C, O), lambda i: (0, 0)),
        ],
        out_specs=pl.BlockSpec((tm, O), lambda i: (i, 0)),
        compiler_params=_COMPILER_PARAMS_1D,
    )(x2d, g.reshape(1, C), b.reshape(1, C), w)


def ln_mlp_residual(x2d, g, b, w1, b1, w2, b2):
    M, C = x2d.shape
    Hd = w1.shape[1]
    O = w2.shape[1]
    tm = _row_tile(M, 2 * (C + O) + 2 * Hd)
    return pl.pallas_call(
        _ln_mlp_residual_kernel,
        out_shape=jax.ShapeDtypeStruct((M, O), x2d.dtype),
        grid=(pl.cdiv(M, tm),),
        in_specs=[
            pl.BlockSpec((tm, C), lambda i: (i, 0)),
            pl.BlockSpec((1, C), lambda i: (0, 0)),
            pl.BlockSpec((1, C), lambda i: (0, 0)),
            pl.BlockSpec((C, Hd), lambda i: (0, 0)),
            pl.BlockSpec((1, Hd), lambda i: (0, 0)),
            pl.BlockSpec((Hd, O), lambda i: (0, 0)),
            pl.BlockSpec((1, O), lambda i: (0, 0)),
        ],
        out_specs=pl.BlockSpec((tm, O), lambda i: (i, 0)),
        compiler_params=_COMPILER_PARAMS_1D,
    )(x2d, g.reshape(1, C), b.reshape(1, C), w1, b1.reshape(1, Hd), w2, b2.reshape(1, O))


def linear_residual(x2d, w, b, res2d):
    M, K = x2d.shape
    O = w.shape[1]
    tm = _row_tile(M, 2 * (K + O) + O)
    return pl.pallas_call(
        _linear_residual_kernel,
        out_shape=jax.ShapeDtypeStruct((M, O), res2d.dtype),
        grid=(pl.cdiv(M, tm),),
        in_specs=[
            pl.BlockSpec((tm, K), lambda i: (i, 0)),
            pl.BlockSpec((K, O), lambda i: (0, 0)),
            pl.BlockSpec((1, O), lambda i: (0, 0)),
            pl.BlockSpec((tm, O), lambda i: (i, 0)),
        ],
        out_specs=pl.BlockSpec((tm, O), lambda i: (i, 0)),
        compiler_params=_COMPILER_PARAMS_1D,
    )(x2d, w, b.reshape(1, O), res2d)


def ln_proj_residual(x3d, g, b, w, bias, res2d):
    M, P, Cin = x3d.shape
    O = w.shape[1]
    tm = _row_tile(M, 2 * (P * Cin + O) + O)
    kernel = functools.partial(_ln_proj_residual_kernel, num_pixel=P, cin=Cin)
    return pl.pallas_call(
        kernel,
        out_shape=jax.ShapeDtypeStruct((M, O), res2d.dtype),
        grid=(pl.cdiv(M, tm),),
        in_specs=[
            pl.BlockSpec((tm, P, Cin), lambda i: (i, 0, 0)),
            pl.BlockSpec((1, Cin), lambda i: (0, 0)),
            pl.BlockSpec((1, Cin), lambda i: (0, 0)),
            pl.BlockSpec((P * Cin, O), lambda i: (0, 0)),
            pl.BlockSpec((1, O), lambda i: (0, 0)),
            pl.BlockSpec((tm, O), lambda i: (i, 0)),
        ],
        out_specs=pl.BlockSpec((tm, O), lambda i: (i, 0)),
        compiler_params=_COMPILER_PARAMS_1D,
    )(x3d, g.reshape(1, Cin), b.reshape(1, Cin), w, bias.reshape(1, O), res2d)


def attn_core(q, k, v, mask_bh, *, scale):
    """q,k: (BH,N,hd)  v: (BH,N,hdv)  mask_bh: (BH,1,N) or None."""
    BH, N, hd = q.shape
    hdv = v.shape[-1]
    tb = _bh_tile(BH, N, hd, hdv)
    grid = (pl.cdiv(BH, tb),)
    qkv_specs = [
        pl.BlockSpec((tb, N, hd), lambda i: (i, 0, 0)),
        pl.BlockSpec((tb, N, hd), lambda i: (i, 0, 0)),
        pl.BlockSpec((tb, N, hdv), lambda i: (i, 0, 0)),
    ]
    out_spec = pl.BlockSpec((tb, N, hdv), lambda i: (i, 0, 0))
    out_shape = jax.ShapeDtypeStruct((BH, N, hdv), q.dtype)
    if mask_bh is None:
        kernel = functools.partial(_attn_kernel_nomask, scale=scale)
        return pl.pallas_call(
            kernel, out_shape=out_shape, grid=grid,
            in_specs=qkv_specs, out_specs=out_spec,
            compiler_params=_COMPILER_PARAMS_1D,
        )(q, k, v)
    kernel = functools.partial(_attn_kernel_masked, scale=scale)
    return pl.pallas_call(
        kernel, out_shape=out_shape, grid=grid,
        in_specs=qkv_specs + [pl.BlockSpec((tb, 1, N), lambda i: (i, 0, 0))],
        out_specs=out_spec,
        compiler_params=_COMPILER_PARAMS_1D,
    )(q, k, v, mask_bh)


# --------------------------------------------------------------------------
# Module-level forward (glue in plain JAX, compute in the kernels above)
# --------------------------------------------------------------------------

def attention_forward(x, p, ln_g, ln_b, mask_vec=None):
    """x + proj(attn(LayerNorm(x)))  -- LN+fused-QKV, batched attention and
    proj+residual each as a single pallas_call."""
    B, N, C = x.shape
    H = p["num_heads"]
    hidden = p["hidden_dim"]
    hd = hidden // H
    hdv = C // H
    x2 = x.reshape(B * N, C)

    # fused LayerNorm + combined q/k/v projection (qkv_bias=False -> no bias)
    qkv = ln_matmul(x2, ln_g, ln_b, p["w_qkv"])            # (B*N, 2*hidden + C)
    q = qkv[:, :hidden].reshape(B, N, H, hd).transpose(0, 2, 1, 3).reshape(B * H, N, hd)
    k = qkv[:, hidden:2 * hidden].reshape(B, N, H, hd).transpose(0, 2, 1, 3).reshape(B * H, N, hd)
    v = qkv[:, 2 * hidden:].reshape(B, N, H, hdv).transpose(0, 2, 1, 3).reshape(B * H, N, hdv)

    if mask_vec is None:
        mask_bh = None
    else:
        # tiny (B*H, 1, N) vector; the (N,N) matrix is built inside the kernel
        mask_bh = jnp.repeat(mask_vec.astype(x.dtype), H, axis=0).reshape(B * H, 1, N)

    o = attn_core(q, k, v, mask_bh, scale=hd ** (-0.5))    # (B*H, N, hdv)
    o2 = o.reshape(B, H, N, hdv).transpose(0, 2, 1, 3).reshape(B * N, C)
    out = linear_residual(o2, p["w_proj"], p["b_proj"], x2)  # proj + residual fused
    return out.reshape(B, N, C)


def block_forward(params, pixel_embed, patch_embed, mask):
    BP, P, Cin = pixel_embed.shape       # (B*(N-1), num_pixel, in_dim)
    B, N, C = patch_embed.shape          # (B, N, dim)

    # --- inner attention (no mask) + residual ---
    pixel_embed = attention_forward(pixel_embed, params["attn_in"],
                                    params["norm_in_g"], params["norm_in_b"],
                                    mask_vec=None)

    # --- inner MLP (fused LN + residual) ---
    px2 = ln_mlp_residual(pixel_embed.reshape(BP * P, Cin),
                          params["norm_mlp_in_g"], params["norm_mlp_in_b"],
                          params["mlp_in"]["w1"], params["mlp_in"]["b1"],
                          params["mlp_in"]["w2"], params["mlp_in"]["b2"])
    pixel_embed = px2.reshape(BP, P, Cin)

    # --- pixel -> patch projection (fused LN + bias + residual), skip class token ---
    res = patch_embed[:, 1:].reshape(B * (N - 1), C)
    y = ln_proj_residual(pixel_embed, params["norm1_proj_g"], params["norm1_proj_b"],
                         params["proj_w"], params["proj_b"], res)
    patch_embed = patch_embed.at[:, 1:].set(y.reshape(B, N - 1, C))

    # --- outer attention (sequence mask) + residual ---
    patch_embed = attention_forward(patch_embed, params["attn_out"],
                                    params["norm_out_g"], params["norm_out_b"],
                                    mask_vec=mask)

    # --- outer MLP (fused LN + residual) ---
    pe2 = ln_mlp_residual(patch_embed.reshape(B * N, C),
                          params["norm_mlp_g"], params["norm_mlp_b"],
                          params["mlp"]["w1"], params["mlp"]["b1"],
                          params["mlp"]["w2"], params["mlp"]["b2"])
    patch_embed = pe2.reshape(B, N, C)

    return pixel_embed, patch_embed


# --------------------------------------------------------------------------
# Deterministic parameter initialization (shapes from Block.__init__)
# --------------------------------------------------------------------------

def _dense(key, fan_in, fan_out):
    return 0.02 * jax.random.normal(key, (fan_in, fan_out), jnp.float32)


def _attn_params(key, dim, hidden_dim, num_heads):
    k1, k2, k3 = jax.random.split(key, 3)
    w_qk = _dense(k1, dim, 2 * hidden_dim)
    w_v = _dense(k2, dim, dim)
    return {
        "num_heads": num_heads,
        "hidden_dim": hidden_dim,
        "w_qkv": jnp.concatenate([w_qk, w_v], axis=1),   # qkv_bias=False -> no bias
        "w_proj": _dense(k3, dim, dim),
        "b_proj": jnp.zeros((dim,), jnp.float32),
    }


def _mlp_params(key, in_f, hidden_f, out_f):
    k1, k2 = jax.random.split(key, 2)
    return {
        "w1": _dense(k1, in_f, hidden_f),
        "b1": jnp.zeros((hidden_f,), jnp.float32),
        "w2": _dense(k2, hidden_f, out_f),
        "b2": jnp.zeros((out_f,), jnp.float32),
    }


def init_block_params(key, dim, in_dim, num_pixel, num_heads, in_num_head, mlp_ratio):
    ks = jax.random.split(key, 4)
    ones = lambda n: jnp.ones((n,), jnp.float32)
    zeros = lambda n: jnp.zeros((n,), jnp.float32)
    return {
        "norm_in_g": ones(in_dim), "norm_in_b": zeros(in_dim),
        "attn_in": _attn_params(ks[0], in_dim, in_dim, in_num_head),
        "norm_mlp_in_g": ones(in_dim), "norm_mlp_in_b": zeros(in_dim),
        "mlp_in": _mlp_params(ks[1], in_dim, int(in_dim * 4), in_dim),
        "norm1_proj_g": ones(in_dim), "norm1_proj_b": zeros(in_dim),
        "proj_w": _dense(jax.random.fold_in(key, 7), in_dim * num_pixel, dim),
        "proj_b": zeros(dim),
        "norm_out_g": ones(dim), "norm_out_b": zeros(dim),
        "attn_out": _attn_params(ks[2], dim, dim, num_heads),
        "norm_mlp_g": ones(dim), "norm_mlp_b": zeros(dim),
        "mlp": _mlp_params(ks[3], dim, int(dim * mlp_ratio), dim),
    }


# --------------------------------------------------------------------------
# Pure-JAX reference (mirrors the PyTorch module) for numerical validation
# --------------------------------------------------------------------------

def _ref_ln(x, g, b, eps=1e-5):
    mu = x.mean(-1, keepdims=True)
    var = ((x - mu) ** 2).mean(-1, keepdims=True)
    return (x - mu) / jnp.sqrt(var + eps) * g + b


def _ref_attn(x, p, mask=None):
    B, N, C = x.shape
    H = p["num_heads"]
    hidden = p["hidden_dim"]
    hd = hidden // H
    qkv = x @ p["w_qkv"]
    q = qkv[..., :hidden].reshape(B, N, H, hd).transpose(0, 2, 1, 3)
    k = qkv[..., hidden:2 * hidden].reshape(B, N, H, hd).transpose(0, 2, 1, 3)
    v = qkv[..., 2 * hidden:].reshape(B, N, H, C // H).transpose(0, 2, 1, 3)
    s = jnp.einsum('bhqd,bhkd->bhqk', q, k) * (hd ** -0.5)
    if mask is not None:
        mm = (mask[:, :, None] * mask[:, None, :])[:, None]
        s = jnp.where(mm == 0.0, -60000.0, s)
    a = jax.nn.softmax(s, axis=-1)
    o = jnp.einsum('bhqk,bhkd->bhqd', a, v).transpose(0, 2, 1, 3).reshape(B, N, C)
    return o @ p["w_proj"] + p["b_proj"]


def _ref_mlp(x, p):
    h = x @ p["w1"] + p["b1"]
    h = 0.5 * h * (1.0 + lax.erf(h / math.sqrt(2.0)))
    return h @ p["w2"] + p["b2"]


def block_forward_ref(params, pixel_embed, patch_embed, mask):
    BP, P, Cin = pixel_embed.shape
    B, N, C = patch_embed.shape
    pixel_embed = pixel_embed + _ref_attn(
        _ref_ln(pixel_embed, params["norm_in_g"], params["norm_in_b"]), params["attn_in"])
    pixel_embed = pixel_embed + _ref_mlp(
        _ref_ln(pixel_embed, params["norm_mlp_in_g"], params["norm_mlp_in_b"]), params["mlp_in"])
    y = _ref_ln(pixel_embed, params["norm1_proj_g"], params["norm1_proj_b"])
    y = y.reshape(B, N - 1, P * Cin) @ params["proj_w"] + params["proj_b"]
    patch_embed = patch_embed.at[:, 1:].add(y)
    patch_embed = patch_embed + _ref_attn(
        _ref_ln(patch_embed, params["norm_out_g"], params["norm_out_b"]),
        params["attn_out"], mask)
    patch_embed = patch_embed + _ref_mlp(
        _ref_ln(patch_embed, params["norm_mlp_g"], params["norm_mlp_b"]), params["mlp"])
    return pixel_embed, patch_embed


# --------------------------------------------------------------------------

if __name__ == "__main__":
    B, N = 2, 5            # N includes the class token; N-1 patches
    num_pixel = 4
    in_dim = 16
    dim = 32
    num_heads = 8
    in_num_head = 4

    key = jax.random.PRNGKey(0)
    k_params, k_pix, k_patch = jax.random.split(key, 3)

    params = init_block_params(k_params, dim, in_dim, num_pixel,
                               num_heads, in_num_head, mlp_ratio=4.0)

    pixel_embed = jax.random.normal(k_pix, (B * (N - 1), num_pixel, in_dim), jnp.float32)
    patch_embed = jax.random.normal(k_patch, (B, N, dim), jnp.float32)
    # per-token validity mask (1 = keep, 0 = pad), used only in the outer attention
    lengths = jnp.array([N, 3])
    mask = (jnp.arange(N)[None, :] < lengths[:, None]).astype(jnp.float32)

    fwd = jax.jit(functools.partial(block_forward, params))
    pixel_out, patch_out = fwd(pixel_embed, patch_embed, mask)
    jax.block_until_ready((pixel_out, patch_out))

    # validate against the pure-JAX reference (approx-reciprocal softmax -> loose tol)
    pix_ref, pat_ref = block_forward_ref(params, pixel_embed, patch_embed, mask)

    assert pixel_out.shape == (B * (N - 1), num_pixel, in_dim)
    assert patch_out.shape == (B, N, dim)
    assert bool(jnp.isfinite(pixel_out).all()) and bool(jnp.isfinite(patch_out).all())
    assert bool(jnp.allclose(pixel_out, pix_ref, rtol=2e-2, atol=2e-2))
    assert bool(jnp.allclose(patch_out, pat_ref, rtol=2e-2, atol=2e-2))
    print("KERNEL_OK")
</pallas_src>

<mosaic_0001>
module attributes {stable_mosaic.version = 11 : i64} {
  func.func @_ln_matmul_kernel(%arg0: i32, %arg1: memref<32x16xf32, #tpu.memory_space<vmem>>, %arg2: memref<1x16xf32, #tpu.memory_space<vmem>>, %arg3: memref<1x16xf32, #tpu.memory_space<vmem>>, %arg4: memref<16x48xf32, #tpu.memory_space<vmem>>, %arg5: memref<32x48xf32, #tpu.memory_space<vmem>>) attributes {dimension_semantics = [#tpu.dimension_semantics<parallel>], iteration_bounds = array<i64: 1>, scalar_prefetch = 0 : i64, scratch_operands = 0 : i64, tpu.core_type = #tpu.core_type<tc>, window_params = [{transform_indices = @transform_0, window_bounds = array<i64: 32, 16>}, {pipeline_mode = #tpu.pipeline_mode<synchronous>, transform_indices = @transform_1, window_bounds = array<i64: 1, 16>}, {pipeline_mode = #tpu.pipeline_mode<synchronous>, transform_indices = @transform_2, window_bounds = array<i64: 1, 16>}, {pipeline_mode = #tpu.pipeline_mode<synchronous>, transform_indices = @transform_3, window_bounds = array<i64: 16, 48>}, {transform_indices = @transform_4, window_bounds = array<i64: 32, 48>}]} {
    %c0 = arith.constant 0 : index
    %c0_0 = arith.constant 0 : index
    %0 = vector.load %arg1[%c0, %c0_0] : memref<32x16xf32, #tpu.memory_space<vmem>>, vector<32x16xf32>
    %c0_1 = arith.constant 0 : index
    %c0_2 = arith.constant 0 : index
    %1 = vector.load %arg2[%c0_1, %c0_2] : memref<1x16xf32, #tpu.memory_space<vmem>>, vector<1x16xf32>
    %c0_3 = arith.constant 0 : index
    %c0_4 = arith.constant 0 : index
    %2 = vector.load %arg3[%c0_3, %c0_4] : memref<1x16xf32, #tpu.memory_space<vmem>>, vector<1x16xf32>
    %cst = arith.constant dense<0.000000e+00> : vector<32xf32>
    %3 = vector.multi_reduction <add>, %0, %cst [1] : vector<32x16xf32> to vector<32xf32>
    %4 = vector.shape_cast %3 : vector<32xf32> to vector<32x1xf32>
    %cst_5 = arith.constant 1.600000e+01 : f32
    %5 = vector.broadcast %cst_5 : f32 to vector<32x1xf32>
    %6 = arith.divf %4, %5 : vector<32x1xf32>
    %7 = vector.broadcast %6 : vector<32x1xf32> to vector<32x16xf32>
    %8 = arith.subf %0, %7 : vector<32x16xf32>
    %9 = arith.mulf %8, %8 : vector<32x16xf32>
    %cst_6 = arith.constant dense<0.000000e+00> : vector<32xf32>
    %10 = vector.multi_reduction <add>, %9, %cst_6 [1] : vector<32x16xf32> to vector<32xf32>
    %11 = vector.shape_cast %10 : vector<32xf32> to vector<32x1xf32>
    %cst_7 = arith.constant 1.600000e+01 : f32
    %12 = vector.broadcast %cst_7 : f32 to vector<32x1xf32>
    %13 = arith.divf %11, %12 : vector<32x1xf32>
    %cst_8 = arith.constant 9.99999974E-6 : f32
    %14 = vector.broadcast %cst_8 : f32 to vector<32x1xf32>
    %15 = arith.addf %13, %14 : vector<32x1xf32>
    %16 = math.rsqrt %15 : vector<32x1xf32>
    %17 = vector.broadcast %16 : vector<32x1xf32> to vector<32x16xf32>
    %18 = arith.mulf %8, %17 : vector<32x16xf32>
    %19 = vector.broadcast %1 : vector<1x16xf32> to vector<32x16xf32>
    %20 = arith.mulf %18, %19 : vector<32x16xf32>
    %21 = vector.broadcast %2 : vector<1x16xf32> to vector<32x16xf32>
    %22 = arith.addf %20, %21 : vector<32x16xf32>
    %c0_9 = arith.constant 0 : index
    %c0_10 = arith.constant 0 : index
    %23 = vector.load %arg4[%c0_9, %c0_10] : memref<16x48xf32, #tpu.memory_space<vmem>>, vector<16x48xf32>
    %cst_11 = arith.constant dense<0.000000e+00> : vector<32x48xf32>
    %24 = tpu.matmul %22, %23, %cst_11 {dimension_numbers = #tpu.dot_dimension_numbers<[1], [0], [0], [1], [0, 0, 1, 1], [], []>} : vector<32x16xf32>, vector<16x48xf32>, vector<32x48xf32> -> vector<32x48xf32>
    %c0_12 = arith.constant 0 : index
    %c0_13 = arith.constant 0 : index
    %25 = vector.load %arg5[%c0_12, %c0_13] : memref<32x48xf32, #tpu.memory_space<vmem>>, vector<32x48xf32>
    tpu.vector_store %arg5[%c0_12, %c0_13], %24 {strides = array<i32>} : memref<32x48xf32, #tpu.memory_space<vmem>>, vector<32x48xf32>,
    return
  }
  func.func @transform_0(%arg0: i32) -> (i32, i32) {
    %c0_i32 = arith.constant 0 : i32
    %c0_i32_0 = arith.constant 0 : i32
    return %arg0, %c0_i32 : i32, i32
  }
  func.func @transform_1(%arg0: i32) -> (i32, i32) {
    %c0_i32 = arith.constant 0 : i32
    %c0_i32_0 = arith.constant 0 : i32
    %c0_i32_1 = arith.constant 0 : i32
    return %c0_i32, %c0_i32_0 : i32, i32
  }
  func.func @transform_2(%arg0: i32) -> (i32, i32) {
    %c0_i32 = arith.constant 0 : i32
    %c0_i32_0 = arith.constant 0 : i32
    %c0_i32_1 = arith.constant 0 : i32
    return %c0_i32, %c0_i32_0 : i32, i32
  }
  func.func @transform_3(%arg0: i32) -> (i32, i32) {
    %c0_i32 = arith.constant 0 : i32
    %c0_i32_0 = arith.constant 0 : i32
    %c0_i32_1 = arith.constant 0 : i32
    return %c0_i32, %c0_i32_0 : i32, i32
  }
  func.func @transform_4(%arg0: i32) -> (i32, i32) {
    %c0_i32 = arith.constant 0 : i32
    %c0_i32_0 = arith.constant 0 : i32
    return %arg0, %c0_i32 : i32, i32
  }
}

module attributes {stable_mosaic.version = 11 : i64} {
  func.func @_attn_kernel_nomask(%arg0: i32, %arg1: memref<32x4x4xf32, #tpu.memory_space<vmem>>, %arg2: memref<32x4x4xf32, #tpu.memory_space<vmem>>, %arg3: memref<32x4x4xf32, #tpu.memory_space<vmem>>, %arg4: memref<32x4x4xf32, #tpu.memory_space<vmem>>) attributes {dimension_semantics = [#tpu.dimension_semantics<parallel>], iteration_bounds = array<i64: 1>, scalar_prefetch = 0 : i64, scratch_operands = 0 : i64, tpu.core_type = #tpu.core_type<tc>, window_params = [{transform_indices = @transform_0, window_bounds = array<i64: 32, 4, 4>}, {transform_indices = @transform_1, window_bounds = array<i64: 32, 4, 4>}, {transform_indices = @transform_2, window_bounds = array<i64: 32, 4, 4>}, {transform_indices = @transform_3, window_bounds = array<i64: 32, 4, 4>}]} {
    %c0 = arith.constant 0 : index
    %c0_0 = arith.constant 0 : index
    %c0_1 = arith.constant 0 : index
    %0 = vector.load %arg1[%c0, %c0_0, %c0_1] : memref<32x4x4xf32, #tpu.memory_space<vmem>>, vector<32x4x4xf32>
    %c0_2 = arith.constant 0 : index
    %c0_3 = arith.constant 0 : index
    %c0_4 = arith.constant 0 : index
    %1 = vector.load %arg2[%c0_2, %c0_3, %c0_4] : memref<32x4x4xf32, #tpu.memory_space<vmem>>, vector<32x4x4xf32>
    "tpu.trace_start"() <{level = 10 : i32, message = "bqd,bkd->bqk"}> : () -> ()
    %cst = arith.constant dense<0.000000e+00> : vector<32x4x4xf32>
    %2 = tpu.matmul %0, %1, %cst {dimension_numbers = #tpu.dot_dimension_numbers<[2], [2], [1], [1], [0, 0, 0, 1, 1, 1], [0], [0]>} : vector<32x4x4xf32>, vector<32x4x4xf32>, vector<32x4x4xf32> -> vector<32x4x4xf32>
    "tpu.trace_stop"() : () -> ()
    %cst_5 = arith.constant 5.000000e-01 : f32
    %3 = vector.broadcast %cst_5 : f32 to vector<32x4x4xf32>
    %4 = arith.mulf %2, %3 : vector<32x4x4xf32>
    %cst_6 = arith.constant dense<0xFF800000> : vector<32x4xf32>
    %5 = vector.multi_reduction <maximumf>, %4, %cst_6 [2] : vector<32x4x4xf32> to vector<32x4xf32>
    %6 = vector.shape_cast %5 : vector<32x4xf32> to vector<32x4x1xf32>
    %7 = vector.broadcast %6 : vector<32x4x1xf32> to vector<32x4x4xf32>
    %8 = arith.subf %4, %7 : vector<32x4x4xf32>
    %9 = math.exp %8 : vector<32x4x4xf32>
    %cst_7 = arith.constant dense<0.000000e+00> : vector<32x4xf32>
    %10 = vector.multi_reduction <add>, %9, %cst_7 [2] : vector<32x4x4xf32> to vector<32x4xf32>
    %11 = vector.shape_cast %10 : vector<32x4xf32> to vector<32x4x1xf32>
    %12 = tpu.reciprocal %11 {approx = true} : vector<32x4x1xf32> -> vector<32x4x1xf32>
    %13 = vector.broadcast %12 : vector<32x4x1xf32> to vector<32x4x4xf32>
    %14 = arith.mulf %9, %13 : vector<32x4x4xf32>
    %c0_8 = arith.constant 0 : index
    %c0_9 = arith.constant 0 : index
    %c0_10 = arith.constant 0 : index
    %15 = vector.load %arg3[%c0_8, %c0_9, %c0_10] : memref<32x4x4xf32, #tpu.memory_space<vmem>>, vector<32x4x4xf32>
    "tpu.trace_start"() <{level = 10 : i32, message = "bqk,bkd->bqd"}> : () -> ()
    %cst_11 = arith.constant dense<0.000000e+00> : vector<32x4x4xf32>
    %16 = tpu.matmul %14, %15, %cst_11 {dimension_numbers = #tpu.dot_dimension_numbers<[2], [1], [1], [2], [0, 0, 0, 1, 1, 2], [0], [0]>} : vector<32x4x4xf32>, vector<32x4x4xf32>, vector<32x4x4xf32> -> vector<32x4x4xf32>
    "tpu.trace_stop"() : () -> ()
    %c0_12 = arith.constant 0 : index
    %c0_13 = arith.constant 0 : index
    %c0_14 = arith.constant 0 : index
    %17 = vector.load %arg4[%c0_12, %c0_13, %c0_14] : memref<32x4x4xf32, #tpu.memory_space<vmem>>, vector<32x4x4xf32>
    tpu.vector_store %arg4[%c0_12, %c0_13, %c0_14], %16 {strides = array<i32>} : memref<32x4x4xf32, #tpu.memory_space<vmem>>, vector<32x4x4xf32>,
    return
  }
  func.func @transform_0(%arg0: i32) -> (i32, i32, i32) {
    %c0_i32 = arith.constant 0 : i32
    %c0_i32_0 = arith.constant 0 : i32
    %c0_i32_1 = arith.constant 0 : i32
    return %arg0, %c0_i32, %c0_i32_0 : i32, i32, i32
  }
  func.func @transform_1(%arg0: i32) -> (i32, i32, i32) {
    %c0_i32 = arith.constant 0 : i32
    %c0_i32_0 = arith.constant 0 : i32
    %c0_i32_1 = arith.constant 0 : i32
    return %arg0, %c0_i32, %c0_i32_0 : i32, i32, i32
  }
  func.func @transform_2(%arg0: i32) -> (i32, i32, i32) {
    %c0_i32 = arith.constant 0 : i32
    %c0_i32_0 = arith.constant 0 : i32
    %c0_i32_1 = arith.constant 0 : i32
    return %arg0, %c0_i32, %c0_i32_0 : i32, i32, i32
  }
  func.func @transform_3(%arg0: i32) -> (i32, i32, i32) {
    %c0_i32 = arith.constant 0 : i32
    %c0_i32_0 = arith.constant 0 : i32
    %c0_i32_1 = arith.constant 0 : i32
    return %arg0, %c0_i32, %c0_i32_0 : i32, i32, i32
  }
}

module attributes {stable_mosaic.version = 11 : i64} {
  func.func @_linear_residual_kernel(%arg0: i32, %arg1: memref<32x16xf32, #tpu.memory_space<vmem>>, %arg2: memref<16x16xf32, #tpu.memory_space<vmem>>, %arg3: memref<1x16xf32, #tpu.memory_space<vmem>>, %arg4: memref<32x16xf32, #tpu.memory_space<vmem>>, %arg5: memref<32x16xf32, #tpu.memory_space<vmem>>) attributes {dimension_semantics = [#tpu.dimension_semantics<parallel>], iteration_bounds = array<i64: 1>, scalar_prefetch = 0 : i64, scratch_operands = 0 : i64, tpu.core_type = #tpu.core_type<tc>, window_params = [{transform_indices = @transform_0, window_bounds = array<i64: 32, 16>}, {pipeline_mode = #tpu.pipeline_mode<synchronous>, transform_indices = @transform_1, window_bounds = array<i64: 16, 16>}, {pipeline_mode = #tpu.pipeline_mode<synchronous>, transform_indices = @transform_2, window_bounds = array<i64: 1, 16>}, {transform_indices = @transform_3, window_bounds = array<i64: 32, 16>}, {transform_indices = @transform_4, window_bounds = array<i64: 32, 16>}]} {
    %c0 = arith.constant 0 : index
    %c0_0 = arith.constant 0 : index
    %0 = vector.load %arg1[%c0, %c0_0] : memref<32x16xf32, #tpu.memory_space<vmem>>, vector<32x16xf32>
    %c0_1 = arith.constant 0 : index
    %c0_2 = arith.constant 0 : index
    %1 = vector.load %arg2[%c0_1, %c0_2] : memref<16x16xf32, #tpu.memory_space<vmem>>, vector<16x16xf32>
    %cst = arith.constant dense<0.000000e+00> : vector<32x16xf32>
    %2 = tpu.matmul %0, %1, %cst {dimension_numbers = #tpu.dot_dimension_numbers<[1], [0], [0], [1], [0, 0, 1, 1], [], []>} : vector<32x16xf32>, vector<16x16xf32>, vector<32x16xf32> -> vector<32x16xf32>
    %c0_3 = arith.constant 0 : index
    %c0_4 = arith.constant 0 : index
    %3 = vector.load %arg4[%c0_3, %c0_4] : memref<32x16xf32, #tpu.memory_space<vmem>>, vector<32x16xf32>
    %4 = arith.addf %3, %2 : vector<32x16xf32>
    %c0_5 = arith.constant 0 : index
    %c0_6 = arith.constant 0 : index
    %5 = vector.load %arg3[%c0_5, %c0_6] : memref<1x16xf32, #tpu.memory_space<vmem>>, vector<1x16xf32>
    %6 = vector.broadcast %5 : vector<1x16xf32> to vector<32x16xf32>
    %7 = arith.addf %4, %6 : vector<32x16xf32>
    %c0_7 = arith.constant 0 : index
    %c0_8 = arith.constant 0 : index
    %8 = vector.load %arg5[%c0_7, %c0_8] : memref<32x16xf32, #tpu.memory_space<vmem>>, vector<32x16xf32>
    tpu.vector_store %arg5[%c0_7, %c0_8], %7 {strides = array<i32>} : memref<32x16xf32, #tpu.memory_space<vmem>>, vector<32x16xf32>,
    return
  }
  func.func @transform_0(%arg0: i32) -> (i32, i32) {
    %c0_i32 = arith.constant 0 : i32
    %c0_i32_0 = arith.constant 0 : i32
    return %arg0, %c0_i32 : i32, i32
  }
  func.func @transform_1(%arg0: i32) -> (i32, i32) {
    %c0_i32 = arith.constant 0 : i32
    %c0_i32_0 = arith.constant 0 : i32
    %c0_i32_1 = arith.constant 0 : i32
    return %c0_i32, %c0_i32_0 : i32, i32
  }
  func.func @transform_2(%arg0: i32) -> (i32, i32) {
    %c0_i32 = arith.constant 0 : i32
    %c0_i32_0 = arith.constant 0 : i32
    %c0_i32_1 = arith.constant 0 : i32
    return %c0_i32, %c0_i32_0 : i32, i32
  }
  func.func @transform_3(%arg0: i32) -> (i32, i32) {
    %c0_i32 = arith.constant 0 : i32
    %c0_i32_0 = arith.constant 0 : i32
    return %arg0, %c0_i32 : i32, i32
  }
  func.func @transform_4(%arg0: i32) -> (i32, i32) {
    %c0_i32 = arith.constant 0 : i32
    %c0_i32_0 = arith.constant 0 : i32
    return %arg0, %c0_i32 : i32, i32
  }
}

module attributes {stable_mosaic.version = 11 : i64} {
  func.func @_ln_mlp_residual_kernel(%arg0: i32, %arg1: memref<32x16xf32, #tpu.memory_space<vmem>>, %arg2: memref<1x16xf32, #tpu.memory_space<vmem>>, %arg3: memref<1x16xf32, #tpu.memory_space<vmem>>, %arg4: memref<16x64xf32, #tpu.memory_space<vmem>>, %arg5: memref<1x64xf32, #tpu.memory_space<vmem>>, %arg6: memref<64x16xf32, #tpu.memory_space<vmem>>, %arg7: memref<1x16xf32, #tpu.memory_space<vmem>>, %arg8: memref<32x16xf32, #tpu.memory_space<vmem>>) attributes {dimension_semantics = [#tpu.dimension_semantics<parallel>], iteration_bounds = array<i64: 1>, scalar_prefetch = 0 : i64, scratch_operands = 0 : i64, tpu.core_type = #tpu.core_type<tc>, window_params = [{transform_indices = @transform_0, window_bounds = array<i64: 32, 16>}, {pipeline_mode = #tpu.pipeline_mode<synchronous>, transform_indices = @transform_1, window_bounds = array<i64: 1, 16>}, {pipeline_mode = #tpu.pipeline_mode<synchronous>, transform_indices = @transform_2, window_bounds = array<i64: 1, 16>}, {pipeline_mode = #tpu.pipeline_mode<synchronous>, transform_indices = @transform_3, window_bounds = array<i64: 16, 64>}, {pipeline_mode = #tpu.pipeline_mode<synchronous>, transform_indices = @transform_4, window_bounds = array<i64: 1, 64>}, {pipeline_mode = #tpu.pipeline_mode<synchronous>, transform_indices = @transform_5, window_bounds = array<i64: 64, 16>}, {pipeline_mode = #tpu.pipeline_mode<synchronous>, transform_indices = @transform_6, window_bounds = array<i64: 1, 16>}, {transform_indices = @transform_7, window_bounds = array<i64: 32, 16>}]} {
    %c0 = arith.constant 0 : index
    %c0_0 = arith.constant 0 : index
    %0 = vector.load %arg1[%c0, %c0_0] : memref<32x16xf32, #tpu.memory_space<vmem>>, vector<32x16xf32>
    %c0_1 = arith.constant 0 : index
    %c0_2 = arith.constant 0 : index
    %1 = vector.load %arg2[%c0_1, %c0_2] : memref<1x16xf32, #tpu.memory_space<vmem>>, vector<1x16xf32>
    %c0_3 = arith.constant 0 : index
    %c0_4 = arith.constant 0 : index
    %2 = vector.load %arg3[%c0_3, %c0_4] : memref<1x16xf32, #tpu.memory_space<vmem>>, vector<1x16xf32>
    %cst = arith.constant dense<0.000000e+00> : vector<32xf32>
    %3 = vector.multi_reduction <add>, %0, %cst [1] : vector<32x16xf32> to vector<32xf32>
    %4 = vector.shape_cast %3 : vector<32xf32> to vector<32x1xf32>
    %cst_5 = arith.constant 1.600000e+01 : f32
    %5 = vector.broadcast %cst_5 : f32 to vector<32x1xf32>
    %6 = arith.divf %4, %5 : vector<32x1xf32>
    %7 = vector.broadcast %6 : vector<32x1xf32> to vector<32x16xf32>
    %8 = arith.subf %0, %7 : vector<32x16xf32>
    %9 = arith.mulf %8, %8 : vector<32x16xf32>
    %cst_6 = arith.constant dense<0.000000e+00> : vector<32xf32>
    %10 = vector.multi_reduction <add>, %9, %cst_6 [1] : vector<32x16xf32> to vector<32xf32>
    %11 = vector.shape_cast %10 : vector<32xf32> to vector<32x1xf32>
    %cst_7 = arith.constant 1.600000e+01 : f32
    %12 = vector.broadcast %cst_7 : f32 to vector<32x1xf32>
    %13 = arith.divf %11, %12 : vector<32x1xf32>
    %cst_8 = arith.constant 9.99999974E-6 : f32
    %14 = vector.broadcast %cst_8 : f32 to vector<32x1xf32>
    %15 = arith.addf %13, %14 : vector<32x1xf32>
    %16 = math.rsqrt %15 : vector<32x1xf32>
    %17 = vector.broadcast %16 : vector<32x1xf32> to vector<32x16xf32>
    %18 = arith.mulf %8, %17 : vector<32x16xf32>
    %19 = vector.broadcast %1 : vector<1x16xf32> to vector<32x16xf32>
    %20 = arith.mulf %18, %19 : vector<32x16xf32>
    %21 = vector.broadcast %2 : vector<1x16xf32> to vector<32x16xf32>
    %22 = arith.addf %20, %21 : vector<32x16xf32>
    %c0_9 = arith.constant 0 : index
    %c0_10 = arith.constant 0 : index
    %23 = vector.load %arg4[%c0_9, %c0_10] : memref<16x64xf32, #tpu.memory_space<vmem>>, vector<16x64xf32>
    %cst_11 = arith.constant dense<0.000000e+00> : vector<32x64xf32>
    %24 = tpu.matmul %22, %23, %cst_11 {dimension_numbers = #tpu.dot_dimension_numbers<[1], [0], [0], [1], [0, 0, 1, 1], [], []>} : vector<32x16xf32>, vector<16x64xf32>, vector<32x64xf32> -> vector<32x64xf32>
    %c0_12 = arith.constant 0 : index
    %c0_13 = arith.constant 0 : index
    %25 = vector.load %arg5[%c0_12, %c0_13] : memref<1x64xf32, #tpu.memory_space<vmem>>, vector<1x64xf32>
    %26 = vector.broadcast %25 : vector<1x64xf32> to vector<32x64xf32>
    %27 = arith.addf %24, %26 : vector<32x64xf32>
    %cst_14 = arith.constant 5.000000e-01 : f32
    %28 = vector.broadcast %cst_14 : f32 to vector<32x64xf32>
    %29 = arith.mulf %28, %27 : vector<32x64xf32>
    %cst_15 = arith.constant 0.707106769 : f32
    %30 = vector.broadcast %cst_15 : f32 to vector<32x64xf32>
    %31 = arith.mulf %27, %30 : vector<32x64xf32>
    %32 = math.erf %31 : vector<32x64xf32>
    %cst_16 = arith.constant 1.000000e+00 : f32
    %33 = vector.broadcast %cst_16 : f32 to vector<32x64xf32>
    %34 = arith.addf %33, %32 : vector<32x64xf32>
    %35 = arith.mulf %29, %34 : vector<32x64xf32>
    %c0_17 = arith.constant 0 : index
    %c0_18 = arith.constant 0 : index
    %36 = vector.load %arg6[%c0_17, %c0_18] : memref<64x16xf32, #tpu.memory_space<vmem>>, vector<64x16xf32>
    %cst_19 = arith.constant dense<0.000000e+00> : vector<32x16xf32>
    %37 = tpu.matmul %35, %36, %cst_19 {dimension_numbers = #tpu.dot_dimension_numbers<[1], [0], [0], [1], [0, 0, 1, 1], [], []>} : vector<32x64xf32>, vector<64x16xf32>, vector<32x16xf32> -> vector<32x16xf32>
    %c0_20 = arith.constant 0 : index
    %c0_21 = arith.constant 0 : index
    %38 = vector.load %arg7[%c0_20, %c0_21] : memref<1x16xf32, #tpu.memory_space<vmem>>, vector<1x16xf32>
    %39 = vector.broadcast %38 : vector<1x16xf32> to vector<32x16xf32>
    %40 = arith.addf %37, %39 : vector<32x16xf32>
    %41 = arith.addf %0, %40 : vector<32x16xf32>
    %c0_22 = arith.constant 0 : index
    %c0_23 = arith.constant 0 : index
    %42 = vector.load %arg8[%c0_22, %c0_23] : memref<32x16xf32, #tpu.memory_space<vmem>>, vector<32x16xf32>
    tpu.vector_store %arg8[%c0_22, %c0_23], %41 {strides = array<i32>} : memref<32x16xf32, #tpu.memory_space<vmem>>, vector<32x16xf32>,
    return
  }
  func.func @transform_0(%arg0: i32) -> (i32, i32) {
    %c0_i32 = arith.constant 0 : i32
    %c0_i32_0 = arith.constant 0 : i32
    return %arg0, %c0_i32 : i32, i32
  }
  func.func @transform_1(%arg0: i32) -> (i32, i32) {
    %c0_i32 = arith.constant 0 : i32
    %c0_i32_0 = arith.constant 0 : i32
    %c0_i32_1 = arith.constant 0 : i32
    return %c0_i32, %c0_i32_0 : i32, i32
  }
  func.func @transform_2(%arg0: i32) -> (i32, i32) {
    %c0_i32 = arith.constant 0 : i32
    %c0_i32_0 = arith.constant 0 : i32
    %c0_i32_1 = arith.constant 0 : i32
    return %c0_i32, %c0_i32_0 : i32, i32
  }
  func.func @transform_3(%arg0: i32) -> (i32, i32) {
    %c0_i32 = arith.constant 0 : i32
    %c0_i32_0 = arith.constant 0 : i32
    %c0_i32_1 = arith.constant 0 : i32
    return %c0_i32, %c0_i32_0 : i32, i32
  }
  func.func @transform_4(%arg0: i32) -> (i32, i32) {
    %c0_i32 = arith.constant 0 : i32
    %c0_i32_0 = arith.constant 0 : i32
    %c0_i32_1 = arith.constant 0 : i32
    return %c0_i32, %c0_i32_0 : i32, i32
  }
  func.func @transform_5(%arg0: i32) -> (i32, i32) {
    %c0_i32 = arith.constant 0 : i32
    %c0_i32_0 = arith.constant 0 : i32
    %c0_i32_1 = arith.constant 0 : i32
    return %c0_i32, %c0_i32_0 : i32, i32
  }
  func.func @transform_6(%arg0: i32) -> (i32, i32) {
    %c0_i32 = arith.constant 0 : i32
    %c0_i32_0 = arith.constant 0 : i32
    %c0_i32_1 = arith.constant 0 : i32
    return %c0_i32, %c0_i32_0 : i32, i32
  }
  func.func @transform_7(%arg0: i32) -> (i32, i32) {
    %c0_i32 = arith.constant 0 : i32
    %c0_i32_0 = arith.constant 0 : i32
    return %arg0, %c0_i32 : i32, i32
  }
}

module attributes {stable_mosaic.version = 11 : i64} {
  func.func @_ln_proj_residual_kernel(%arg0: i32, %arg1: memref<8x4x16xf32, #tpu.memory_space<vmem>>, %arg2: memref<1x16xf32, #tpu.memory_space<vmem>>, %arg3: memref<1x16xf32, #tpu.memory_space<vmem>>, %arg4: memref<64x32xf32, #tpu.memory_space<vmem>>, %arg5: memref<1x32xf32, #tpu.memory_space<vmem>>, %arg6: memref<8x32xf32, #tpu.memory_space<vmem>>, %arg7: memref<8x32xf32, #tpu.memory_space<vmem>>) attributes {dimension_semantics = [#tpu.dimension_semantics<parallel>], iteration_bounds = array<i64: 1>, scalar_prefetch = 0 : i64, scratch_operands = 0 : i64, tpu.core_type = #tpu.core_type<tc>, window_params = [{transform_indices = @transform_0, window_bounds = array<i64: 8, 4, 16>}, {pipeline_mode = #tpu.pipeline_mode<synchronous>, transform_indices = @transform_1, window_bounds = array<i64: 1, 16>}, {pipeline_mode = #tpu.pipeline_mode<synchronous>, transform_indices = @transform_2, window_bounds = array<i64: 1, 16>}, {pipeline_mode = #tpu.pipeline_mode<synchronous>, transform_indices = @transform_3, window_bounds = array<i64: 64, 32>}, {pipeline_mode = #tpu.pipeline_mode<synchronous>, transform_indices = @transform_4, window_bounds = array<i64: 1, 32>}, {transform_indices = @transform_5, window_bounds = array<i64: 8, 32>}, {transform_indices = @transform_6, window_bounds = array<i64: 8, 32>}]} {
    %c0 = arith.constant 0 : index
    %c0_0 = arith.constant 0 : index
    %0 = vector.load %arg2[%c0, %c0_0] : memref<1x16xf32, #tpu.memory_space<vmem>>, vector<1x16xf32>
    %c0_1 = arith.constant 0 : index
    %c0_2 = arith.constant 0 : index
    %1 = vector.load %arg3[%c0_1, %c0_2] : memref<1x16xf32, #tpu.memory_space<vmem>>, vector<1x16xf32>
    %c0_3 = arith.constant 0 : index
    %c0_4 = arith.constant 0 : index
    %2 = vector.load %arg4[%c0_3, %c0_4] : memref<64x32xf32, #tpu.memory_space<vmem>>, vector<64x32xf32>
    %c0_5 = arith.constant 0 : index
    %c0_6 = arith.constant 0 : index
    %3 = vector.load %arg6[%c0_5, %c0_6] : memref<8x32xf32, #tpu.memory_space<vmem>>, vector<8x32xf32>
    %c0_7 = arith.constant 0 : index
    %c0_8 = arith.constant 0 : index
    %4 = vector.load %arg5[%c0_7, %c0_8] : memref<1x32xf32, #tpu.memory_space<vmem>>, vector<1x32xf32>
    %5 = vector.broadcast %4 : vector<1x32xf32> to vector<8x32xf32>
    %6 = arith.addf %3, %5 : vector<8x32xf32>
    %c0_9 = arith.constant 0 : index
    %c0_10 = arith.constant 0 : index
    %c0_11 = arith.constant 0 : index
    %7 = vector.load %arg1[%c0_9, %c0_10, %c0_11] : memref<8x4x16xf32, #tpu.memory_space<vmem>>, vector<8x1x16xf32>
    %8 = vector.shape_cast %7 : vector<8x1x16xf32> to vector<8x16xf32>
    %cst = arith.constant dense<0.000000e+00> : vector<8xf32>
    %9 = vector.multi_reduction <add>, %8, %cst [1] : vector<8x16xf32> to vector<8xf32>
    %10 = vector.shape_cast %9 : vector<8xf32> to vector<8x1xf32>
    %cst_12 = arith.constant 1.600000e+01 : f32
    %11 = vector.broadcast %cst_12 : f32 to vector<8x1xf32>
    %12 = arith.divf %10, %11 : vector<8x1xf32>
    %13 = vector.broadcast %12 : vector<8x1xf32> to vector<8x16xf32>
    %14 = arith.subf %8, %13 : vector<8x16xf32>
    %15 = arith.mulf %14, %14 : vector<8x16xf32>
    %cst_13 = arith.constant dense<0.000000e+00> : vector<8xf32>
    %16 = vector.multi_reduction <add>, %15, %cst_13 [1] : vector<8x16xf32> to vector<8xf32>
    %17 = vector.shape_cast %16 : vector<8xf32> to vector<8x1xf32>
    %cst_14 = arith.constant 1.600000e+01 : f32
    %18 = vector.broadcast %cst_14 : f32 to vector<8x1xf32>
    %19 = arith.divf %17, %18 : vector<8x1xf32>
    %cst_15 = arith.constant 9.99999974E-6 : f32
    %20 = vector.broadcast %cst_15 : f32 to vector<8x1xf32>
    %21 = arith.addf %19, %20 : vector<8x1xf32>
    %22 = math.rsqrt %21 : vector<8x1xf32>
    %23 = vector.broadcast %22 : vector<8x1xf32> to vector<8x16xf32>
    %24 = arith.mulf %14, %23 : vector<8x16xf32>
    %25 = vector.broadcast %0 : vector<1x16xf32> to vector<8x16xf32>
    %26 = arith.mulf %24, %25 : vector<8x16xf32>
    %27 = vector.broadcast %1 : vector<1x16xf32> to vector<8x16xf32>
    %28 = arith.addf %26, %27 : vector<8x16xf32>
    %29 = vector.extract_strided_slice %2 {offsets = [0, 0], sizes = [16, 32], strides = [1, 1]} : vector<64x32xf32> to vector<16x32xf32>
    %cst_16 = arith.constant dense<0.000000e+00> : vector<8x32xf32>
    %30 = tpu.matmul %28, %29, %cst_16 {dimension_numbers = #tpu.dot_dimension_numbers<[1], [0], [0], [1], [0, 0, 1, 1], [], []>} : vector<8x16xf32>, vector<16x32xf32>, vector<8x32xf32> -> vector<8x32xf32>
    %31 = arith.addf %6, %30 : vector<8x32xf32>
    %c0_17 = arith.constant 0 : index
    %c1 = arith.constant 1 : index
    %c0_18 = arith.constant 0 : index
    %32 = vector.load %arg1[%c0_17, %c1, %c0_18] : memref<8x4x16xf32, #tpu.memory_space<vmem>>, vector<8x1x16xf32>
    %33 = vector.shape_cast %32 : vector<8x1x16xf32> to vector<8x16xf32>
    %cst_19 = arith.constant dense<0.000000e+00> : vector<8xf32>
    %34 = vector.multi_reduction <add>, %33, %cst_19 [1] : vector<8x16xf32> to vector<8xf32>
    %35 = vector.shape_cast %34 : vector<8xf32> to vector<8x1xf32>
    %cst_20 = arith.constant 1.600000e+01 : f32
    %36 = vector.broadcast %cst_20 : f32 to vector<8x1xf32>
    %37 = arith.divf %35, %36 : vector<8x1xf32>
    %38 = vector.broadcast %37 : vector<8x1xf32> to vector<8x16xf32>
    %39 = arith.subf %33, %38 : vector<8x16xf32>
    %40 = arith.mulf %39, %39 : vector<8x16xf32>
    %cst_21 = arith.constant dense<0.000000e+00> : vector<8xf32>
    %41 = vector.multi_reduction <add>, %40, %cst_21 [1] : vector<8x16xf32> to vector<8xf32>
    %42 = vector.shape_cast %41 : vector<8xf32> to vector<8x1xf32>
    %cst_22 = arith.constant 1.600000e+01 : f32
    %43 = vector.broadcast %cst_22 : f32 to vector<8x1xf32>
    %44 = arith.divf %42, %43 : vector<8x1xf32>
    %cst_23 = arith.constant 9.99999974E-6 : f32
    %45 = vector.broadcast %cst_23 : f32 to vector<8x1xf32>
    %46 = arith.addf %44, %45 : vector<8x1xf32>
    %47 = math.rsqrt %46 : vector<8x1xf32>
    %48 = vector.broadcast %47 : vector<8x1xf32> to vector<8x16xf32>
    %49 = arith.mulf %39, %48 : vector<8x16xf32>
    %50 = vector.broadcast %0 : vector<1x16xf32> to vector<8x16xf32>
    %51 = arith.mulf %49, %50 : vector<8x16xf32>
    %52 = vector.broadcast %1 : vector<1x16xf32> to vector<8x16xf32>
    %53 = arith.addf %51, %52 : vector<8x16xf32>
    %54 = vector.extract_strided_slice %2 {offsets = [16, 0], sizes = [16, 32], strides = [1, 1]} : vector<64x32xf32> to vector<16x32xf32>
    %cst_24 = arith.constant dense<0.000000e+00> : vector<8x32xf32>
    %55 = tpu.matmul %53, %54, %cst_24 {dimension_numbers = #tpu.dot_dimension_numbers<[1], [0], [0], [1], [0, 0, 1, 1], [], []>} : vector<8x16xf32>, vector<16x32xf32>, vector<8x32xf32> -> vector<8x32xf32>
    %56 = arith.addf %31, %55 : vector<8x32xf32>
    %c0_25 = arith.constant 0 : index
    %c2 = arith.constant 2 : index
    %c0_26 = arith.constant 0 : index
    %57 = vector.load %arg1[%c0_25, %c2, %c0_26] : memref<8x4x16xf32, #tpu.memory_space<vmem>>, vector<8x1x16xf32>
    %58 = vector.shape_cast %57 : vector<8x1x16xf32> to vector<8x16xf32>
    %cst_27 = arith.constant dense<0.000000e+00> : vector<8xf32>
    %59 = vector.multi_reduction <add>, %58, %cst_27 [1] : vector<8x16xf32> to vector<8xf32>
    %60 = vector.shape_cast %59 : vector<8xf32> to vector<8x1xf32>
    %cst_28 = arith.constant 1.600000e+01 : f32
    %61 = vector.broadcast %cst_28 : f32 to vector<8x1xf32>
    %62 = arith.divf %60, %61 : vector<8x1xf32>
    %63 = vector.broadcast %62 : vector<8x1xf32> to vector<8x16xf32>
    %64 = arith.subf %58, %63 : vector<8x16xf32>
    %65 = arith.mulf %64, %64 : vector<8x16xf32>
    %cst_29 = arith.constant dense<0.000000e+00> : vector<8xf32>
    %66 = vector.multi_reduction <add>, %65, %cst_29 [1] : vector<8x16xf32> to vector<8xf32>
    %67 = vector.shape_cast %66 : vector<8xf32> to vector<8x1xf32>
    %cst_30 = arith.constant 1.600000e+01 : f32
    %68 = vector.broadcast %cst_30 : f32 to vector<8x1xf32>
    %69 = arith.divf %67, %68 : vector<8x1xf32>
    %cst_31 = arith.constant 9.99999974E-6 : f32
    %70 = vector.broadcast %cst_31 : f32 to vector<8x1xf32>
    %71 = arith.addf %69, %70 : vector<8x1xf32>
    %72 = math.rsqrt %71 : vector<8x1xf32>
    %73 = vector.broadcast %72 : vector<8x1xf32> to vector<8x16xf32>
    %74 = arith.mulf %64, %73 : vector<8x16xf32>
    %75 = vector.broadcast %0 : vector<1x16xf32> to vector<8x16xf32>
    %76 = arith.mulf %74, %75 : vector<8x16xf32>
    %77 = vector.broadcast %1 : vector<1x16xf32> to vector<8x16xf32>
    %78 = arith.addf %76, %77 : vector<8x16xf32>
    %79 = vector.extract_strided_slice %2 {offsets = [32, 0], sizes = [16, 32], strides = [1, 1]} : vector<64x32xf32> to vector<16x32xf32>
    %cst_32 = arith.constant dense<0.000000e+00> : vector<8x32xf32>
    %80 = tpu.matmul %78, %79, %cst_32 {dimension_numbers = #tpu.dot_dimension_numbers<[1], [0], [0], [1], [0, 0, 1, 1], [], []>} : vector<8x16xf32>, vector<16x32xf32>, vector<8x32xf32> -> vector<8x32xf32>
    %81 = arith.addf %56, %80 : vector<8x32xf32>
    %c0_33 = arith.constant 0 : index
    %c3 = arith.constant 3 : index
    %c0_34 = arith.constant 0 : index
    %82 = vector.load %arg1[%c0_33, %c3, %c0_34] : memref<8x4x16xf32, #tpu.memory_space<vmem>>, vector<8x1x16xf32>
    %83 = vector.shape_cast %82 : vector<8x1x16xf32> to vector<8x16xf32>
    %cst_35 = arith.constant dense<0.000000e+00> : vector<8xf32>
    %84 = vector.multi_reduction <add>, %83, %cst_35 [1] : vector<8x16xf32> to vector<8xf32>
    %85 = vector.shape_cast %84 : vector<8xf32> to vector<8x1xf32>
    %cst_36 = arith.constant 1.600000e+01 : f32
    %86 = vector.broadcast %cst_36 : f32 to vector<8x1xf32>
    %87 = arith.divf %85, %86 : vector<8x1xf32>
    %88 = vector.broadcast %87 : vector<8x1xf32> to vector<8x16xf32>
    %89 = arith.subf %83, %88 : vector<8x16xf32>
    %90 = arith.mulf %89, %89 : vector<8x16xf32>
    %cst_37 = arith.constant dense<0.000000e+00> : vector<8xf32>
    %91 = vector.multi_reduction <add>, %90, %cst_37 [1] : vector<8x16xf32> to vector<8xf32>
    %92 = vector.shape_cast %91 : vector<8xf32> to vector<8x1xf32>
    %cst_38 = arith.constant 1.600000e+01 : f32
    %93 = vector.broadcast %cst_38 : f32 to vector<8x1xf32>
    %94 = arith.divf %92, %93 : vector<8x1xf32>
    %cst_39 = arith.constant 9.99999974E-6 : f32
    %95 = vector.broadcast %cst_39 : f32 to vector<8x1xf32>
    %96 = arith.addf %94, %95 : vector<8x1xf32>
    %97 = math.rsqrt %96 : vector<8x1xf32>
    %98 = vector.broadcast %97 : vector<8x1xf32> to vector<8x16xf32>
    %99 = arith.mulf %89, %98 : vector<8x16xf32>
    %100 = vector.broadcast %0 : vector<1x16xf32> to vector<8x16xf32>
    %101 = arith.mulf %99, %100 : vector<8x16xf32>
    %102 = vector.broadcast %1 : vector<1x16xf32> to vector<8x16xf32>
    %103 = arith.addf %101, %102 : vector<8x16xf32>
    %104 = vector.extract_strided_slice %2 {offsets = [48, 0], sizes = [16, 32], strides = [1, 1]} : vector<64x32xf32> to vector<16x32xf32>
    %cst_40 = arith.constant dense<0.000000e+00> : vector<8x32xf32>
    %105 = tpu.matmul %103, %104, %cst_40 {dimension_numbers = #tpu.dot_dimension_numbers<[1], [0], [0], [1], [0, 0, 1, 1], [], []>} : vector<8x16xf32>, vector<16x32xf32>, vector<8x32xf32> -> vector<8x32xf32>
    %106 = arith.addf %81, %105 : vector<8x32xf32>
    %c0_41 = arith.constant 0 : index
    %c0_42 = arith.constant 0 : index
    %107 = vector.load %arg7[%c0_41, %c0_42] : memref<8x32xf32, #tpu.memory_space<vmem>>, vector<8x32xf32>
    tpu.vector_store %arg7[%c0_41, %c0_42], %106 {strides = array<i32>} : memref<8x32xf32, #tpu.memory_space<vmem>>, vector<8x32xf32>,
    return
  }
  func.func @transform_0(%arg0: i32) -> (i32, i32, i32) {
    %c0_i32 = arith.constant 0 : i32
    %c0_i32_0 = arith.constant 0 : i32
    %c0_i32_1 = arith.constant 0 : i32
    return %arg0, %c0_i32, %c0_i32_0 : i32, i32, i32
  }
  func.func @transform_1(%arg0: i32) -> (i32, i32) {
    %c0_i32 = arith.constant 0 : i32
    %c0_i32_0 = arith.constant 0 : i32
    %c0_i32_1 = arith.constant 0 : i32
    return %c0_i32, %c0_i32_0 : i32, i32
  }
  func.func @transform_2(%arg0: i32) -> (i32, i32) {
    %c0_i32 = arith.constant 0 : i32
    %c0_i32_0 = arith.constant 0 : i32
    %c0_i32_1 = arith.constant 0 : i32
    return %c0_i32, %c0_i32_0 : i32, i32
  }
  func.func @transform_3(%arg0: i32) -> (i32, i32) {
    %c0_i32 = arith.constant 0 : i32
    %c0_i32_0 = arith.constant 0 : i32
    %c0_i32_1 = arith.constant 0 : i32
    return %c0_i32, %c0_i32_0 : i32, i32
  }
  func.func @transform_4(%arg0: i32) -> (i32, i32) {
    %c0_i32 = arith.constant 0 : i32
    %c0_i32_0 = arith.constant 0 : i32
    %c0_i32_1 = arith.constant 0 : i32
    return %c0_i32, %c0_i32_0 : i32, i32
  }
  func.func @transform_5(%arg0: i32) -> (i32, i32) {
    %c0_i32 = arith.constant 0 : i32
    %c0_i32_0 = arith.constant 0 : i32
    return %arg0, %c0_i32 : i32, i32
  }
  func.func @transform_6(%arg0: i32) -> (i32, i32) {
    %c0_i32 = arith.constant 0 : i32
    %c0_i32_0 = arith.constant 0 : i32
    return %arg0, %c0_i32 : i32, i32
  }
}

module attributes {stable_mosaic.version = 11 : i64} {
  func.func @_ln_matmul_kernel(%arg0: i32, %arg1: memref<10x32xf32, #tpu.memory_space<vmem>>, %arg2: memref<1x32xf32, #tpu.memory_space<vmem>>, %arg3: memref<1x32xf32, #tpu.memory_space<vmem>>, %arg4: memref<32x96xf32, #tpu.memory_space<vmem>>, %arg5: memref<10x96xf32, #tpu.memory_space<vmem>>) attributes {dimension_semantics = [#tpu.dimension_semantics<parallel>], iteration_bounds = array<i64: 1>, scalar_prefetch = 0 : i64, scratch_operands = 0 : i64, tpu.core_type = #tpu.core_type<tc>, window_params = [{transform_indices = @transform_0, window_bounds = array<i64: 10, 32>}, {pipeline_mode = #tpu.pipeline_mode<synchronous>, transform_indices = @transform_1, window_bounds = array<i64: 1, 32>}, {pipeline_mode = #tpu.pipeline_mode<synchronous>, transform_indices = @transform_2, window_bounds = array<i64: 1, 32>}, {pipeline_mode = #tpu.pipeline_mode<synchronous>, transform_indices = @transform_3, window_bounds = array<i64: 32, 96>}, {transform_indices = @transform_4, window_bounds = array<i64: 10, 96>}]} {
    %c0 = arith.constant 0 : index
    %c0_0 = arith.constant 0 : index
    %0 = vector.load %arg1[%c0, %c0_0] : memref<10x32xf32, #tpu.memory_space<vmem>>, vector<10x32xf32>
    %c0_1 = arith.constant 0 : index
    %c0_2 = arith.constant 0 : index
    %1 = vector.load %arg2[%c0_1, %c0_2] : memref<1x32xf32, #tpu.memory_space<vmem>>, vector<1x32xf32>
    %c0_3 = arith.constant 0 : index
    %c0_4 = arith.constant 0 : index
    %2 = vector.load %arg3[%c0_3, %c0_4] : memref<1x32xf32, #tpu.memory_space<vmem>>, vector<1x32xf32>
    %cst = arith.constant dense<0.000000e+00> : vector<10xf32>
    %3 = vector.multi_reduction <add>, %0, %cst [1] : vector<10x32xf32> to vector<10xf32>
    %4 = vector.shape_cast %3 : vector<10xf32> to vector<10x1xf32>
    %cst_5 = arith.constant 3.200000e+01 : f32
    %5 = vector.broadcast %cst_5 : f32 to vector<10x1xf32>
    %6 = arith.divf %4, %5 : vector<10x1xf32>
    %7 = vector.broadcast %6 : vector<10x1xf32> to vector<10x32xf32>
    %8 = arith.subf %0, %7 : vector<10x32xf32>
    %9 = arith.mulf %8, %8 : vector<10x32xf32>
    %cst_6 = arith.constant dense<0.000000e+00> : vector<10xf32>
    %10 = vector.multi_reduction <add>, %9, %cst_6 [1] : vector<10x32xf32> to vector<10xf32>
    %11 = vector.shape_cast %10 : vector<10xf32> to vector<10x1xf32>
    %cst_7 = arith.constant 3.200000e+01 : f32
    %12 = vector.broadcast %cst_7 : f32 to vector<10x1xf32>
    %13 = arith.divf %11, %12 : vector<10x1xf32>
    %cst_8 = arith.constant 9.99999974E-6 : f32
    %14 = vector.broadcast %cst_8 : f32 to vector<10x1xf32>
    %15 = arith.addf %13, %14 : vector<10x1xf32>
    %16 = math.rsqrt %15 : vector<10x1xf32>
    %17 = vector.broadcast %16 : vector<10x1xf32> to vector<10x32xf32>
    %18 = arith.mulf %8, %17 : vector<10x32xf32>
    %19 = vector.broadcast %1 : vector<1x32xf32> to vector<10x32xf32>
    %20 = arith.mulf %18, %19 : vector<10x32xf32>
    %21 = vector.broadcast %2 : vector<1x32xf32> to vector<10x32xf32>
    %22 = arith.addf %20, %21 : vector<10x32xf32>
    %c0_9 = arith.constant 0 : index
    %c0_10 = arith.constant 0 : index
    %23 = vector.load %arg4[%c0_9, %c0_10] : memref<32x96xf32, #tpu.memory_space<vmem>>, vector<32x96xf32>
    %cst_11 = arith.constant dense<0.000000e+00> : vector<10x96xf32>
    %24 = tpu.matmul %22, %23, %cst_11 {dimension_numbers = #tpu.dot_dimension_numbers<[1], [0], [0], [1], [0, 0, 1, 1], [], []>} : vector<10x32xf32>, vector<32x96xf32>, vector<10x96xf32> -> vector<10x96xf32>
    %c0_12 = arith.constant 0 : index
    %c0_13 = arith.constant 0 : index
    %25 = vector.load %arg5[%c0_12, %c0_13] : memref<10x96xf32, #tpu.memory_space<vmem>>, vector<10x96xf32>
    tpu.vector_store %arg5[%c0_12, %c0_13], %24 {strides = array<i32>} : memref<10x96xf32, #tpu.memory_space<vmem>>, vector<10x96xf32>,
    return
  }
  func.func @transform_0(%arg0: i32) -> (i32, i32) {
    %c0_i32 = arith.constant 0 : i32
    %c0_i32_0 = arith.constant 0 : i32
    return %arg0, %c0_i32 : i32, i32
  }
  func.func @transform_1(%arg0: i32) -> (i32, i32) {
    %c0_i32 = arith.constant 0 : i32
    %c0_i32_0 = arith.constant 0 : i32
    %c0_i32_1 = arith.constant 0 : i32
    return %c0_i32, %c0_i32_0 : i32, i32
  }
  func.func @transform_2(%arg0: i32) -> (i32, i32) {
    %c0_i32 = arith.constant 0 : i32
    %c0_i32_0 = arith.constant 0 : i32
    %c0_i32_1 = arith.constant 0 : i32
    return %c0_i32, %c0_i32_0 : i32, i32
  }
  func.func @transform_3(%arg0: i32) -> (i32, i32) {
    %c0_i32 = arith.constant 0 : i32
    %c0_i32_0 = arith.constant 0 : i32
    %c0_i32_1 = arith.constant 0 : i32
    return %c0_i32, %c0_i32_0 : i32, i32
  }
  func.func @transform_4(%arg0: i32) -> (i32, i32) {
    %c0_i32 = arith.constant 0 : i32
    %c0_i32_0 = arith.constant 0 : i32
    return %arg0, %c0_i32 : i32, i32
  }
}

module attributes {stable_mosaic.version = 11 : i64} {
  func.func @_attn_kernel_masked(%arg0: i32, %arg1: memref<16x5x4xf32, #tpu.memory_space<vmem>>, %arg2: memref<16x5x4xf32, #tpu.memory_space<vmem>>, %arg3: memref<16x5x4xf32, #tpu.memory_space<vmem>>, %arg4: memref<16x1x5xf32, #tpu.memory_space<vmem>>, %arg5: memref<16x5x4xf32, #tpu.memory_space<vmem>>) attributes {dimension_semantics = [#tpu.dimension_semantics<parallel>], iteration_bounds = array<i64: 1>, scalar_prefetch = 0 : i64, scratch_operands = 0 : i64, tpu.core_type = #tpu.core_type<tc>, window_params = [{transform_indices = @transform_0, window_bounds = array<i64: 16, 5, 4>}, {transform_indices = @transform_1, window_bounds = array<i64: 16, 5, 4>}, {transform_indices = @transform_2, window_bounds = array<i64: 16, 5, 4>}, {transform_indices = @transform_3, window_bounds = array<i64: 16, 1, 5>}, {transform_indices = @transform_4, window_bounds = array<i64: 16, 5, 4>}]} {
    %c0 = arith.constant 0 : index
    %c0_0 = arith.constant 0 : index
    %c0_1 = arith.constant 0 : index
    %0 = vector.load %arg1[%c0, %c0_0, %c0_1] : memref<16x5x4xf32, #tpu.memory_space<vmem>>, vector<16x5x4xf32>
    %c0_2 = arith.constant 0 : index
    %c0_3 = arith.constant 0 : index
    %c0_4 = arith.constant 0 : index
    %1 = vector.load %arg2[%c0_2, %c0_3, %c0_4] : memref<16x5x4xf32, #tpu.memory_space<vmem>>, vector<16x5x4xf32>
    "tpu.trace_start"() <{level = 10 : i32, message = "bqd,bkd->bqk"}> : () -> ()
    %cst = arith.constant dense<0.000000e+00> : vector<16x5x5xf32>
    %2 = tpu.matmul %0, %1, %cst {dimension_numbers = #tpu.dot_dimension_numbers<[2], [2], [1], [1], [0, 0, 0, 1, 1, 1], [0], [0]>} : vector<16x5x4xf32>, vector<16x5x4xf32>, vector<16x5x5xf32> -> vector<16x5x5xf32>
    "tpu.trace_stop"() : () -> ()
    %cst_5 = arith.constant 5.000000e-01 : f32
    %3 = vector.broadcast %cst_5 : f32 to vector<16x5x5xf32>
    %4 = arith.mulf %2, %3 : vector<16x5x5xf32>
    %c0_6 = arith.constant 0 : index
    %c0_7 = arith.constant 0 : index
    %c0_8 = arith.constant 0 : index
    %5 = vector.load %arg4[%c0_6, %c0_7, %c0_8] : memref<16x1x5xf32, #tpu.memory_space<vmem>>, vector<16x1x5xf32>
    %6 = vector.shape_cast %5 : vector<16x1x5xf32> to vector<16x5xf32>
    %7 = vector.shape_cast %6 : vector<16x5xf32> to vector<16x5x1xf32>
    %8 = vector.shape_cast %6 : vector<16x5xf32> to vector<16x1x5xf32>
    %9 = vector.broadcast %7 : vector<16x5x1xf32> to vector<16x5x5xf32>
    %10 = vector.broadcast %8 : vector<16x1x5xf32> to vector<16x5x5xf32>
    %11 = arith.mulf %9, %10 : vector<16x5x5xf32>
    %cst_9 = arith.constant 0.000000e+00 : f32
    %12 = vector.broadcast %cst_9 : f32 to vector<16x5x5xf32>
    %13 = arith.cmpf oeq, %11, %12 : vector<16x5x5xf32>
    %cst_10 = arith.constant -6.000000e+04 : f32
    %14 = vector.broadcast %cst_10 : f32 to vector<16x5x5xf32>
    %15 = arith.select %13, %14, %4 : vector<16x5x5xi1>, vector<16x5x5xf32>
    %cst_11 = arith.constant dense<0xFF800000> : vector<16x5xf32>
    %16 = vector.multi_reduction <maximumf>, %15, %cst_11 [2] : vector<16x5x5xf32> to vector<16x5xf32>
    %17 = vector.shape_cast %16 : vector<16x5xf32> to vector<16x5x1xf32>
    %18 = vector.broadcast %17 : vector<16x5x1xf32> to vector<16x5x5xf32>
    %19 = arith.subf %15, %18 : vector<16x5x5xf32>
    %20 = math.exp %19 : vector<16x5x5xf32>
    %cst_12 = arith.constant dense<0.000000e+00> : vector<16x5xf32>
    %21 = vector.multi_reduction <add>, %20, %cst_12 [2] : vector<16x5x5xf32> to vector<16x5xf32>
    %22 = vector.shape_cast %21 : vector<16x5xf32> to vector<16x5x1xf32>
    %23 = tpu.reciprocal %22 {approx = true} : vector<16x5x1xf32> -> vector<16x5x1xf32>
    %24 = vector.broadcast %23 : vector<16x5x1xf32> to vector<16x5x5xf32>
    %25 = arith.mulf %20, %24 : vector<16x5x5xf32>
    %c0_13 = arith.constant 0 : index
    %c0_14 = arith.constant 0 : index
    %c0_15 = arith.constant 0 : index
    %26 = vector.load %arg3[%c0_13, %c0_14, %c0_15] : memref<16x5x4xf32, #tpu.memory_space<vmem>>, vector<16x5x4xf32>
    "tpu.trace_start"() <{level = 10 : i32, message = "bqk,bkd->bqd"}> : () -> ()
    %cst_16 = arith.constant dense<0.000000e+00> : vector<16x5x4xf32>
    %27 = tpu.matmul %25, %26, %cst_16 {dimension_numbers = #tpu.dot_dimension_numbers<[2], [1], [1], [2], [0, 0, 0, 1, 1, 2], [0], [0]>} : vector<16x5x5xf32>, vector<16x5x4xf32>, vector<16x5x4xf32> -> vector<16x5x4xf32>
    "tpu.trace_stop"() : () -> ()
    %c0_17 = arith.constant 0 : index
    %c0_18 = arith.constant 0 : index
    %c0_19 = arith.constant 0 : index
    %28 = vector.load %arg5[%c0_17, %c0_18, %c0_19] : memref<16x5x4xf32, #tpu.memory_space<vmem>>, vector<16x5x4xf32>
    tpu.vector_store %arg5[%c0_17, %c0_18, %c0_19], %27 {strides = array<i32>} : memref<16x5x4xf32, #tpu.memory_space<vmem>>, vector<16x5x4xf32>,
    return
  }
  func.func @transform_0(%arg0: i32) -> (i32, i32, i32) {
    %c0_i32 = arith.constant 0 : i32
    %c0_i32_0 = arith.constant 0 : i32
    %c0_i32_1 = arith.constant 0 : i32
    return %arg0, %c0_i32, %c0_i32_0 : i32, i32, i32
  }
  func.func @transform_1(%arg0: i32) -> (i32, i32, i32) {
    %c0_i32 = arith.constant 0 : i32
    %c0_i32_0 = arith.constant 0 : i32
    %c0_i32_1 = arith.constant 0 : i32
    return %arg0, %c0_i32, %c0_i32_0 : i32, i32, i32
  }
  func.func @transform_2(%arg0: i32) -> (i32, i32, i32) {
    %c0_i32 = arith.constant 0 : i32
    %c0_i32_0 = arith.constant 0 : i32
    %c0_i32_1 = arith.constant 0 : i32
    return %arg0, %c0_i32, %c0_i32_0 : i32, i32, i32
  }
  func.func @transform_3(%arg0: i32) -> (i32, i32, i32) {
    %c0_i32 = arith.constant 0 : i32
    %c0_i32_0 = arith.constant 0 : i32
    %c0_i32_1 = arith.constant 0 : i32
    return %arg0, %c0_i32, %c0_i32_0 : i32, i32, i32
  }
  func.func @transform_4(%arg0: i32) -> (i32, i32, i32) {
    %c0_i32 = arith.constant 0 : i32
    %c0_i32_0 = arith.constant 0 : i32
    %c0_i32_1 = arith.constant 0 : i32
    return %arg0, %c0_i32, %c0_i32_0 : i32, i32, i32
  }
}

module attributes {stable_mosaic.version = 11 : i64} {
  func.func @_linear_residual_kernel(%arg0: i32, %arg1: memref<10x32xf32, #tpu.memory_space<vmem>>, %arg2: memref<32x32xf32, #tpu.memory_space<vmem>>, %arg3: memref<1x32xf32, #tpu.memory_space<vmem>>, %arg4: memref<10x32xf32, #tpu.memory_space<vmem>>, %arg5: memref<10x32xf32, #tpu.memory_space<vmem>>) attributes {dimension_semantics = [#tpu.dimension_semantics<parallel>], iteration_bounds = array<i64: 1>, scalar_prefetch = 0 : i64, scratch_operands = 0 : i64, tpu.core_type = #tpu.core_type<tc>, window_params = [{transform_indices = @transform_0, window_bounds = array<i64: 10, 32>}, {pipeline_mode = #tpu.pipeline_mode<synchronous>, transform_indices = @transform_1, window_bounds = array<i64: 32, 32>}, {pipeline_mode = #tpu.pipeline_mode<synchronous>, transform_indices = @transform_2, window_bounds = array<i64: 1, 32>}, {transform_indices = @transform_3, window_bounds = array<i64: 10, 32>}, {transform_indices = @transform_4, window_bounds = array<i64: 10, 32>}]} {
    %c0 = arith.constant 0 : index
    %c0_0 = arith.constant 0 : index
    %0 = vector.load %arg1[%c0, %c0_0] : memref<10x32xf32, #tpu.memory_space<vmem>>, vector<10x32xf32>
    %c0_1 = arith.constant 0 : index
    %c0_2 = arith.constant 0 : index
    %1 = vector.load %arg2[%c0_1, %c0_2] : memref<32x32xf32, #tpu.memory_space<vmem>>, vector<32x32xf32>
    %cst = arith.constant dense<0.000000e+00> : vector<10x32xf32>
    %2 = tpu.matmul %0, %1, %cst {dimension_numbers = #tpu.dot_dimension_numbers<[1], [0], [0], [1], [0, 0, 1, 1], [], []>} : vector<10x32xf32>, vector<32x32xf32>, vector<10x32xf32> -> vector<10x32xf32>
    %c0_3 = arith.constant 0 : index
    %c0_4 = arith.constant 0 : index
    %3 = vector.load %arg4[%c0_3, %c0_4] : memref<10x32xf32, #tpu.memory_space<vmem>>, vector<10x32xf32>
    %4 = arith.addf %3, %2 : vector<10x32xf32>
    %c0_5 = arith.constant 0 : index
    %c0_6 = arith.constant 0 : index
    %5 = vector.load %arg3[%c0_5, %c0_6] : memref<1x32xf32, #tpu.memory_space<vmem>>, vector<1x32xf32>
    %6 = vector.broadcast %5 : vector<1x32xf32> to vector<10x32xf32>
    %7 = arith.addf %4, %6 : vector<10x32xf32>
    %c0_7 = arith.constant 0 : index
    %c0_8 = arith.constant 0 : index
    %8 = vector.load %arg5[%c0_7, %c0_8] : memref<10x32xf32, #tpu.memory_space<vmem>>, vector<10x32xf32>
    tpu.vector_store %arg5[%c0_7, %c0_8], %7 {strides = array<i32>} : memref<10x32xf32, #tpu.memory_space<vmem>>, vector<10x32xf32>,
    return
  }
  func.func @transform_0(%arg0: i32) -> (i32, i32) {
    %c0_i32 = arith.constant 0 : i32
    %c0_i32_0 = arith.constant 0 : i32
    return %arg0, %c0_i32 : i32, i32
  }
  func.func @transform_1(%arg0: i32) -> (i32, i32) {
    %c0_i32 = arith.constant 0 : i32
    %c0_i32_0 = arith.constant 0 : i32
    %c0_i32_1 = arith.constant 0 : i32
    return %c0_i32, %c0_i32_0 : i32, i32
  }
  func.func @transform_2(%arg0: i32) -> (i32, i32) {
    %c0_i32 = arith.constant 0 : i32
    %c0_i32_0 = arith.constant 0 : i32
    %c0_i32_1 = arith.constant 0 : i32
    return %c0_i32, %c0_i32_0 : i32, i32
  }
  func.func @transform_3(%arg0: i32) -> (i32, i32) {
    %c0_i32 = arith.constant 0 : i32
    %c0_i32_0 = arith.constant 0 : i32
    return %arg0, %c0_i32 : i32, i32
  }
  func.func @transform_4(%arg0: i32) -> (i32, i32) {
    %c0_i32 = arith.constant 0 : i32
    %c0_i32_0 = arith.constant 0 : i32
    return %arg0, %c0_i32 : i32, i32
  }
}

module attributes {stable_mosaic.version = 11 : i64} {
  func.func @_ln_mlp_residual_kernel(%arg0: i32, %arg1: memref<10x32xf32, #tpu.memory_space<vmem>>, %arg2: memref<1x32xf32, #tpu.memory_space<vmem>>, %arg3: memref<1x32xf32, #tpu.memory_space<vmem>>, %arg4: memref<32x128xf32, #tpu.memory_space<vmem>>, %arg5: memref<1x128xf32, #tpu.memory_space<vmem>>, %arg6: memref<128x32xf32, #tpu.memory_space<vmem>>, %arg7: memref<1x32xf32, #tpu.memory_space<vmem>>, %arg8: memref<10x32xf32, #tpu.memory_space<vmem>>) attributes {dimension_semantics = [#tpu.dimension_semantics<parallel>], iteration_bounds = array<i64: 1>, scalar_prefetch = 0 : i64, scratch_operands = 0 : i64, tpu.core_type = #tpu.core_type<tc>, window_params = [{transform_indices = @transform_0, window_bounds = array<i64: 10, 32>}, {pipeline_mode = #tpu.pipeline_mode<synchronous>, transform_indices = @transform_1, window_bounds = array<i64: 1, 32>}, {pipeline_mode = #tpu.pipeline_mode<synchronous>, transform_indices = @transform_2, window_bounds = array<i64: 1, 32>}, {pipeline_mode = #tpu.pipeline_mode<synchronous>, transform_indices = @transform_3, window_bounds = array<i64: 32, 128>}, {pipeline_mode = #tpu.pipeline_mode<synchronous>, transform_indices = @transform_4, window_bounds = array<i64: 1, 128>}, {pipeline_mode = #tpu.pipeline_mode<synchronous>, transform_indices = @transform_5, window_bounds = array<i64: 128, 32>}, {pipeline_mode = #tpu.pipeline_mode<synchronous>, transform_indices = @transform_6, window_bounds = array<i64: 1, 32>}, {transform_indices = @transform_7, window_bounds = array<i64: 10, 32>}]} {
    %c0 = arith.constant 0 : index
    %c0_0 = arith.constant 0 : index
    %0 = vector.load %arg1[%c0, %c0_0] : memref<10x32xf32, #tpu.memory_space<vmem>>, vector<10x32xf32>
    %c0_1 = arith.constant 0 : index
    %c0_2 = arith.constant 0 : index
    %1 = vector.load %arg2[%c0_1, %c0_2] : memref<1x32xf32, #tpu.memory_space<vmem>>, vector<1x32xf32>
    %c0_3 = arith.constant 0 : index
    %c0_4 = arith.constant 0 : index
    %2 = vector.load %arg3[%c0_3, %c0_4] : memref<1x32xf32, #tpu.memory_space<vmem>>, vector<1x32xf32>
    %cst = arith.constant dense<0.000000e+00> : vector<10xf32>
    %3 = vector.multi_reduction <add>, %0, %cst [1] : vector<10x32xf32> to vector<10xf32>
    %4 = vector.shape_cast %3 : vector<10xf32> to vector<10x1xf32>
    %cst_5 = arith.constant 3.200000e+01 : f32
    %5 = vector.broadcast %cst_5 : f32 to vector<10x1xf32>
    %6 = arith.divf %4, %5 : vector<10x1xf32>
    %7 = vector.broadcast %6 : vector<10x1xf32> to vector<10x32xf32>
    %8 = arith.subf %0, %7 : vector<10x32xf32>
    %9 = arith.mulf %8, %8 : vector<10x32xf32>
    %cst_6 = arith.constant dense<0.000000e+00> : vector<10xf32>
    %10 = vector.multi_reduction <add>, %9, %cst_6 [1] : vector<10x32xf32> to vector<10xf32>
    %11 = vector.shape_cast %10 : vector<10xf32> to vector<10x1xf32>
    %cst_7 = arith.constant 3.200000e+01 : f32
    %12 = vector.broadcast %cst_7 : f32 to vector<10x1xf32>
    %13 = arith.divf %11, %12 : vector<10x1xf32>
    %cst_8 = arith.constant 9.99999974E-6 : f32
    %14 = vector.broadcast %cst_8 : f32 to vector<10x1xf32>
    %15 = arith.addf %13, %14 : vector<10x1xf32>
    %16 = math.rsqrt %15 : vector<10x1xf32>
    %17 = vector.broadcast %16 : vector<10x1xf32> to vector<10x32xf32>
    %18 = arith.mulf %8, %17 : vector<10x32xf32>
    %19 = vector.broadcast %1 : vector<1x32xf32> to vector<10x32xf32>
    %20 = arith.mulf %18, %19 : vector<10x32xf32>
    %21 = vector.broadcast %2 : vector<1x32xf32> to vector<10x32xf32>
    %22 = arith.addf %20, %21 : vector<10x32xf32>
    %c0_9 = arith.constant 0 : index
    %c0_10 = arith.constant 0 : index
    %23 = vector.load %arg4[%c0_9, %c0_10] : memref<32x128xf32, #tpu.memory_space<vmem>>, vector<32x128xf32>
    %cst_11 = arith.constant dense<0.000000e+00> : vector<10x128xf32>
    %24 = tpu.matmul %22, %23, %cst_11 {dimension_numbers = #tpu.dot_dimension_numbers<[1], [0], [0], [1], [0, 0, 1, 1], [], []>} : vector<10x32xf32>, vector<32x128xf32>, vector<10x128xf32> -> vector<10x128xf32>
    %c0_12 = arith.constant 0 : index
    %c0_13 = arith.constant 0 : index
    %25 = vector.load %arg5[%c0_12, %c0_13] : memref<1x128xf32, #tpu.memory_space<vmem>>, vector<1x128xf32>
    %26 = vector.broadcast %25 : vector<1x128xf32> to vector<10x128xf32>
    %27 = arith.addf %24, %26 : vector<10x128xf32>
    %cst_14 = arith.constant 5.000000e-01 : f32
    %28 = vector.broadcast %cst_14 : f32 to vector<10x128xf32>
    %29 = arith.mulf %28, %27 : vector<10x128xf32>
    %cst_15 = arith.constant 0.707106769 : f32
    %30 = vector.broadcast %cst_15 : f32 to vector<10x128xf32>
    %31 = arith.mulf %27, %30 : vector<10x128xf32>
    %32 = math.erf %31 : vector<10x128xf32>
    %cst_16 = arith.constant 1.000000e+00 : f32
    %33 = vector.broadcast %cst_16 : f32 to vector<10x128xf32>
    %34 = arith.addf %33, %32 : vector<10x128xf32>
    %35 = arith.mulf %29, %34 : vector<10x128xf32>
    %c0_17 = arith.constant 0 : index
    %c0_18 = arith.constant 0 : index
    %36 = vector.load %arg6[%c0_17, %c0_18] : memref<128x32xf32, #tpu.memory_space<vmem>>, vector<128x32xf32>
    %cst_19 = arith.constant dense<0.000000e+00> : vector<10x32xf32>
    %37 = tpu.matmul %35, %36, %cst_19 {dimension_numbers = #tpu.dot_dimension_numbers<[1], [0], [0], [1], [0, 0, 1, 1], [], []>} : vector<10x128xf32>, vector<128x32xf32>, vector<10x32xf32> -> vector<10x32xf32>
    %c0_20 = arith.constant 0 : index
    %c0_21 = arith.constant 0 : index
    %38 = vector.load %arg7[%c0_20, %c0_21] : memref<1x32xf32, #tpu.memory_space<vmem>>, vector<1x32xf32>
    %39 = vector.broadcast %38 : vector<1x32xf32> to vector<10x32xf32>
    %40 = arith.addf %37, %39 : vector<10x32xf32>
    %41 = arith.addf %0, %40 : vector<10x32xf32>
    %c0_22 = arith.constant 0 : index
    %c0_23 = arith.constant 0 : index
    %42 = vector.load %arg8[%c0_22, %c0_23] : memref<10x32xf32, #tpu.memory_space<vmem>>, vector<10x32xf32>
    tpu.vector_store %arg8[%c0_22, %c0_23], %41 {strides = array<i32>} : memref<10x32xf32, #tpu.memory_space<vmem>>, vector<10x32xf32>,
    return
  }
  func.func @transform_0(%arg0: i32) -> (i32, i32) {
    %c0_i32 = arith.constant 0 : i32
    %c0_i32_0 = arith.constant 0 : i32
    return %arg0, %c0_i32 : i32, i32
  }
  func.func @transform_1(%arg0: i32) -> (i32, i32) {
    %c0_i32 = arith.constant 0 : i32
    %c0_i32_0 = arith.constant 0 : i32
    %c0_i32_1 = arith.constant 0 : i32
    return %c0_i32, %c0_i32_0 : i32, i32
  }
  func.func @transform_2(%arg0: i32) -> (i32, i32) {
    %c0_i32 = arith.constant 0 : i32
    %c0_i32_0 = arith.constant 0 : i32
    %c0_i32_1 = arith.constant 0 : i32
    return %c0_i32, %c0_i32_0 : i32, i32
  }
  func.func @transform_3(%arg0: i32) -> (i32, i32) {
    %c0_i32 = arith.constant 0 : i32
    %c0_i32_0 = arith.constant 0 : i32
    %c0_i32_1 = arith.constant 0 : i32
    return %c0_i32, %c0_i32_0 : i32, i32
  }
  func.func @transform_4(%arg0: i32) -> (i32, i32) {
    %c0_i32 = arith.constant 0 : i32
    %c0_i32_0 = arith.constant 0 : i32
    %c0_i32_1 = arith.constant 0 : i32
    return %c0_i32, %c0_i32_0 : i32, i32
  }
  func.func @transform_5(%arg0: i32) -> (i32, i32) {
    %c0_i32 = arith.constant 0 : i32
    %c0_i32_0 = arith.constant 0 : i32
    %c0_i32_1 = arith.constant 0 : i32
    return %c0_i32, %c0_i32_0 : i32, i32
  }
  func.func @transform_6(%arg0: i32) -> (i32, i32) {
    %c0_i32 = arith.constant 0 : i32
    %c0_i32_0 = arith.constant 0 : i32
    %c0_i32_1 = arith.constant 0 : i32
    return %c0_i32, %c0_i32_0 : i32, i32
  }
  func.func @transform_7(%arg0: i32) -> (i32, i32) {
    %c0_i32 = arith.constant 0 : i32
    %c0_i32_0 = arith.constant 0 : i32
    return %arg0, %c0_i32 : i32, i32
  }
}

</mosaic_0001>

<bundles_post_ra>
// kernel: block_forward.9
= control target key start
LH: loop header
LB: loop body
LE: loop exit
PB: predicated region body
PF: predicated region fallthrough
CT: control target
= control target key end

     0   :  { %vm23_vm0 = vcmask 130048   ;;  %vm196_vm1 = vcmask 392192   ;;  %s314_s0 = inlined_call_operand.vmem [shape: f32[32,16], index: 0, kind: input, shape index: {}]   ;;  %s315_s3 = inlined_call_operand.vmem [shape: f32[16,48], index: 3, kind: input, shape index: {}]   ;;  %s316_s1 = inlined_call_operand.vmem [shape: f32[1,16], index: 1, kind: input, shape index: {}]   ;;  %s317_s2 = inlined_call_operand.vmem [shape: f32[1,16], index: 2, kind: input, shape index: {}]   ;;  %s318_s4 = inlined_call_operand.vmem [shape: f32[32,48], index: 4, kind: output, shape index: {}]  }
   0x1   :  { %v17_v0 = vld [vmem:[%s314_s0] sm:$0xff]  ;;  %v18_v1 = vld [vmem:[%s314_s0 + $0x8] sm:$0xff]  ;;  %v19_v2 = vld [vmem:[%s314_s0 + $0x10] sm:$0xff] }
   0x2   :  { %v24_v3 = vsel %vm23_vm0, %v17_v0, 0.0  ;;  %v27_v4 = vsel %vm23_vm0, %v18_v1, 0.0  ;;  %v20_v5 = vld [vmem:[%s314_s0 + $0x18] sm:$0xff]  ;;  %v30_v6 = vsel %vm23_vm0, %v19_v2, 0.0  ;;  %v97_v28 = vld [vmem:[%s315_s3] sm:$0xff]  ;;  %v98_v29 = vld [vmem:[%s315_s3 + $0x8] sm:$0xff] }
   0x3   :  { %25 = vadd.xlane.f32.xlu0 %v24_v3  ;;  %28 = vadd.xlane.f32.xlu1 %v27_v4  ;;  %v33_v7 = vsel %vm23_vm0, %v20_v5, 0.0  ;;  %v227_v30 = vpack.c.bf16 %v98_v29, %v97_v28  ;;  %v205_v44 = vld [vmem:[%s316_s1] ss:$0 sm:$0xff] }
   0x4   :  { %v206_v46 = vld [vmem:[%s317_s2] ss:$0 sm:$0xff] }
   0x5   :  { %228 = vmatprep.subr.bf16.mxu0 %v227_v30  ;;  %231 = vmatprep.subr.bf16.mxu1 %v227_v30 }
   0x6   :  { %230 = vmatpush3.bf16.msra.mxu0 %v227_v30  ;;  %232 = vmatpush3.bf16.msra.mxu1 %v227_v30 }
   0x7   :  { %31 = vadd.xlane.f32.xlu0 %v30_v6  ;;  %34 = vadd.xlane.f32.xlu1 %v33_v7 }
  0x90   :  { %v26_v8 = vpop.xlane.xlu0 %25  ;;  %v29_v9 = vpop.xlane.xlu1 %28 }
  0x91   :  { %v37_v10 = vmul.f32 0.0625, %v26_v8  ;;  %v38_v11 = vmul.f32 0.0625, %v29_v9 }
  0x93   :  { %v41_v12 = vsub.f32 %v17_v0, %v37_v10  ;;  %v42_v13 = vsub.f32 %v18_v1, %v38_v11 }
  0x94   :  { %v32_v14 = vpop.xlane.xlu0 %31  ;;  %v35_v15 = vpop.xlane.xlu1 %34 }
  0x95   :  { %v39_v16 = vmul.f32 0.0625, %v32_v14  ;;  %v40_v17 = vmul.f32 0.0625, %v35_v15  ;;  %v45_v18 = vmul.f32 %v41_v12, %v41_v12  ;;  %v46_v19 = vmul.f32 %v42_v13, %v42_v13 }
  0x97   :  { %v43_v20 = vsub.f32 %v19_v2, %v39_v16  ;;  %v44_v21 = vsub.f32 %v20_v5, %v40_v17  ;;  %v49_v22 = vsel %vm23_vm0, %v45_v18, 0.0  ;;  %v52_v23 = vsel %vm23_vm0, %v46_v19, 0.0 }
  0x98   :  { %50 = vadd.xlane.f32.xlu0 %v49_v22 }
  0x99   :  { %v47_v24 = vmul.f32 %v43_v20, %v43_v20  ;;  %v48_v25 = vmul.f32 %v44_v21, %v44_v21 }
  0x9b   :  { %v55_v26 = vsel %vm23_vm0, %v47_v24, 0.0  ;;  %v58_v27 = vsel %vm23_vm0, %v48_v25, 0.0 }
  0x9c   :  { %53 = vadd.xlane.f32.xlu0 %v52_v23  ;;  %56 = vadd.xlane.f32.xlu1 %v55_v26 }
  0xa0   :  { %59 = vadd.xlane.f32.xlu1 %v58_v27 }
 0x125   :  { %v51_v31 = vpop.xlane.xlu0 %50 }
 0x126   :  { %v61_v32 = vmul.f32 0.0625, %v51_v31 }
 0x128   :  { %v65_v33 = vadd.f32 1e-05, %v61_v32 }
 0x129   :  { %v57_v34 = vpop.xlane.xlu1 %56  ;;  %v54_v35 = vpop.xlane.xlu0 %53 }
 0x12a   :  { %233 = vrsqrt.f32 %v65_v33  ;;  %v63_v36 = vmul.f32 0.0625, %v57_v34  ;;  %v62_v37 = vmul.f32 0.0625, %v54_v35 }
 0x12c   :  { %v67_v38 = vadd.f32 1e-05, %v63_v36  ;;  %v66_v39 = vadd.f32 1e-05, %v62_v37 }
 0x12d   :  { %v60_v40 = vpop.xlane.xlu1 %59 }
 0x12e   :  { %235 = vrsqrt.f32 %v67_v38  ;;  %v64_v41 = vmul.f32 0.0625, %v60_v40 }
 0x12f   :  { %237 = vrsqrt.f32 %v66_v39 }
 0x130   :  { %v68_v42 = vadd.f32 1e-05, %v64_v41 }
 0x132   :  { %239 = vrsqrt.f32 %v68_v42 }
 0x134   :  { %v234_v43 = vpop.eup %233 }
 0x135   :  { %v73_v45 = vmul.f32 %v234_v43, %v41_v12 }
 0x137   :  { %v83_v47 = vmul.f32 %v205_v44, %v73_v45 }
 0x138   :  { %v236_v48 = vpop.eup %235 }
 0x139   :  { %v238_v49 = vpop.eup %237  ;;  %v93_v50 = vadd.f32 %v206_v46, %v83_v47  ;;  %v75_v51 = vmul.f32 %v236_v48, %v43_v20 }
 0x13a   :  { %v74_v52 = vmul.f32 %v238_v49, %v42_v13 }
 0x13b   :  { %221 = vmatprep.mubr.msk.f32.mxu0 %vm23_vm0, %v93_v50  ;;  %v85_v53 = vmul.f32 %v205_v44, %v75_v51 }
 0x13c   :  { %v240_v54 = vpop.eup %239  ;;  %v84_v55 = vmul.f32 %v205_v44, %v74_v52 }
 0x13d   :  { %v95_v56 = vadd.f32 %v206_v46, %v85_v53  ;;  %v76_v57 = vmul.f32 %v240_v54, %v44_v21 }
 0x13e   :  { %v94_v58 = vadd.f32 %v206_v46, %v84_v55 }
 0x13f   :  { %224 = vmatprep.mubr.msk.f32.mxu1 %vm23_vm0, %v95_v56  ;;  %v86_v59 = vmul.f32 %v205_v44, %v76_v57 }
 0x140   :  { %222 = vmatmul.mubr.msk.f32.vlgmr.msra.gmra.mrb[0].mxu0 %vm23_vm0, %v94_v58 }
 0x141   :  { %v96_v60 = vadd.f32 %v206_v46, %v86_v59 }
 0x143   :  { %225 = vmatmul.mubr.msk.f32.vlgmr.msra.gmra.mrb[0].mxu1 %vm23_vm0, %v96_v60 }
 0x213   :  { %v223_v61 = vpop.f32.mrb[0].mxu0 }
 0x214   :  { %198 = vst.msk [vmem:[%s318_s4 + $0x8] sm:$0xff] %vm196_vm1, %v223_v61  ;;  %v177_v62 = vpop.f32.mrb[1].mxu0 }
 0x215   :  { %197 = vst.msk [vmem:[%s318_s4] sm:$0xff] %vm196_vm1, %v177_v62 }
 0x216   :  { %v226_v63 = vpop.f32.mrb[0].mxu1 }
 0x217   :  { %200 = vst.msk [vmem:[%s318_s4 + $0x18] sm:$0xff] %vm196_vm1, %v226_v63  ;;  %v187_v0 = vpop.f32.mrb[1].mxu1 }
 0x218   :  { %199 = vst.msk [vmem:[%s318_s4 + $0x10] sm:$0xff] %vm196_vm1, %v187_v0 }

// kernel: block_forward.11
= control target key start
LH: loop header
LB: loop body
LE: loop exit
PB: predicated region body
PF: predicated region fallthrough
CT: control target
= control target key end

     0   :  { %vm23_vm0 = vcmask 130048   ;;  %s253_s1 = inlined_call_operand.vmem [shape: f32[16,16], index: 1, kind: input, shape index: {}]   ;;  %s254_s0 = inlined_call_operand.vmem [shape: f32[32,16], index: 0, kind: input, shape index: {}]   ;;  %s255_s3 = inlined_call_operand.vmem [shape: f32[32,16], index: 3, kind: input, shape index: {}]   ;;  %s256_s2 = inlined_call_operand.vmem [shape: f32[1,16], index: 2, kind: input, shape index: {}]   ;;  %s257_s4 = inlined_call_operand.vmem [shape: f32[32,16], index: 4, kind: output, shape index: {}]  }
   0x1   :  { %v21_v0 = vld [vmem:[%s253_s1] sm:$0xff]  ;;  %v22_v1 = vld [vmem:[%s253_s1 + $0x8] sm:$0xff]  ;;  %v19_v4 = vld [vmem:[%s254_s0 + $0x10] sm:$0xff] }
   0x2   :  { %v17_v2 = vld [vmem:[%s254_s0] sm:$0xff]  ;;  %v169_v3 = vpack.c.bf16 %v22_v1, %v21_v0  ;;  %166 = vmatprep.mubr.msk.f32.mxu1 %vm23_vm0, %v19_v4  ;;  %v18_v5 = vld [vmem:[%s254_s0 + $0x8] sm:$0xff]  ;;  %v20_v6 = vld [vmem:[%s254_s0 + $0x18] sm:$0xff] }
   0x3   :  { %163 = vmatprep.mubr.msk.f32.mxu0 %vm23_vm0, %v17_v2  ;;  %v122_v7 = vld [vmem:[%s255_s3 + $0x8] sm:$0xff]  ;;  %v124_v8 = vld [vmem:[%s255_s3 + $0x18] sm:$0xff]  ;;  %v121_v9 = vld [vmem:[%s255_s3] sm:$0xff] }
   0x4   :  { %170 = vmatprep.subr.bf16.mxu0 %v169_v3  ;;  %173 = vmatprep.subr.bf16.mxu1 %v169_v3  ;;  %v123_v10 = vld [vmem:[%s255_s3 + $0x10] sm:$0xff]  ;;  %v152_v12 = vld [vmem:[%s256_s2] ss:$0 sm:$0xff] }
   0x5   :  { %172 = vmatpush3.bf16.msra.mxu0 %v169_v3  ;;  %174 = vmatpush3.bf16.msra.mxu1 %v169_v3 }
   0x8   :  { %164 = vmatmul.mubr.msk.f32.vlgmr.msra.gmra.mrb[0].mxu0 %vm23_vm0, %v18_v5  ;;  %167 = vmatmul.mubr.msk.f32.vlgmr.msra.gmra.mrb[0].mxu1 %vm23_vm0, %v20_v6 }
  0xdb   :  { %v165_v11 = vpop.f32.mrb[0].mxu0  ;;  %v168_v13 = vpop.f32.mrb[0].mxu1 }
  0xdc   :  { %v126_v14 = vadd.f32 %v165_v11, %v122_v7  ;;  %v128_v15 = vadd.f32 %v168_v13, %v124_v8  ;;  %v102_v16 = vpop.f32.mrb[1].mxu0  ;;  %v112_v17 = vpop.f32.mrb[1].mxu1 }
  0xdd   :  { %v125_v18 = vadd.f32 %v121_v9, %v102_v16  ;;  %v127_v19 = vadd.f32 %v123_v10, %v112_v17 }
  0xde   :  { %v137_v20 = vadd.f32 %v152_v12, %v126_v14  ;;  %v139_v21 = vadd.f32 %v152_v12, %v128_v15 }
  0xdf   :  { %v136_v22 = vadd.f32 %v152_v12, %v125_v18  ;;  %v138_v23 = vadd.f32 %v152_v12, %v127_v19 }
  0xe0   :  { %141 = vst.msk [vmem:[%s257_s4 + $0x8] sm:$0xff] %vm23_vm0, %v137_v20  ;;  %143 = vst.msk [vmem:[%s257_s4 + $0x18] sm:$0xff] %vm23_vm0, %v139_v21 }
  0xe1   :  { %140 = vst.msk [vmem:[%s257_s4] sm:$0xff] %vm23_vm0, %v136_v22  ;;  %142 = vst.msk [vmem:[%s257_s4 + $0x10] sm:$0xff] %vm23_vm0, %v138_v23 }

// kernel: block_forward.12
= control target key start
LH: loop header
LB: loop body
LE: loop exit
PB: predicated region body
PF: predicated region fallthrough
CT: control target
= control target key end

     0   :  { %vm32_vm0 = vcmask 130048   ;;  %vm247_vm1 = vcmask 523264   ;;  %s597_s0 = inlined_call_operand.vmem [shape: f32[32,16], index: 0, kind: input, shape index: {}]   ;;  %s598_s3 = inlined_call_operand.vmem [shape: f32[16,64], index: 3, kind: input, shape index: {}]   ;;  %s599_s1 = inlined_call_operand.vmem [shape: f32[1,16], index: 1, kind: input, shape index: {}]   ;;  %s600_s2 = inlined_call_operand.vmem [shape: f32[1,16], index: 2, kind: input, shape index: {}, may-alias: {2,6}]   ;;  %s601_s5 = inlined_call_operand.vmem [shape: f32[64,16], index: 5, kind: input, shape index: {}]   ;;  %s602_s4 = inlined_call_operand.vmem [shape: f32[1,64], index: 4, kind: input, shape index: {}]   ;;  %s603_s6 = inlined_call_operand.vmem [shape: f32[1,16], index: 6, kind: input, shape index: {}, may-alias: {2,6}]   ;;  %s604_s7 = inlined_call_operand.vmem [shape: f32[32,16], index: 7, kind: output, shape index: {}]  }
   0x1   :  { %v498_v0 = vld [vmem:[%s597_s0] sm:$0xff]  ;;  %v503_v1 = vld [vmem:[%s597_s0 + $0x10] sm:$0xff]  ;;  %v508_v2 = vld [vmem:[%s597_s0 + $0x8] sm:$0xff] }
   0x2   :  { %v33_v3 = vsel %vm32_vm0, %v498_v0, 0.0  ;;  %v39_v4 = vsel %vm32_vm0, %v503_v1, 0.0  ;;  %v517_v5 = vld [vmem:[%s597_s0 + $0x18] sm:$0xff]  ;;  %v36_v6 = vsel %vm32_vm0, %v508_v2, 0.0  ;;  %v106_v28 = vld [vmem:[%s598_s3] sm:$0xff]  ;;  %v107_v29 = vld [vmem:[%s598_s3 + $0x8] sm:$0xff] }
   0x3   :  { %34 = vadd.xlane.f32.xlu0 %v33_v3  ;;  %40 = vadd.xlane.f32.xlu1 %v39_v4  ;;  %v42_v7 = vsel %vm32_vm0, %v517_v5, 0.0  ;;  %v419_v30 = vpack.c.bf16 %v107_v29, %v106_v28  ;;  %v357_v44 = vld [vmem:[%s599_s1] ss:$0 sm:$0xff]  ;;  %v233_v62 = vld [vmem:[%s601_s5 + $0x8] sm:$0xff]  ;;  %v234_v3 = vld [vmem:[%s601_s5 + $0x10] sm:$0xff] }
   0x4   :  { %v358_v46 = vld [vmem:[%s600_s2] ss:$0 sm:$0xff]  ;;  %v235_v4 = vld [vmem:[%s601_s5 + $0x18] sm:$0xff] }
   0x5   :  { %420 = vmatprep.subr.bf16.mxu0 %v419_v30  ;;  %v232_v61 = vld [vmem:[%s601_s5] sm:$0xff] }
   0x6   :  { %422 = vmatpush3.bf16.msra.mxu0 %v419_v30  ;;  %v423_v63 = vpack.c.bf16 %v233_v62, %v232_v61 }
   0x7   :  { %37 = vadd.xlane.f32.xlu0 %v36_v6  ;;  %43 = vadd.xlane.f32.xlu1 %v42_v7  ;;  %v427_v6 = vpack.c.bf16 %v235_v4, %v234_v3  ;;  %v236_v7 = vld [vmem:[%s601_s5 + $0x20] sm:$0xff] }
   0x8   :  { %424 = vmatprep.subr.bf16.mxu1 %v423_v63 }
   0x9   :  { %426 = vmatpush3.bf16.msra.mxu1 %v423_v63 }
   0xa   :  { %428 = vmatprep.subr.bf16.mxu1 %v427_v6 }
   0xd   :  { %430 = vmatpush3.bf16.msra.mxu1 %v427_v6 }
  0x90   :  { %v35_v8 = vpop.xlane.xlu0 %34  ;;  %v41_v9 = vpop.xlane.xlu1 %40 }
  0x91   :  { %v46_v10 = vmul.f32 0.0625, %v35_v8  ;;  %v48_v11 = vmul.f32 0.0625, %v41_v9  ;;  %v237_v8 = vld [vmem:[%s601_s5 + $0x28] sm:$0xff] }
  0x92   :  { %v431_v9 = vpack.c.bf16 %v237_v8, %v236_v7 }
  0x93   :  { %v50_v12 = vsub.f32 %v498_v0, %v46_v10  ;;  %v52_v13 = vsub.f32 %v503_v1, %v48_v11  ;;  %v238_v10 = vld [vmem:[%s601_s5 + $0x30] sm:$0xff]  ;;  %v239_v11 = vld [vmem:[%s601_s5 + $0x38] sm:$0xff] }
  0x94   :  { %v38_v14 = vpop.xlane.xlu0 %37  ;;  %v44_v15 = vpop.xlane.xlu1 %43  ;;  %432 = vmatprep.subr.bf16.mxu1 %v431_v9 }
  0x95   :  { %v47_v16 = vmul.f32 0.0625, %v38_v14  ;;  %v49_v17 = vmul.f32 0.0625, %v44_v15  ;;  %v54_v18 = vmul.f32 %v50_v12, %v50_v12  ;;  %v56_v19 = vmul.f32 %v52_v13, %v52_v13  ;;  %434 = vmatpush3.bf16.msra.mxu1 %v431_v9 }
  0x97   :  { %v51_v20 = vsub.f32 %v508_v2, %v47_v16  ;;  %v53_v21 = vsub.f32 %v517_v5, %v49_v17  ;;  %v58_v22 = vsel %vm32_vm0, %v54_v18, 0.0  ;;  %v64_v23 = vsel %vm32_vm0, %v56_v19, 0.0 }
  0x98   :  { %59 = vadd.xlane.f32.xlu0 %v58_v22 }
  0x99   :  { %v55_v24 = vmul.f32 %v51_v20, %v51_v20  ;;  %v57_v25 = vmul.f32 %v53_v21, %v53_v21 }
  0x9b   :  { %v61_v26 = vsel %vm32_vm0, %v55_v24, 0.0  ;;  %v67_v27 = vsel %vm32_vm0, %v57_v25, 0.0 }
  0x9c   :  { %65 = vadd.xlane.f32.xlu0 %v64_v23  ;;  %62 = vadd.xlane.f32.xlu1 %v61_v26 }
  0xa0   :  { %68 = vadd.xlane.f32.xlu1 %v67_v27 }
 0x125   :  { %v60_v31 = vpop.xlane.xlu0 %59 }
 0x126   :  { %v70_v32 = vmul.f32 0.0625, %v60_v31 }
 0x128   :  { %v74_v33 = vadd.f32 1e-05, %v70_v32 }
 0x129   :  { %v63_v34 = vpop.xlane.xlu1 %62  ;;  %v66_v35 = vpop.xlane.xlu0 %65 }
 0x12a   :  { %439 = vrsqrt.f32 %v74_v33  ;;  %v71_v36 = vmul.f32 0.0625, %v63_v34  ;;  %v72_v37 = vmul.f32 0.0625, %v66_v35 }
 0x12c   :  { %v75_v38 = vadd.f32 1e-05, %v71_v36  ;;  %v76_v39 = vadd.f32 1e-05, %v72_v37 }
 0x12d   :  { %v69_v40 = vpop.xlane.xlu1 %68 }
 0x12e   :  { %441 = vrsqrt.f32 %v75_v38  ;;  %v73_v41 = vmul.f32 0.0625, %v69_v40 }
 0x12f   :  { %443 = vrsqrt.f32 %v76_v39 }
 0x130   :  { %v77_v42 = vadd.f32 1e-05, %v73_v41 }
 0x132   :  { %445 = vrsqrt.f32 %v77_v42  ;;  %v364_v42 = vld [vmem:[%s603_s6] ss:$0 sm:$0xff] }
 0x134   :  { %v440_v43 = vpop.eup %439 }
 0x135   :  { %v82_v45 = vmul.f32 %v440_v43, %v50_v12  ;;  %v435_v12 = vpack.c.bf16 %v239_v11, %v238_v10 }
 0x137   :  { %v92_v47 = vmul.f32 %v357_v44, %v82_v45  ;;  %436 = vmatprep.subr.bf16.mxu1 %v435_v12 }
 0x138   :  { %v442_v48 = vpop.eup %441  ;;  %438 = vmatpush3.bf16.msra.mxu1 %v435_v12 }
 0x139   :  { %v444_v49 = vpop.eup %443  ;;  %v102_v50 = vadd.f32 %v358_v46, %v92_v47  ;;  %v83_v51 = vmul.f32 %v442_v48, %v51_v20 }
 0x13a   :  { %v84_v52 = vmul.f32 %v444_v49, %v52_v13  ;;  %v359_v13 = vld [vmem:[%s602_s4] ss:$0 sm:$0xff] }
 0x13b   :  { %391 = vmatprep.mubr.msk.f32.mxu0 %vm32_vm0, %v102_v50  ;;  %v93_v53 = vmul.f32 %v357_v44, %v83_v51 }
 0x13c   :  { %v446_v54 = vpop.eup %445  ;;  %v94_v55 = vmul.f32 %v357_v44, %v84_v52 }
 0x13d   :  { %v103_v56 = vadd.f32 %v358_v46, %v93_v53  ;;  %v85_v57 = vmul.f32 %v446_v54, %v53_v21 }
 0x13e   :  { %v104_v58 = vadd.f32 %v358_v46, %v94_v55 }
 0x13f   :  { %392 = vmatmul.mubr.msk.f32.vlgmr.msra.gmra.mrb[0].mxu0 %vm32_vm0, %v103_v56  ;;  %v95_v59 = vmul.f32 %v357_v44, %v85_v57 }
 0x140   :  { %394 = vmatprep.mubr.msk.f32.mxu0 %vm32_vm0, %v104_v58 }
 0x141   :  { %v105_v60 = vadd.f32 %v358_v46, %v95_v59 }
 0x143   :  { %395 = vmatmul.mubr.msk.f32.gmra.mrb[2].mxu0 %vm32_vm0, %v105_v60 }
 0x212   :  { %v393_v14 = vpop.f32.mrb[0].mxu0 }
 0x213   :  { %v199_v15 = vadd.f32 %v393_v14, %v359_v13  ;;  %v193_v16 = vpop.f32.mrb[1].mxu0 }
 0x214   :  { %v194_v17 = vadd.f32 %v359_v13, %v193_v16 }
 0x215   :  { %v217_v18 = vmul.f32 0.70710677, %v199_v15  ;;  %v213_v31 = vmul.f32 0.5, %v199_v15 }
 0x216   :  { %v216_v19 = vmul.f32 0.70710677, %v194_v17  ;;  %v396_v20 = vpop.f32.mrb[2].mxu0  ;;  %v212_v29 = vmul.f32 0.5, %v194_v17 }
 0x217   :  { %447 = verf.f32 %v217_v18  ;;  %v209_v21 = vadd.f32 %v396_v20, %v359_v13  ;;  %v203_v22 = vpop.f32.mrb[3].mxu0 }
 0x218   :  { %449 = verf.f32 %v216_v19  ;;  %v204_v23 = vadd.f32 %v359_v13, %v203_v22 }
 0x219   :  { %v219_v24 = vmul.f32 0.70710677, %v209_v21  ;;  %v215_v39 = vmul.f32 0.5, %v209_v21 }
 0x21a   :  { %v218_v25 = vmul.f32 0.70710677, %v204_v23  ;;  %v214_v37 = vmul.f32 0.5, %v204_v23 }
 0x21b   :  { %451 = verf.f32 %v219_v24 }
 0x21c   :  { %453 = verf.f32 %v218_v25 }
 0x221   :  { %v448_v26 = vpop.eup %447 }
 0x222   :  { %v450_v27 = vpop.eup %449  ;;  %v225_v28 = vadd.f32 1.0, %v448_v26 }
 0x223   :  { %v224_v30 = vadd.f32 1.0, %v450_v27 }
 0x224   :  { %v229_v35 = vmul.f32 %v225_v28, %v213_v31 }
 0x225   :  { %v452_v32 = vpop.eup %451  ;;  %v228_v33 = vmul.f32 %v224_v30, %v212_v29 }
 0x226   :  { %v454_v34 = vpop.eup %453  ;;  %v227_v36 = vadd.f32 1.0, %v452_v32 }
 0x227   :  { %v226_v38 = vadd.f32 1.0, %v454_v34  ;;  %413 = vmatprep.mubr.msk.f32.mxu1 %vm247_vm1, %v228_v33 }
 0x228   :  { %414 = vmatmul.mubr.msk.f32.vlgmr.msra.gmra.mrb[0].mxu1 %vm247_vm1, %v229_v35  ;;  %v231_v41 = vmul.f32 %v227_v36, %v215_v39 }
 0x229   :  { %v230_v40 = vmul.f32 %v226_v38, %v214_v37 }
 0x22b   :  { %416 = vmatprep.mubr.msk.f32.mxu1 %vm247_vm1, %v230_v40 }
 0x22c   :  { %417 = vmatmul.mubr.msk.f32.gmra.mrb[2].mxu1 %vm247_vm1, %v231_v41 }
 0x2fb   :  { %v415_v43 = vpop.f32.mrb[0].mxu1 }
 0x2fc   :  { %v332_v44 = vadd.f32 %v415_v43, %v364_v42  ;;  %v326_v45 = vpop.f32.mrb[1].mxu1 }
 0x2fd   :  { %v327_v46 = vadd.f32 %v364_v42, %v326_v45 }
 0x2fe   :  { %v346_v47 = vadd.f32 %v332_v44, %v508_v2 }
 0x2ff   :  { %v345_v48 = vadd.f32 %v327_v46, %v498_v0  ;;  %v418_v49 = vpop.f32.mrb[2].mxu1 }
 0x300   :  { %350 = vst.msk [vmem:[%s604_s7 + $0x8] sm:$0xff] %vm32_vm0, %v346_v47  ;;  %v342_v50 = vadd.f32 %v418_v49, %v364_v42  ;;  %v336_v51 = vpop.f32.mrb[3].mxu1 }
 0x301   :  { %349 = vst.msk [vmem:[%s604_s7] sm:$0xff] %vm32_vm0, %v345_v48  ;;  %v337_v52 = vadd.f32 %v364_v42, %v336_v51 }
 0x302   :  { %v348_v53 = vadd.f32 %v342_v50, %v517_v5 }
 0x303   :  { %v347_v2 = vadd.f32 %v337_v52, %v503_v1 }
 0x304   :  { %352 = vst.msk [vmem:[%s604_s7 + $0x18] sm:$0xff] %vm32_vm0, %v348_v53 }
 0x305   :  { %351 = vst.msk [vmem:[%s604_s7 + $0x10] sm:$0xff] %vm32_vm0, %v347_v2 }

// kernel: block_forward.14
= control target key start
LH: loop header
LB: loop body
LE: loop exit
PB: predicated region body
PF: predicated region fallthrough
CT: control target
= control target key end

     0   :  { %vm21_vm0 = vcmask 261120   ;;  %vm25_vm1 = vcmask 254976   ;;  %vm153_vm2 = vcmask 779264   ;;  %vm151_vm3 = vcmask 785408   ;;  %s251_s0 = inlined_call_operand.vmem [shape: f32[10,32], index: 0, kind: input, shape index: {}]   ;;  %s252_s3 = inlined_call_operand.vmem [shape: f32[32,96], index: 3, kind: input, shape index: {}]   ;;  %s253_s1 = inlined_call_operand.vmem [shape: f32[1,32], index: 1, kind: input, shape index: {}]   ;;  %s254_s2 = inlined_call_operand.vmem [shape: f32[1,32], index: 2, kind: input, shape index: {}]   ;;  %s255_s4 = inlined_call_operand.vmem [shape: f32[10,96], index: 4, kind: output, shape index: {}]  }
   0x1   :  { %v17_v0 = vld [vmem:[%s251_s0] sm:$0xff]  ;;  %v18_v1 = vld [vmem:[%s251_s0 + $0x8] sm:$0x3]  ;;  %v68_v16 = vld [vmem:[%s252_s3 + $0x10] sm:$0xff] }
   0x2   :  { %v22_v2 = vsel %vm21_vm0, %v17_v0, 0.0  ;;  %v26_v3 = vsel %vm25_vm1, %v18_v1, 0.0  ;;  %v66_v14 = vld [vmem:[%s252_s3] sm:$0xff]  ;;  %v67_v15 = vld [vmem:[%s252_s3 + $0x8] sm:$0xff]  ;;  %v69_v18 = vld [vmem:[%s252_s3 + $0x18] sm:$0xff] }
   0x3   :  { %23 = vadd.xlane.f32.xlu0 %v22_v2  ;;  %v180_v17 = vpack.c.bf16 %v67_v15, %v66_v14  ;;  %v184_v19 = vpack.c.bf16 %v69_v18, %v68_v16  ;;  %v159_v27 = vld [vmem:[%s253_s1] ss:$0 sm:$0xff] }
   0x4   :  { %v160_v29 = vld [vmem:[%s254_s2] ss:$0 sm:$0xff] }
   0x5   :  { %181 = vmatprep.subr.bf16.mxu0 %v180_v17 }
   0x6   :  { %183 = vmatpush3.bf16.msra.mxu0 %v180_v17 }
   0x7   :  { %27 = vadd.xlane.f32.xlu0 %v26_v3  ;;  %185 = vmatprep.subr.bf16.mxu0 %v184_v19 }
   0xa   :  { %187 = vmatpush3.bf16.msra.mxu0 %v184_v19 }
  0x90   :  { %v24_v4 = vpop.xlane.xlu0 %23 }
  0x91   :  { %v30_v5 = vmul.f32 0.03125, %v24_v4 }
  0x93   :  { %v32_v6 = vsub.f32 %v17_v0, %v30_v5 }
  0x94   :  { %v28_v7 = vpop.xlane.xlu0 %27 }
  0x95   :  { %v31_v8 = vmul.f32 0.03125, %v28_v7  ;;  %v34_v9 = vmul.f32 %v32_v6, %v32_v6 }
  0x97   :  { %v33_v10 = vsub.f32 %v18_v1, %v31_v8  ;;  %v36_v11 = vsel %vm21_vm0, %v34_v9, 0.0 }
  0x98   :  { %37 = vadd.xlane.f32.xlu1 %v36_v11 }
  0x99   :  { %v35_v12 = vmul.f32 %v33_v10, %v33_v10 }
  0x9b   :  { %v39_v13 = vsel %vm25_vm1, %v35_v12, 0.0 }
  0x9c   :  { %40 = vadd.xlane.f32.xlu1 %v39_v13 }
 0x125   :  { %v38_v20 = vpop.xlane.xlu1 %37 }
 0x126   :  { %v42_v21 = vmul.f32 0.03125, %v38_v20 }
 0x128   :  { %v44_v22 = vadd.f32 1e-05, %v42_v21 }
 0x129   :  { %v41_v23 = vpop.xlane.xlu1 %40 }
 0x12a   :  { %188 = vrsqrt.f32 %v44_v22  ;;  %v43_v24 = vmul.f32 0.03125, %v41_v23 }
 0x12c   :  { %v45_v25 = vadd.f32 1e-05, %v43_v24 }
 0x12e   :  { %190 = vrsqrt.f32 %v45_v25 }
 0x134   :  { %v189_v26 = vpop.eup %188 }
 0x135   :  { %v48_v28 = vmul.f32 %v189_v26, %v32_v6 }
 0x137   :  { %v56_v30 = vmul.f32 %v159_v27, %v48_v28 }
 0x138   :  { %v191_v31 = vpop.eup %190 }
 0x139   :  { %v49_v32 = vmul.f32 %v191_v31, %v33_v10  ;;  %v64_v33 = vadd.f32 %v160_v29, %v56_v30 }
 0x13b   :  { %v57_v34 = vmul.f32 %v159_v27, %v49_v32  ;;  %177 = vmatprep.mubr.msk.f32.mxu0 %vm21_vm0, %v64_v33 }
 0x13d   :  { %v65_v35 = vadd.f32 %v160_v29, %v57_v34 }
 0x13f   :  { %178 = vmatmul.mubr.msk.f32.vlgmr.msra.gmra.mrb[0].mxu0 %vm21_vm0, %v65_v35 }
 0x212   :  { %v179_v36 = vpop.f32.mrb[0].mxu0 }
 0x213   :  { %154 = vst.msk [vmem:[%s255_s4 + $0x8] sm:$0x3] %vm153_vm2, %v179_v36  ;;  %v142_v37 = vpop.f32.mrb[1].mxu0 }
 0x214   :  { %152 = vst.msk [vmem:[%s255_s4] sm:$0xff] %vm151_vm3, %v142_v37 }

// kernel: block_forward.13
= control target key start
LH: loop header
LB: loop body
LE: loop exit
PB: predicated region body
PF: predicated region fallthrough
CT: control target
= control target key end

     0   :  { %vm59_vm0 = vcmask 1041409   ;;  %vm62_vm1 = vcmask 1042434   ;;  %vm65_vm2 = vcmask 1043459   ;;  %vm68_vm3 = vcmask 1044484   ;;  %s1740_s0 = inlined_call_operand.vmem [shape: f32[8,4,16], index: 0, kind: input, shape index: {}]   ;;  %s1741_s3 = inlined_call_operand.vmem [shape: f32[64,32], index: 3, kind: input, shape index: {}]   ;;  %s1742_s1 = inlined_call_operand.vmem [shape: f32[1,16], index: 1, kind: input, shape index: {}]   ;;  %s1743_s2 = inlined_call_operand.vmem [shape: f32[1,16], index: 2, kind: input, shape index: {}]   ;;  %s1744_s4 = inlined_call_operand.vmem [shape: f32[1,32], index: 4, kind: input, shape index: {}]   ;;  %s1745_s5 = inlined_call_operand.vmem [shape: f32[8,32], index: 5, kind: input, shape index: {}]   ;;  %s1746_s6 = inlined_call_operand.vmem [shape: f32[8,32], index: 6, kind: output, shape index: {}]  }
   0x1   :  { %v1110_v0 = vld [vmem:[%s1740_s0] sm:$0x1]  ;;  %v1115_v1 = vld [vmem:[%s1740_s0 + $0x4] sm:$0x1]  ;;  %v1120_v2 = vld [vmem:[%s1740_s0 + $0x8] sm:$0x1] }
   0x2   :  { %v1125_v3 = vld [vmem:[%s1740_s0 + $0xc] sm:$0x1]  ;;  %v1130_v4 = vld [vmem:[%s1740_s0 + $0x10] sm:$0x1]  ;;  %v1135_v5 = vld [vmem:[%s1740_s0 + $0x14] sm:$0x1] }
   0x3   :  { %v1140_v6 = vld [vmem:[%s1740_s0 + $0x18] sm:$0x1]  ;;  %v1145_v7 = vld [vmem:[%s1740_s0 + $0x1c] sm:$0x1]  ;;  %v58_v8 = vrot.slane %v1115_v1, 7  ;;  %v61_v9 = vrot.slane %v1120_v2, 6 }
   0x4   :  { %v64_v10 = vrot.slane %v1125_v3, 5  ;;  %v67_v11 = vrot.slane %v1130_v4, 4  ;;  %v70_v12 = vrot.slane %v1135_v5, 3  ;;  %vm71_vm4 = vcmask 1045509   ;;  %v1158_v15 = vld [vmem:[%s1740_s0 + $0x1] sm:$0x1] }
   0x5   :  { %v60_v13 = vsel %vm59_vm0, %v58_v8, %v1110_v0  ;;  %v73_v14 = vrot.slane %v1140_v6, 2  ;;  %vm74_vm5 = vcmask 1046534   ;;  %v1163_v16 = vld [vmem:[%s1740_s0 + $0x5] sm:$0x1]  ;;  %v76_v18 = vrot.slane %v1145_v7, 1 }
   0x6   :  { %v63_v17 = vsel %vm62_vm1, %v61_v9, %v60_v13  ;;  %vm77_vm6 = vcmask 1047559   ;;  %v1170_v19 = vld [vmem:[%s1740_s0 + $0x9] sm:$0x1]  ;;  %v1175_v20 = vld [vmem:[%s1740_s0 + $0xd] sm:$0x1]  ;;  %v310_v27 = vrot.slane %v1163_v16, 7 }
   0x7   :  { %v66_v21 = vsel %vm65_vm2, %v64_v10, %v63_v17  ;;  %v1181_v22 = vld [vmem:[%s1740_s0 + $0x11] sm:$0x1]  ;;  %v1186_v23 = vld [vmem:[%s1740_s0 + $0x15] sm:$0x1]  ;;  %v1191_v24 = vld [vmem:[%s1740_s0 + $0x19] sm:$0x1] }
   0x8   :  { %v69_v25 = vsel %vm68_vm3, %v67_v11, %v66_v21  ;;  %v1197_v26 = vld [vmem:[%s1740_s0 + $0x1d] sm:$0x1]  ;;  %v312_v28 = vrot.slane %v1170_v19, 6  ;;  %v314_v29 = vrot.slane %v1175_v20, 5  ;;  %vm80_vm7 = vcmask 130048  }
   0x9   :  { %v72_v30 = vsel %vm71_vm4, %v70_v12, %v69_v25  ;;  %v316_v31 = vrot.slane %v1181_v22, 4  ;;  %v318_v32 = vrot.slane %v1186_v23, 3  ;;  %v1208_v33 = vld [vmem:[%s1740_s0 + $0x2] sm:$0x1]  ;;  %v311_v35 = vsel %vm59_vm0, %v310_v27, %v1158_v15  ;;  %v1218_v38 = vld [vmem:[%s1740_s0 + $0x6] sm:$0x1] }
   0xa   :  { %v75_v34 = vsel %vm74_vm5, %v73_v14, %v72_v30  ;;  %v320_v36 = vrot.slane %v1191_v24, 2  ;;  %v322_v37 = vrot.slane %v1197_v26, 1  ;;  %v1223_v39 = vld [vmem:[%s1740_s0 + $0xa] sm:$0x1]  ;;  %v313_v41 = vsel %vm62_vm1, %v312_v28, %v311_v35  ;;  %v1230_v42 = vld [vmem:[%s1740_s0 + $0xe] sm:$0x1] }
   0xb   :  { %v78_v40 = vsel %vm77_vm6, %v76_v18, %v75_v34  ;;  %v1235_v43 = vld [vmem:[%s1740_s0 + $0x12] sm:$0x1]  ;;  %v1240_v44 = vld [vmem:[%s1740_s0 + $0x16] sm:$0x1]  ;;  %v315_v46 = vsel %vm65_vm2, %v314_v29, %v313_v41  ;;  %v1247_v47 = vld [vmem:[%s1740_s0 + $0x1a] sm:$0x1] }
   0xc   :  { %v81_v45 = vsel %vm80_vm7, %v78_v40, 0.0  ;;  %v1252_v48 = vld [vmem:[%s1740_s0 + $0x1e] sm:$0x1]  ;;  %v541_v49 = vrot.slane %v1218_v38, 7  ;;  %v317_v50 = vsel %vm68_vm3, %v316_v31, %v315_v46  ;;  %v543_v51 = vrot.slane %v1223_v39, 6 }
   0xd   :  { %82 = vadd.xlane.f32.xlu0 %v81_v45  ;;  %v545_v52 = vrot.slane %v1230_v42, 5  ;;  %v547_v53 = vrot.slane %v1235_v43, 4  ;;  %v1262_v54 = vld [vmem:[%s1740_s0 + $0x3] sm:$0x1]  ;;  %v319_v55 = vsel %vm71_vm4, %v318_v32, %v317_v50  ;;  %v549_v57 = vrot.slane %v1240_v44, 3 }
   0xe   :  { %v542_v56 = vsel %vm59_vm0, %v541_v49, %v1208_v33  ;;  %v1271_v58 = vld [vmem:[%s1740_s0 + $0x7] sm:$0x1]  ;;  %v1276_v59 = vld [vmem:[%s1740_s0 + $0xb] sm:$0x1]  ;;  %v321_v60 = vsel %vm74_vm5, %v320_v36, %v319_v55  ;;  %v551_v62 = vrot.slane %v1247_v47, 2  ;;  %v553_v12 = vrot.slane %v1252_v48, 1 }
   0xf   :  { %v544_v61 = vsel %vm62_vm1, %v543_v51, %v542_v56  ;;  %v1284_v63 = vld [vmem:[%s1740_s0 + $0xf] sm:$0x1]  ;;  %v1289_v8 = vld [vmem:[%s1740_s0 + $0x13] sm:$0x1]  ;;  %v772_v9 = vrot.slane %v1271_v58, 7  ;;  %v323_v10 = vsel %vm77_vm6, %v322_v37, %v321_v60  ;;  %v774_v27 = vrot.slane %v1276_v59, 6 }
  0x10   :  { %v546_v11 = vsel %vm65_vm2, %v545_v52, %v544_v61  ;;  %v1298_v13 = vld [vmem:[%s1740_s0 + $0x17] sm:$0x1]  ;;  %v1303_v14 = vld [vmem:[%s1740_s0 + $0x1b] sm:$0x1]  ;;  %v325_v17 = vsel %vm80_vm7, %v323_v10, 0.0  ;;  %v776_v29 = vrot.slane %v1284_v63, 5 }
  0x11   :  { %v548_v18 = vsel %vm68_vm3, %v547_v53, %v546_v11  ;;  %v1310_v21 = vld [vmem:[%s1740_s0 + $0x1f] sm:$0x1]  ;;  %v773_v25 = vsel %vm59_vm0, %v772_v9, %v1262_v54  ;;  %326 = vadd.xlane.f32.xlu1 %v325_v17  ;;  %v778_v30 = vrot.slane %v1289_v8, 4  ;;  %v780_v31 = vrot.slane %v1298_v13, 3 }
  0x12   :  { %v550_v28 = vsel %vm71_vm4, %v549_v57, %v548_v18  ;;  %v775_v34 = vsel %vm62_vm1, %v774_v27, %v773_v25  ;;  %v782_v35 = vrot.slane %v1303_v14, 2  ;;  %v784_v40 = vrot.slane %v1310_v21, 1 }
  0x13   :  { %v552_v32 = vsel %vm74_vm5, %v551_v62, %v550_v28  ;;  %v777_v37 = vsel %vm65_vm2, %v776_v29, %v775_v34  ;;  %vm1070_vm8 = vmmov 0   ;;  %vm987_vm9 = vcmask 261120  }
  0x14   :  { %v554_v36 = vsel %vm77_vm6, %v553_v12, %v552_v32  ;;  %v779_v45 = vsel %vm68_vm3, %v778_v30, %v777_v37 }
  0x15   :  { %v556_v41 = vsel %vm80_vm7, %v554_v36, 0.0  ;;  %v781_v46 = vsel %vm71_vm4, %v780_v31, %v779_v45 }
  0x16   :  { %557 = vadd.xlane.f32.xlu0 %v556_v41  ;;  %v783_v49 = vsel %vm74_vm5, %v782_v35, %v781_v46 }
  0x17   :  { %v785_v50 = vsel %vm77_vm6, %v784_v40, %v783_v49 }
  0x18   :  { %v787_v51 = vsel %vm80_vm7, %v785_v50, 0.0 }
  0x19   :  { %788 = vadd.xlane.f32.xlu1 %v787_v51 }
  0x9a   :  { %v83_v52 = vpop.xlane.xlu0 %82 }
  0x9b   :  { %v85_v53 = vmul.f32 0.0625, %v83_v52 }
  0x9d   :  { %v87_v55 = vrot.slane %v85_v53, 1  ;;  %v88_v56 = vrot.slane %v85_v53, 2  ;;  %v89_v57 = vrot.slane %v85_v53, 3  ;;  %v90_v60 = vrot.slane %v85_v53, 4 }
  0x9e   :  { %v91_v61 = vrot.slane %v85_v53, 5  ;;  %v92_v62 = vrot.slane %v85_v53, 6  ;;  %v93_v9 = vrot.slane %v85_v53, 7  ;;  %v1332_v10 = vsub.f32 %v1110_v0, %v85_v53  ;;  %v327_v11 = vpop.xlane.xlu1 %326 }
  0x9f   :  { %v1335_v12 = vsub.f32 %v1115_v1, %v87_v55  ;;  %v1338_v17 = vsub.f32 %v1120_v2, %v88_v56  ;;  %v1341_v18 = vsub.f32 %v1125_v3, %v89_v57  ;;  %v1344_v25 = vsub.f32 %v1130_v4, %v90_v60 }
  0xa0   :  { %v328_v27 = vmul.f32 0.0625, %v327_v11  ;;  %v1347_v28 = vsub.f32 %v1135_v5, %v91_v61  ;;  %v1350_v0 = vsub.f32 %v1140_v6, %v92_v62  ;;  %v1353_v29 = vsub.f32 %v1145_v7, %v93_v9 }
  0xa1   :  { %v110_v1 = vmul.f32 %v1332_v10, %v1332_v10  ;;  %v111_v2 = vmul.f32 %v1335_v12, %v1335_v12  ;;  %v112_v3 = vmul.f32 %v1338_v17, %v1338_v17  ;;  %v113_v4 = vmul.f32 %v1341_v18, %v1341_v18 }
  0xa2   :  { %v114_v5 = vmul.f32 %v1344_v25, %v1344_v25  ;;  %v115_v6 = vmul.f32 %v1347_v28, %v1347_v28  ;;  %v116_v7 = vmul.f32 %v1350_v0, %v1350_v0  ;;  %v117_v30 = vmul.f32 %v1353_v29, %v1353_v29 }
  0xa3   :  { %v558_v31 = vpop.xlane.xlu0 %557  ;;  %v126_v32 = vrot.slane %v111_v2, 7  ;;  %v128_v34 = vrot.slane %v112_v3, 6  ;;  %v130_v35 = vrot.slane %v113_v4, 5  ;;  %v330_v36 = vrot.slane %v328_v27, 1 }
  0xa4   :  { %v1371_v37 = vmul.f32 0.0625, %v558_v31  ;;  %v132_v40 = vrot.slane %v114_v5, 4  ;;  %v134_v41 = vrot.slane %v115_v6, 3  ;;  %v136_v45 = vrot.slane %v116_v7, 2 }
  0xa5   :  { %v127_v46 = vsel %vm59_vm0, %v126_v32, %v110_v1  ;;  %v138_v49 = vrot.slane %v117_v30, 1  ;;  %v331_v50 = vrot.slane %v328_v27, 2  ;;  %v332_v51 = vrot.slane %v328_v27, 3 }
  0xa6   :  { %v129_v52 = vsel %vm62_vm1, %v128_v34, %v127_v46  ;;  %v333_v53 = vrot.slane %v328_v27, 4  ;;  %v334_v55 = vrot.slane %v328_v27, 5  ;;  %v335_v56 = vrot.slane %v328_v27, 6  ;;  %v789_v57 = vpop.xlane.xlu1 %788 }
  0xa7   :  { %v131_v60 = vsel %vm65_vm2, %v130_v35, %v129_v52  ;;  %v336_v61 = vrot.slane %v328_v27, 7  ;;  %v1377_v62 = vsub.f32 %v1158_v15, %v328_v27  ;;  %v1380_v9 = vsub.f32 %v1163_v16, %v330_v36 }
  0xa8   :  { %v1382_v11 = vmul.f32 0.0625, %v789_v57  ;;  %v133_v1 = vsel %vm68_vm3, %v132_v40, %v131_v60  ;;  %v1386_v2 = vsub.f32 %v1170_v19, %v331_v50  ;;  %v1389_v3 = vsub.f32 %v1175_v20, %v332_v51 }
  0xa9   :  { %v135_v4 = vsel %vm71_vm4, %v134_v41, %v133_v1  ;;  %v1393_v5 = vsub.f32 %v1181_v22, %v333_v53  ;;  %v1396_v15 = vsub.f32 %v1186_v23, %v334_v55  ;;  %v1399_v16 = vsub.f32 %v1191_v24, %v335_v56 }
  0xaa   :  { %v137_v27 = vsel %vm74_vm5, %v136_v45, %v135_v4  ;;  %v1403_v6 = vsub.f32 %v1197_v26, %v336_v61  ;;  %v353_v19 = vmul.f32 %v1377_v62, %v1377_v62  ;;  %v354_v20 = vmul.f32 %v1380_v9, %v1380_v9 }
  0xab   :  { %v139_v22 = vsel %vm77_vm6, %v138_v49, %v137_v27  ;;  %v355_v23 = vmul.f32 %v1386_v2, %v1386_v2  ;;  %v356_v24 = vmul.f32 %v1389_v3, %v1389_v3  ;;  %v357_v7 = vmul.f32 %v1393_v5, %v1393_v5 }
  0xac   :  { %v141_v26 = vsel %vm80_vm7, %v139_v22, 0.0  ;;  %v358_v30 = vmul.f32 %v1396_v15, %v1396_v15  ;;  %v359_v31 = vmul.f32 %v1399_v16, %v1399_v16  ;;  %v360_v32 = vmul.f32 %v1403_v6, %v1403_v6 }
  0xad   :  { %142 = vadd.xlane.f32.xlu0 %v141_v26  ;;  %v369_v34 = vrot.slane %v354_v20, 7  ;;  %v371_v35 = vrot.slane %v355_v23, 6  ;;  %v373_v36 = vrot.slane %v356_v24, 5  ;;  %v375_v40 = vrot.slane %v357_v7, 4 }
  0xae   :  { %v377_v41 = vrot.slane %v358_v30, 3  ;;  %v379_v45 = vrot.slane %v359_v31, 2  ;;  %v381_v46 = vrot.slane %v360_v32, 1  ;;  %v561_v49 = vrot.slane %v1371_v37, 1 }
  0xaf   :  { %v370_v50 = vsel %vm59_vm0, %v369_v34, %v353_v19  ;;  %v562_v51 = vrot.slane %v1371_v37, 2  ;;  %v563_v52 = vrot.slane %v1371_v37, 3  ;;  %v564_v53 = vrot.slane %v1371_v37, 4 }
  0xb0   :  { %v372_v55 = vsel %vm62_vm1, %v371_v35, %v370_v50  ;;  %v565_v56 = vrot.slane %v1371_v37, 5  ;;  %v566_v57 = vrot.slane %v1371_v37, 6  ;;  %v567_v60 = vrot.slane %v1371_v37, 7 }
  0xb1   :  { %v374_v61 = vsel %vm65_vm2, %v373_v36, %v372_v55  ;;  %v1435_v1 = vsub.f32 %v1208_v33, %v1371_v37  ;;  %v1438_v4 = vsub.f32 %v1218_v38, %v561_v49  ;;  %v1441_v27 = vsub.f32 %v1223_v39, %v562_v51 }
  0xb2   :  { %v376_v19 = vsel %vm68_vm3, %v375_v40, %v374_v61  ;;  %v1445_v20 = vsub.f32 %v1230_v42, %v563_v52  ;;  %v1448_v22 = vsub.f32 %v1235_v43, %v564_v53  ;;  %v1451_v23 = vsub.f32 %v1240_v44, %v565_v56 }
  0xb3   :  { %v378_v33 = vsel %vm71_vm4, %v377_v41, %v376_v19  ;;  %v1455_v37 = vsub.f32 %v1247_v47, %v566_v57  ;;  %v1458_v38 = vsub.f32 %v1252_v48, %v567_v60  ;;  %v584_v39 = vmul.f32 %v1435_v1, %v1435_v1 }
  0xb4   :  { %v380_v42 = vsel %vm74_vm5, %v379_v45, %v378_v33  ;;  %v585_v43 = vmul.f32 %v1438_v4, %v1438_v4  ;;  %v586_v44 = vmul.f32 %v1441_v27, %v1441_v27  ;;  %v587_v24 = vmul.f32 %v1445_v20, %v1445_v20 }
  0xb5   :  { %v382_v47 = vsel %vm77_vm6, %v381_v46, %v380_v42  ;;  %v588_v48 = vmul.f32 %v1448_v22, %v1448_v22  ;;  %v589_v7 = vmul.f32 %v1451_v23, %v1451_v23  ;;  %v590_v26 = vmul.f32 %v1455_v37, %v1455_v37 }
  0xb6   :  { %v384_v30 = vsel %vm80_vm7, %v382_v47, 0.0  ;;  %v591_v31 = vmul.f32 %v1458_v38, %v1458_v38  ;;  %v600_v32 = vrot.slane %v585_v43, 7  ;;  %v602_v34 = vrot.slane %v586_v44, 6 }
  0xb7   :  { %385 = vadd.xlane.f32.xlu0 %v384_v30  ;;  %v604_v35 = vrot.slane %v587_v24, 5  ;;  %v606_v36 = vrot.slane %v588_v48, 4  ;;  %v608_v40 = vrot.slane %v589_v7, 3  ;;  %v610_v41 = vrot.slane %v590_v26, 2 }
  0xb8   :  { %v601_v45 = vsel %vm59_vm0, %v600_v32, %v584_v39  ;;  %v612_v46 = vrot.slane %v591_v31, 1  ;;  %v792_v49 = vrot.slane %v1382_v11, 1  ;;  %v793_v50 = vrot.slane %v1382_v11, 2 }
  0xb9   :  { %v603_v51 = vsel %vm62_vm1, %v602_v34, %v601_v45  ;;  %v794_v52 = vrot.slane %v1382_v11, 3  ;;  %v795_v53 = vrot.slane %v1382_v11, 4  ;;  %v796_v55 = vrot.slane %v1382_v11, 5 }
  0xba   :  { %v605_v56 = vsel %vm65_vm2, %v604_v35, %v603_v51  ;;  %v797_v57 = vrot.slane %v1382_v11, 6  ;;  %v798_v60 = vrot.slane %v1382_v11, 7  ;;  %v1491_v61 = vsub.f32 %v1262_v54, %v1382_v11 }
  0xbb   :  { %v607_v19 = vsel %vm68_vm3, %v606_v36, %v605_v56  ;;  %v1495_v33 = vsub.f32 %v1271_v58, %v792_v49  ;;  %v1498_v39 = vsub.f32 %v1276_v59, %v793_v50  ;;  %v1501_v42 = vsub.f32 %v1284_v63, %v794_v52  ;;  %v25_v56 = vld [vmem:[%s1741_s3] sm:$0xff] }
  0xbc   :  { %v609_v43 = vsel %vm71_vm4, %v608_v40, %v607_v19  ;;  %v1505_v44 = vsub.f32 %v1289_v8, %v795_v53  ;;  %v1508_v24 = vsub.f32 %v1298_v13, %v796_v55  ;;  %v1511_v54 = vsub.f32 %v1303_v14, %v797_v57  ;;  %v26_v57 = vld [vmem:[%s1741_s3 + $0x8] sm:$0xff] }
  0xbd   :  { %v611_v58 = vsel %vm74_vm5, %v610_v41, %v609_v43  ;;  %v1515_v11 = vsub.f32 %v1310_v21, %v798_v60  ;;  %v815_v59 = vmul.f32 %v1491_v61, %v1491_v61  ;;  %v816_v63 = vmul.f32 %v1495_v33, %v1495_v33  ;;  %v29_v43 = vld [vmem:[%s1741_s3 + $0x20] sm:$0xff] }
  0xbe   :  { %v613_v8 = vsel %vm77_vm6, %v612_v46, %v611_v58  ;;  %v817_v13 = vmul.f32 %v1498_v39, %v1498_v39  ;;  %v818_v14 = vmul.f32 %v1501_v42, %v1501_v42  ;;  %v819_v47 = vmul.f32 %v1505_v44, %v1505_v44  ;;  %v30_v58 = vld [vmem:[%s1741_s3 + $0x28] sm:$0xff] }
  0xbf   :  { %v615_v21 = vsel %vm80_vm7, %v613_v8, 0.0  ;;  %v820_v48 = vmul.f32 %v1508_v24, %v1508_v24  ;;  %v821_v7 = vmul.f32 %v1511_v54, %v1511_v54  ;;  %v822_v26 = vmul.f32 %v1515_v11, %v1515_v11 }
  0xc0   :  { %616 = vadd.xlane.f32.xlu1 %v615_v21  ;;  %v831_v30 = vrot.slane %v816_v63, 7  ;;  %v833_v31 = vrot.slane %v817_v13, 6  ;;  %v835_v32 = vrot.slane %v818_v14, 5  ;;  %v837_v34 = vrot.slane %v819_v47, 4  ;;  %v1562_v21 = vld [vmem:[%s1741_s3 + $0x10] sm:$0xff] }
  0xc1   :  { %v839_v36 = vrot.slane %v820_v48, 3  ;;  %v841_v41 = vrot.slane %v821_v7, 2  ;;  %v843_v46 = vrot.slane %v822_v26, 1  ;;  %v1069_v55 = vmov 0.0|0.0   ;;  %v1567_v48 = vld [vmem:[%s1741_s3 + $0x18] sm:$0xff]  ;;  %v1572_v7 = vld [vmem:[%s1741_s3 + $0x30] sm:$0xff] }
  0xc2   :  { %v832_v35 = vsel %vm59_vm0, %v831_v30, %v815_v59  ;;  %1040 = vmatprep.subr.bf16.mxu1 %v1069_v55  ;;  %v1071_v60 = vmov 0.0   ;;  %v1041_v19 = vpack.c.bf16 %v26_v57, %v25_v56  ;;  %1046 = vmatprep.subr.bf16.mxu0 %v1069_v55  ;;  %v1047_v59 = vpack.c.bf16 %v30_v58, %v29_v43  ;;  %v1577_v26 = vld [vmem:[%s1741_s3 + $0x38] sm:$0xff] }
  0xc3   :  { %v834_v40 = vsel %vm62_vm1, %v833_v31, %v832_v35  ;;  %1016 = vmatprep.mubr.msk.f32.mxu1 %vm1070_vm8, %v1071_v60  ;;  %1030 = vmatprep.mubr.msk.f32.mxu0 %vm1070_vm8, %v1071_v60  ;;  %v1586_v35 = vld [vmem:[%s1742_s1] ss:$0 sm:$0xff] }
  0xc4   :  { %v836_v45 = vsel %vm65_vm2, %v835_v32, %v834_v40  ;;  %1042 = vmatpush3.bf16.msra.mxu1 %v1041_v19  ;;  %1048 = vmatpush3.bf16.msra.mxu0 %v1047_v59  ;;  %v1044_v32 = vpack.c.bf16 %v1567_v48, %v1562_v21  ;;  %v1596_v19 = vld [vmem:[%s1743_s2] ss:$0 sm:$0xff] }
  0xc5   :  { %v838_v49 = vsel %vm68_vm3, %v837_v34, %v836_v45  ;;  %1043 = vmatprep.subr.bf16.mxu1 %v1069_v55  ;;  %1049 = vmatprep.subr.bf16.mxu0 %v1069_v55  ;;  %v1050_v34 = vpack.c.bf16 %v1577_v26, %v1572_v7 }
  0xc6   :  { %v840_v50 = vsel %vm71_vm4, %v839_v36, %v838_v49 }
  0xc7   :  { %v842_v51 = vsel %vm74_vm5, %v841_v41, %v840_v50 }
  0xc8   :  { %v844_v52 = vsel %vm77_vm6, %v843_v46, %v842_v51 }
  0xc9   :  { %v846_v53 = vsel %vm80_vm7, %v844_v52, 0.0 }
  0xca   :  { %847 = vadd.xlane.f32.xlu1 %v846_v53 }
 0x13a   :  { %v143_v63 = vpop.xlane.xlu0 %142 }
 0x13b   :  { %v144_v8 = vmul.f32 0.0625, %v143_v63 }
 0x13d   :  { %v145_v13 = vadd.f32 1e-05, %v144_v8 }
 0x13f   :  { %1061 = vrsqrt.f32 %v145_v13 }
 0x144   :  { %v386_v14 = vpop.xlane.xlu0 %385 }
 0x145   :  { %v387_v47 = vmul.f32 0.0625, %v386_v14 }
 0x147   :  { %v388_v30 = vadd.f32 1e-05, %v387_v47 }
 0x149   :  { %v1062_v31 = vpop.eup %1061  ;;  %1063 = vrsqrt.f32 %v388_v30 }
 0x14a   :  { %v148_v36 = vrot.slane %v1062_v31, 1  ;;  %v149_v40 = vrot.slane %v1062_v31, 2  ;;  %v150_v41 = vrot.slane %v1062_v31, 3  ;;  %v151_v45 = vrot.slane %v1062_v31, 4 }
 0x14b   :  { %v152_v46 = vrot.slane %v1062_v31, 5  ;;  %v153_v49 = vrot.slane %v1062_v31, 6  ;;  %v154_v50 = vrot.slane %v1062_v31, 7  ;;  %v163_v51 = vmul.f32 %v1062_v31, %v1332_v10 }
 0x14c   :  { %v164_v52 = vmul.f32 %v148_v36, %v1335_v12  ;;  %v165_v53 = vmul.f32 %v149_v40, %v1338_v17  ;;  %v166_v55 = vmul.f32 %v150_v41, %v1341_v18  ;;  %v167_v56 = vmul.f32 %v151_v45, %v1344_v25 }
 0x14d   :  { %v617_v57 = vpop.xlane.xlu1 %616  ;;  %v168_v43 = vmul.f32 %v152_v46, %v1347_v28  ;;  %v169_v58 = vmul.f32 %v153_v49, %v1350_v0  ;;  %v170_v10 = vmul.f32 %v154_v50, %v1353_v29  ;;  %v177_v12 = vmul.f32 %v1586_v35, %v163_v51 }
 0x14e   :  { %v618_v59 = vmul.f32 0.0625, %v617_v57  ;;  %v178_v17 = vmul.f32 %v1586_v35, %v164_v52  ;;  %v179_v18 = vmul.f32 %v1586_v35, %v165_v53  ;;  %v180_v25 = vmul.f32 %v1586_v35, %v166_v55 }
 0x14f   :  { %v181_v63 = vmul.f32 %v1586_v35, %v167_v56  ;;  %v182_v8 = vmul.f32 %v1586_v35, %v168_v43  ;;  %v183_v13 = vmul.f32 %v1586_v35, %v169_v58  ;;  %v184_v28 = vmul.f32 %v1586_v35, %v170_v10 }
 0x150   :  { %v619_v0 = vadd.f32 1e-05, %v618_v59  ;;  %v191_v29 = vadd.f32 %v1596_v19, %v177_v12  ;;  %v192_v14 = vadd.f32 %v1596_v19, %v178_v17  ;;  %v193_v47 = vadd.f32 %v1596_v19, %v179_v18 }
 0x151   :  { %v194_v30 = vadd.f32 %v1596_v19, %v180_v25  ;;  %v195_v31 = vadd.f32 %v1596_v19, %v181_v63  ;;  %v196_v36 = vadd.f32 %v1596_v19, %v182_v8  ;;  %v197_v40 = vadd.f32 %v1596_v19, %v183_v13 }
 0x152   :  { %1065 = vrsqrt.f32 %v619_v0  ;;  %v198_v41 = vadd.f32 %v1596_v19, %v184_v28  ;;  %v207_v45 = vrot.slane %v192_v14, 7  ;;  %v209_v46 = vrot.slane %v193_v47, 6 }
 0x153   :  { %v1064_v49 = vpop.eup %1063  ;;  %v211_v50 = vrot.slane %v194_v30, 5  ;;  %v213_v51 = vrot.slane %v195_v31, 4  ;;  %v215_v52 = vrot.slane %v196_v36, 3  ;;  %v217_v53 = vrot.slane %v197_v40, 2 }
 0x154   :  { %v208_v55 = vsel %vm59_vm0, %v207_v45, %v191_v29  ;;  %v219_v56 = vrot.slane %v198_v41, 1  ;;  %v391_v57 = vrot.slane %v1064_v49, 1  ;;  %v392_v43 = vrot.slane %v1064_v49, 2 }
 0x155   :  { %v210_v58 = vsel %vm62_vm1, %v209_v46, %v208_v55  ;;  %v393_v10 = vrot.slane %v1064_v49, 3  ;;  %v394_v12 = vrot.slane %v1064_v49, 4  ;;  %v395_v59 = vrot.slane %v1064_v49, 5 }
 0x156   :  { %v212_v17 = vsel %vm65_vm2, %v211_v50, %v210_v58  ;;  %v396_v18 = vrot.slane %v1064_v49, 6  ;;  %v397_v25 = vrot.slane %v1064_v49, 7  ;;  %v406_v63 = vmul.f32 %v1064_v49, %v1377_v62 }
 0x157   :  { %v848_v8 = vpop.xlane.xlu1 %847  ;;  %v214_v13 = vsel %vm68_vm3, %v213_v51, %v212_v17  ;;  %v407_v28 = vmul.f32 %v391_v57, %v1380_v9  ;;  %v408_v0 = vmul.f32 %v392_v43, %v1386_v2  ;;  %v409_v29 = vmul.f32 %v393_v10, %v1389_v3 }
 0x158   :  { %v849_v14 = vmul.f32 0.0625, %v848_v8  ;;  %v216_v47 = vsel %vm71_vm4, %v215_v52, %v214_v13  ;;  %v410_v30 = vmul.f32 %v394_v12, %v1393_v5  ;;  %v411_v31 = vmul.f32 %v395_v59, %v1396_v15 }
 0x159   :  { %v218_v36 = vsel %vm74_vm5, %v217_v53, %v216_v47  ;;  %v412_v62 = vmul.f32 %v396_v18, %v1399_v16  ;;  %v413_v40 = vmul.f32 %v397_v25, %v1403_v6  ;;  %v414_v41 = vmul.f32 %v1586_v35, %v406_v63 }
 0x15a   :  { %v850_v9 = vadd.f32 1e-05, %v849_v14  ;;  %v220_v2 = vsel %vm77_vm6, %v219_v56, %v218_v36  ;;  %v415_v3 = vmul.f32 %v1586_v35, %v407_v28  ;;  %v416_v45 = vmul.f32 %v1586_v35, %v408_v0 }
 0x15b   :  { %1017 = vmatmul.mubr.msk.f32.vlgmr.msra.gmra.mrb[0].mxu1 %vm80_vm7, %v220_v2  ;;  %v417_v5 = vmul.f32 %v1586_v35, %v409_v29  ;;  %v418_v15 = vmul.f32 %v1586_v35, %v410_v30  ;;  %v419_v46 = vmul.f32 %v1586_v35, %v411_v31  ;;  %v420_v16 = vmul.f32 %v1586_v35, %v412_v62 }
 0x15c   :  { %v1066_v6 = vpop.eup %1065  ;;  %1067 = vrsqrt.f32 %v850_v9  ;;  %1045 = vmatpush3.bf16.msra.mxu1 %v1044_v32  ;;  %1023 = vmatprep.mubr.msk.f32.mxu1 %vm1070_vm8, %v1071_v60  ;;  %v421_v49 = vmul.f32 %v1586_v35, %v413_v40  ;;  %v422_v50 = vadd.f32 %v1596_v19, %v414_v41  ;;  %v423_v51 = vadd.f32 %v1596_v19, %v415_v3 }
 0x15d   :  { %v622_v52 = vrot.slane %v1066_v6, 1  ;;  %v623_v53 = vrot.slane %v1066_v6, 2  ;;  %v624_v55 = vrot.slane %v1066_v6, 3  ;;  %v625_v56 = vrot.slane %v1066_v6, 4 }
 0x15e   :  { %v626_v57 = vrot.slane %v1066_v6, 5  ;;  %v627_v43 = vrot.slane %v1066_v6, 6  ;;  %v628_v58 = vrot.slane %v1066_v6, 7  ;;  %v637_v10 = vmul.f32 %v1066_v6, %v1435_v1 }
 0x15f   :  { %v638_v21 = vmul.f32 %v622_v52, %v1438_v4  ;;  %v639_v48 = vmul.f32 %v623_v53, %v1441_v27  ;;  %v640_v32 = vmul.f32 %v624_v55, %v1445_v20  ;;  %v641_v12 = vmul.f32 %v625_v56, %v1448_v22 }
 0x160   :  { %v642_v59 = vmul.f32 %v626_v57, %v1451_v23  ;;  %v643_v17 = vmul.f32 %v627_v43, %v1455_v37  ;;  %v644_v18 = vmul.f32 %v628_v58, %v1458_v38  ;;  %v645_v25 = vmul.f32 %v1586_v35, %v637_v10 }
 0x161   :  { %v646_v63 = vmul.f32 %v1586_v35, %v638_v21  ;;  %v647_v1 = vmul.f32 %v1586_v35, %v639_v48  ;;  %v648_v4 = vmul.f32 %v1586_v35, %v640_v32  ;;  %v649_v27 = vmul.f32 %v1586_v35, %v641_v12 }
 0x162   :  { %v650_v20 = vmul.f32 %v1586_v35, %v642_v59  ;;  %v651_v22 = vmul.f32 %v1586_v35, %v643_v17  ;;  %v652_v23 = vmul.f32 %v1586_v35, %v644_v18  ;;  %v653_v37 = vadd.f32 %v1596_v19, %v645_v25 }
 0x163   :  { %v654_v38 = vadd.f32 %v1596_v19, %v646_v63  ;;  %v655_v8 = vadd.f32 %v1596_v19, %v647_v1  ;;  %v656_v13 = vadd.f32 %v1596_v19, %v648_v4  ;;  %v657_v28 = vadd.f32 %v1596_v19, %v649_v27 }
 0x164   :  { %v658_v0 = vadd.f32 %v1596_v19, %v650_v20  ;;  %v659_v29 = vadd.f32 %v1596_v19, %v651_v22  ;;  %v660_v14 = vadd.f32 %v1596_v19, %v652_v23  ;;  %v424_v47 = vadd.f32 %v1596_v19, %v416_v45 }
 0x165   :  { %v669_v30 = vrot.slane %v654_v38, 7  ;;  %v671_v31 = vrot.slane %v655_v8, 6  ;;  %v673_v36 = vrot.slane %v656_v13, 5  ;;  %v675_v62 = vrot.slane %v657_v28, 4 }
 0x166   :  { %v1068_v40 = vpop.eup %1067  ;;  %v677_v41 = vrot.slane %v658_v0, 3  ;;  %v679_v9 = vrot.slane %v659_v29, 2  ;;  %v681_v2 = vrot.slane %v660_v14, 1  ;;  %v425_v3 = vadd.f32 %v1596_v19, %v417_v5 }
 0x167   :  { %v670_v6 = vsel %vm59_vm0, %v669_v30, %v653_v37  ;;  %v426_v52 = vadd.f32 %v1596_v19, %v418_v15  ;;  %v427_v53 = vadd.f32 %v1596_v19, %v419_v46  ;;  %v428_v55 = vadd.f32 %v1596_v19, %v420_v16 }
 0x168   :  { %v672_v45 = vsel %vm62_vm1, %v671_v31, %v670_v6  ;;  %v429_v56 = vadd.f32 %v1596_v19, %v421_v49  ;;  %v438_v57 = vrot.slane %v423_v51, 7  ;;  %v440_v43 = vrot.slane %v424_v47, 6 }
 0x169   :  { %v674_v58 = vsel %vm65_vm2, %v673_v36, %v672_v45  ;;  %v442_v10 = vrot.slane %v425_v3, 5  ;;  %v444_v21 = vrot.slane %v426_v52, 4  ;;  %v446_v48 = vrot.slane %v427_v53, 3 }
 0x16a   :  { %v676_v5 = vsel %vm68_vm3, %v675_v62, %v674_v58  ;;  %v439_v32 = vsel %vm59_vm0, %v438_v57, %v422_v50  ;;  %v448_v15 = vrot.slane %v428_v55, 2  ;;  %v450_v12 = vrot.slane %v429_v56, 1  ;;  %v33_v58 = vld [vmem:[%s1745_s5] sm:$0xff] }
 0x16b   :  { %v678_v46 = vsel %vm71_vm4, %v677_v41, %v676_v5  ;;  %v441_v16 = vsel %vm62_vm1, %v440_v43, %v439_v32  ;;  %v853_v59 = vrot.slane %v1068_v40, 1  ;;  %v854_v17 = vrot.slane %v1068_v40, 2 }
 0x16c   :  { %v680_v49 = vsel %vm74_vm5, %v679_v9, %v678_v46  ;;  %v443_v51 = vsel %vm65_vm2, %v442_v10, %v441_v16  ;;  %v855_v18 = vrot.slane %v1068_v40, 3  ;;  %v856_v25 = vrot.slane %v1068_v40, 4  ;;  %v993_v10 = vld [vmem:[%s1744_s4] ss:$0 sm:$0xff] }
 0x16d   :  { %v682_v63 = vsel %vm77_vm6, %v681_v2, %v680_v49  ;;  %v445_v1 = vsel %vm68_vm3, %v444_v21, %v443_v51  ;;  %v857_v4 = vrot.slane %v1068_v40, 5  ;;  %v858_v50 = vrot.slane %v1068_v40, 6 }
 0x16e   :  { %1031 = vmatmul.mubr.msk.f32.vlgmr.msra.gmra.mrb[0].mxu0 %vm80_vm7, %v682_v63  ;;  %v447_v27 = vsel %vm71_vm4, %v446_v48, %v445_v1  ;;  %v859_v20 = vrot.slane %v1068_v40, 7  ;;  %v868_v22 = vmul.f32 %v1068_v40, %v1491_v61  ;;  %v869_v23 = vmul.f32 %v853_v59, %v1495_v33 }
 0x16f   :  { %1051 = vmatpush3.bf16.msra.mxu0 %v1050_v34  ;;  %v449_v37 = vsel %vm74_vm5, %v448_v15, %v447_v27  ;;  %1037 = vmatprep.mubr.msk.f32.mxu0 %vm1070_vm8, %v1071_v60  ;;  %v870_v38 = vmul.f32 %v854_v17, %v1498_v39  ;;  %v871_v8 = vmul.f32 %v855_v18, %v1501_v42 }
 0x170   :  { %v451_v13 = vsel %vm77_vm6, %v450_v12, %v449_v37  ;;  %v872_v28 = vmul.f32 %v856_v25, %v1505_v44  ;;  %v873_v61 = vmul.f32 %v857_v4, %v1508_v24  ;;  %v874_v33 = vmul.f32 %v858_v50, %v1511_v54 }
 0x171   :  { %1024 = vmatmul.mubr.msk.f32.vlgmr.msra.gmra.mrb[0].mxu1 %vm80_vm7, %v451_v13  ;;  %v875_v7 = vmul.f32 %v859_v20, %v1515_v11  ;;  %v876_v26 = vmul.f32 %v1586_v35, %v868_v22  ;;  %v877_v60 = vmul.f32 %v1586_v35, %v869_v23  ;;  %v878_v39 = vmul.f32 %v1586_v35, %v870_v38 }
 0x172   :  { %v879_v42 = vmul.f32 %v1586_v35, %v871_v8  ;;  %v880_v34 = vmul.f32 %v1586_v35, %v872_v28  ;;  %v881_v44 = vmul.f32 %v1586_v35, %v873_v61  ;;  %v882_v24 = vmul.f32 %v1586_v35, %v874_v33 }
 0x173   :  { %v883_v54 = vmul.f32 %v1586_v35, %v875_v7  ;;  %v885_v0 = vadd.f32 %v1596_v19, %v877_v60  ;;  %v886_v11 = vadd.f32 %v1596_v19, %v878_v39  ;;  %v884_v47 = vadd.f32 %v1596_v19, %v876_v26 }
 0x174   :  { %v887_v29 = vadd.f32 %v1596_v19, %v879_v42  ;;  %v888_v14 = vadd.f32 %v1596_v19, %v880_v34  ;;  %v889_v30 = vadd.f32 %v1596_v19, %v881_v44  ;;  %v890_v62 = vadd.f32 %v1596_v19, %v882_v24 }
 0x175   :  { %v900_v31 = vrot.slane %v885_v0, 7  ;;  %v902_v36 = vrot.slane %v886_v11, 6  ;;  %v891_v40 = vadd.f32 %v1596_v19, %v883_v54  ;;  %v41_v21 = vadd.f32 %v993_v10, %v33_v58 }
 0x176   :  { %v904_v41 = vrot.slane %v887_v29, 5  ;;  %v906_v2 = vrot.slane %v888_v14, 4  ;;  %v908_v6 = vrot.slane %v889_v30, 3  ;;  %v910_v53 = vrot.slane %v890_v62, 2 }
 0x177   :  { %v901_v35 = vsel %vm59_vm0, %v900_v31, %v884_v47  ;;  %v912_v45 = vrot.slane %v891_v40, 1 }
 0x178   :  { %v903_v9 = vsel %vm62_vm1, %v902_v36, %v901_v35 }
 0x179   :  { %v905_v3 = vsel %vm65_vm2, %v904_v41, %v903_v9 }
 0x17a   :  { %v907_v52 = vsel %vm68_vm3, %v906_v2, %v905_v3 }
 0x17b   :  { %v909_v55 = vsel %vm71_vm4, %v908_v6, %v907_v52 }
 0x17c   :  { %v911_v56 = vsel %vm74_vm5, %v910_v53, %v909_v55 }
 0x17d   :  { %v913_v57 = vsel %vm77_vm6, %v912_v45, %v911_v56 }
 0x17e   :  { %1038 = vmatmul.mubr.msk.f32.vlgmr.msra.gmra.mrb[0].mxu0 %vm80_vm7, %v913_v57 }
 0x244   :  { %v520_v19 = vpop.f32.mrb[0].mxu1 }
 0x245   :  { %v1025_v43 = vpop.f32.mrb[1].mxu1  ;;  %v1052_v48 = vadd.f32 %v520_v19, %v41_v21 }
 0x251   :  { %v982_v5 = vpop.f32.mrb[0].mxu0 }
 0x252   :  { %v1053_v32 = vadd.f32 %v1052_v48, %v982_v5  ;;  %v1039_v15 = vpop.f32.mrb[1].mxu0 }
 0x254   :  { %988 = vst.msk [vmem:[%s1746_s6] sm:$0xff] %vm987_vm9, %v1053_v32 }

// kernel: block_forward.10
= control target key start
LH: loop header
LB: loop body
LE: loop exit
PB: predicated region body
PF: predicated region fallthrough
CT: control target
= control target key end

     0   :  { %vm78_vm0 = vcmask 31744   ;;  %v6103_v0 = vmov 0.0   ;;  %vm6104_vm1 = vmmov 0   ;;  %vm2543_vm2 = vcmask 27648   ;;  %s7181_s1 = inlined_call_operand.vmem [shape: f32[32,4,4], index: 1, kind: input, shape index: {}]   ;;  %s7182_s0 = inlined_call_operand.vmem [shape: f32[32,4,4], index: 0, kind: input, shape index: {}]   ;;  %s7183_s2 = inlined_call_operand.vmem [shape: f32[32,4,4], index: 2, kind: input, shape index: {}]   ;;  %s7184_s3 = inlined_call_operand.vmem [shape: f32[32,4,4], index: 3, kind: output, shape index: {}]  }
   0x1   :  { %5653 = vmatprep.subr.mxu0 %v6103_v0  ;;  %v46_v1 = vld [vmem:[%s7181_s1] sm:$0xf]  ;;  %5655 = vmatprep.mubr.msk.f32.mxu0 %vm6104_vm1, %v6103_v0  ;;  %v47_v2 = vld [vmem:[%s7181_s1 + $0x4] sm:$0xf]  ;;  %v48_v4 = vld [vmem:[%s7181_s1 + $0x8] sm:$0xf] }
   0x2   :  { %5654 = vmatpush3.xpose.msk.msra.mxu0 %vm78_vm0, %v46_v1  ;;  %v14_v3 = vld [vmem:[%s7182_s0] sm:$0xf]  ;;  %5658 = vmatprep.subr.mxu1 %v6103_v0  ;;  %v15_v5 = vld [vmem:[%s7182_s0 + $0x4] sm:$0xf]  ;;  %v49_v6 = vld [vmem:[%s7181_s1 + $0xc] sm:$0xf] }
   0x3   :  { %5663 = vmatprep.subr.mxu0 %v6103_v0  ;;  %5659 = vmatpush3.xpose.msk.msra.mxu1 %vm78_vm0, %v47_v2  ;;  %v16_v7 = vld [vmem:[%s7182_s0 + $0x8] sm:$0xf]  ;;  %v50_v8 = vld [vmem:[%s7181_s1 + $0x10] sm:$0xf]  ;;  %v17_v9 = vld [vmem:[%s7182_s0 + $0xc] sm:$0xf] }
   0x4   :  { %5660 = vmatprep.mubr.msk.f32.mxu1 %vm6104_vm1, %v6103_v0  ;;  %5668 = vmatprep.subr.mxu1 %v6103_v0  ;;  %v51_v10 = vld [vmem:[%s7181_s1 + $0x14] sm:$0xf]  ;;  %v18_v11 = vld [vmem:[%s7182_s0 + $0x10] sm:$0xf]  ;;  %v52_v12 = vld [vmem:[%s7181_s1 + $0x18] sm:$0xf] }
   0x5   :  { %5656 = vmatmul.mubr.msk.f32.vlgmr.msra.gmra.mrb[0].mxu0 %vm78_vm0, %v14_v3  ;;  %v19_v13 = vld [vmem:[%s7182_s0 + $0x14] sm:$0xf]  ;;  %v53_v14 = vld [vmem:[%s7181_s1 + $0x1c] sm:$0xf]  ;;  %v20_v15 = vld [vmem:[%s7182_s0 + $0x18] sm:$0xf] }
   0x6   :  { %5664 = vmatpush3.xpose.msk.msra.mxu0 %vm78_vm0, %v48_v4  ;;  %5665 = vmatprep.mubr.msk.f32.mxu0 %vm6104_vm1, %v6103_v0  ;;  %v54_v16 = vld [vmem:[%s7181_s1 + $0x20] sm:$0xf]  ;;  %v21_v17 = vld [vmem:[%s7182_s0 + $0x1c] sm:$0xf]  ;;  %v55_v18 = vld [vmem:[%s7181_s1 + $0x24] sm:$0xf] }
   0x7   :  { %5661 = vmatmul.mubr.msk.f32.vlgmr.msra.gmra.mrb[0].mxu1 %vm78_vm0, %v15_v5  ;;  %5673 = vmatprep.subr.mxu0 %v6103_v0  ;;  %v22_v19 = vld [vmem:[%s7182_s0 + $0x20] sm:$0xf]  ;;  %v56_v20 = vld [vmem:[%s7181_s1 + $0x28] sm:$0xf]  ;;  %v23_v21 = vld [vmem:[%s7182_s0 + $0x24] sm:$0xf] }
   0x8   :  { %5669 = vmatpush3.xpose.msk.msra.mxu1 %vm78_vm0, %v49_v6  ;;  %5670 = vmatprep.mubr.msk.f32.mxu1 %vm6104_vm1, %v6103_v0  ;;  %v57_v22 = vld [vmem:[%s7181_s1 + $0x2c] sm:$0xf]  ;;  %v24_v23 = vld [vmem:[%s7182_s0 + $0x28] sm:$0xf]  ;;  %v58_v24 = vld [vmem:[%s7181_s1 + $0x30] sm:$0xf] }
   0x9   :  { %5666 = vmatmul.mubr.msk.f32.vlgmr.msra.gmra.mrb[2].mxu0 %vm78_vm0, %v16_v7  ;;  %5678 = vmatprep.subr.mxu1 %v6103_v0  ;;  %v25_v25 = vld [vmem:[%s7182_s0 + $0x2c] sm:$0xf]  ;;  %v59_v26 = vld [vmem:[%s7181_s1 + $0x34] sm:$0xf]  ;;  %v26_v27 = vld [vmem:[%s7182_s0 + $0x30] sm:$0xf] }
   0xa   :  { %5674 = vmatpush3.xpose.msk.msra.mxu0 %vm78_vm0, %v50_v8  ;;  %5675 = vmatprep.mubr.msk.f32.mxu0 %vm6104_vm1, %v6103_v0  ;;  %v60_v28 = vld [vmem:[%s7181_s1 + $0x38] sm:$0xf]  ;;  %v27_v29 = vld [vmem:[%s7182_s0 + $0x34] sm:$0xf]  ;;  %v61_v30 = vld [vmem:[%s7181_s1 + $0x3c] sm:$0xf] }
   0xb   :  { %5671 = vmatmul.mubr.msk.f32.vlgmr.msra.gmra.mrb[2].mxu1 %vm78_vm0, %v17_v9  ;;  %5683 = vmatprep.subr.mxu0 %v6103_v0  ;;  %v28_v31 = vld [vmem:[%s7182_s0 + $0x38] sm:$0xf]  ;;  %v62_v32 = vld [vmem:[%s7181_s1 + $0x40] sm:$0xf]  ;;  %v29_v33 = vld [vmem:[%s7182_s0 + $0x3c] sm:$0xf] }
   0xc   :  { %5679 = vmatpush3.xpose.msk.msra.mxu1 %vm78_vm0, %v51_v10  ;;  %5680 = vmatprep.mubr.msk.f32.mxu1 %vm6104_vm1, %v6103_v0  ;;  %v63_v34 = vld [vmem:[%s7181_s1 + $0x44] sm:$0xf]  ;;  %v30_v35 = vld [vmem:[%s7182_s0 + $0x40] sm:$0xf]  ;;  %v64_v36 = vld [vmem:[%s7181_s1 + $0x48] sm:$0xf] }
   0xd   :  { %5676 = vmatmul.mubr.msk.f32.vlgmr.msra.gmra.mrb[4].mxu0 %vm78_vm0, %v18_v11  ;;  %5688 = vmatprep.subr.mxu1 %v6103_v0  ;;  %v31_v37 = vld [vmem:[%s7182_s0 + $0x44] sm:$0xf]  ;;  %v65_v38 = vld [vmem:[%s7181_s1 + $0x4c] sm:$0xf]  ;;  %v32_v39 = vld [vmem:[%s7182_s0 + $0x48] sm:$0xf] }
   0xe   :  { %5684 = vmatpush3.xpose.msk.msra.mxu0 %vm78_vm0, %v52_v12  ;;  %5685 = vmatprep.mubr.msk.f32.mxu0 %vm6104_vm1, %v6103_v0  ;;  %v66_v40 = vld [vmem:[%s7181_s1 + $0x50] sm:$0xf]  ;;  %v33_v41 = vld [vmem:[%s7182_s0 + $0x4c] sm:$0xf]  ;;  %v67_v42 = vld [vmem:[%s7181_s1 + $0x54] sm:$0xf] }
   0xf   :  { %5681 = vmatmul.mubr.msk.f32.vlgmr.msra.gmra.mrb[4].mxu1 %vm78_vm0, %v19_v13  ;;  %5693 = vmatprep.subr.mxu0 %v6103_v0  ;;  %v34_v43 = vld [vmem:[%s7182_s0 + $0x50] sm:$0xf]  ;;  %v68_v44 = vld [vmem:[%s7181_s1 + $0x58] sm:$0xf]  ;;  %v35_v45 = vld [vmem:[%s7182_s0 + $0x54] sm:$0xf] }
  0x10   :  { %5689 = vmatpush3.xpose.msk.msra.mxu1 %vm78_vm0, %v53_v14  ;;  %5690 = vmatprep.mubr.msk.f32.mxu1 %vm6104_vm1, %v6103_v0  ;;  %v69_v46 = vld [vmem:[%s7181_s1 + $0x5c] sm:$0xf]  ;;  %v36_v47 = vld [vmem:[%s7182_s0 + $0x58] sm:$0xf]  ;;  %v70_v48 = vld [vmem:[%s7181_s1 + $0x60] sm:$0xf] }
  0x11   :  { %5686 = vmatmul.mubr.msk.f32.vlgmr.msra.gmra.mrb[6].mxu0 %vm78_vm0, %v20_v15  ;;  %5698 = vmatprep.subr.mxu1 %v6103_v0  ;;  %v37_v49 = vld [vmem:[%s7182_s0 + $0x5c] sm:$0xf]  ;;  %v71_v50 = vld [vmem:[%s7181_s1 + $0x64] sm:$0xf]  ;;  %v38_v51 = vld [vmem:[%s7182_s0 + $0x60] sm:$0xf] }
  0x12   :  { %5694 = vmatpush3.xpose.msk.msra.mxu0 %vm78_vm0, %v54_v16  ;;  %5695 = vmatprep.mubr.msk.f32.mxu0 %vm6104_vm1, %v6103_v0  ;;  %v72_v52 = vld [vmem:[%s7181_s1 + $0x68] sm:$0xf]  ;;  %v39_v53 = vld [vmem:[%s7182_s0 + $0x64] sm:$0xf]  ;;  %v73_v54 = vld [vmem:[%s7181_s1 + $0x6c] sm:$0xf] }
  0x13   :  { %5691 = vmatmul.mubr.msk.f32.vlgmr.msra.gmra.mrb[6].mxu1 %vm78_vm0, %v21_v17  ;;  %5703 = vmatprep.subr.mxu0 %v6103_v0  ;;  %v40_v55 = vld [vmem:[%s7182_s0 + $0x68] sm:$0xf]  ;;  %v74_v56 = vld [vmem:[%s7181_s1 + $0x70] sm:$0xf]  ;;  %v41_v57 = vld [vmem:[%s7182_s0 + $0x6c] sm:$0xf] }
  0x14   :  { %5699 = vmatpush3.xpose.msk.msra.mxu1 %vm78_vm0, %v55_v18  ;;  %5700 = vmatprep.mubr.msk.f32.mxu1 %vm6104_vm1, %v6103_v0  ;;  %v75_v58 = vld [vmem:[%s7181_s1 + $0x74] sm:$0xf]  ;;  %v42_v59 = vld [vmem:[%s7182_s0 + $0x70] sm:$0xf]  ;;  %v76_v60 = vld [vmem:[%s7181_s1 + $0x78] sm:$0xf] }
  0x15   :  { %5696 = vmatmul.mubr.msk.f32.vlgmr.msra.gmra.mrb[8].mxu0 %vm78_vm0, %v22_v19  ;;  %5708 = vmatprep.subr.mxu1 %v6103_v0  ;;  %v43_v61 = vld [vmem:[%s7182_s0 + $0x74] sm:$0xf]  ;;  %v77_v62 = vld [vmem:[%s7181_s1 + $0x7c] sm:$0xf]  ;;  %v44_v63 = vld [vmem:[%s7182_s0 + $0x78] sm:$0xf] }
  0x16   :  { %5704 = vmatpush3.xpose.msk.msra.mxu0 %vm78_vm0, %v56_v20  ;;  %5705 = vmatprep.mubr.msk.f32.mxu0 %vm6104_vm1, %v6103_v0  ;;  %v45_v1 = vld [vmem:[%s7182_s0 + $0x7c] sm:$0xf]  ;;  %vm2931_vm3 = vcmask 1043456  }
  0x17   :  { %5701 = vmatmul.mubr.msk.f32.vlgmr.msra.gmra.mrb[8].mxu1 %vm78_vm0, %v23_v21  ;;  %5713 = vmatprep.subr.mxu0 %v6103_v0 }
  0x18   :  { %5709 = vmatpush3.xpose.msk.msra.mxu1 %vm78_vm0, %v57_v22  ;;  %5710 = vmatprep.mubr.msk.f32.mxu1 %vm6104_vm1, %v6103_v0 }
  0x19   :  { %5706 = vmatmul.mubr.msk.f32.vlgmr.msra.gmra.mrb[10].mxu0 %vm78_vm0, %v24_v23  ;;  %5718 = vmatprep.subr.mxu1 %v6103_v0 }
  0x1a   :  { %5714 = vmatpush3.xpose.msk.msra.mxu0 %vm78_vm0, %v58_v24  ;;  %5715 = vmatprep.mubr.msk.f32.mxu0 %vm6104_vm1, %v6103_v0 }
  0x1b   :  { %5711 = vmatmul.mubr.msk.f32.vlgmr.msra.gmra.mrb[10].mxu1 %vm78_vm0, %v25_v25  ;;  %5723 = vmatprep.subr.mxu0 %v6103_v0 }
  0x1c   :  { %5719 = vmatpush3.xpose.msk.msra.mxu1 %vm78_vm0, %v59_v26  ;;  %5720 = vmatprep.mubr.msk.f32.mxu1 %vm6104_vm1, %v6103_v0 }
  0x1d   :  { %5716 = vmatmul.mubr.msk.f32.vlgmr.msra.gmra.mrb[12].mxu0 %vm78_vm0, %v26_v27  ;;  %5728 = vmatprep.subr.mxu1 %v6103_v0 }
  0x1e   :  { %5724 = vmatpush3.xpose.msk.msra.mxu0 %vm78_vm0, %v60_v28  ;;  %5725 = vmatprep.mubr.msk.f32.mxu0 %vm6104_vm1, %v6103_v0 }
  0x1f   :  { %5721 = vmatmul.mubr.msk.f32.vlgmr.msra.gmra.mrb[12].mxu1 %vm78_vm0, %v27_v29  ;;  %5733 = vmatprep.subr.mxu0 %v6103_v0 }
  0x20   :  { %5729 = vmatpush3.xpose.msk.msra.mxu1 %vm78_vm0, %v61_v30  ;;  %5730 = vmatprep.mubr.msk.f32.mxu1 %vm6104_vm1, %v6103_v0 }
  0x21   :  { %5726 = vmatmul.mubr.msk.f32.vlgmr.msra.gmra.mrb[14].mxu0 %vm78_vm0, %v28_v31  ;;  %5738 = vmatprep.subr.mxu1 %v6103_v0 }
  0x22   :  { %5734 = vmatpush3.xpose.msk.msra.mxu0 %vm78_vm0, %v62_v32  ;;  %5735 = vmatprep.mubr.msk.f32.mxu0 %vm6104_vm1, %v6103_v0 }
  0x23   :  { %5731 = vmatmul.mubr.msk.f32.vlgmr.msra.gmra.mrb[14].mxu1 %vm78_vm0, %v29_v33  ;;  %5743 = vmatprep.subr.mxu0 %v6103_v0 }
  0x24   :  { %5739 = vmatpush3.xpose.msk.msra.mxu1 %vm78_vm0, %v63_v34  ;;  %5740 = vmatprep.mubr.msk.f32.mxu1 %vm6104_vm1, %v6103_v0 }
  0x25   :  { %5736 = vmatmul.mubr.msk.f32.vlgmr.msra.gmra.mrb[16].mxu0 %vm78_vm0, %v30_v35  ;;  %5748 = vmatprep.subr.mxu1 %v6103_v0 }
  0x26   :  { %5744 = vmatpush3.xpose.msk.msra.mxu0 %vm78_vm0, %v64_v36  ;;  %5745 = vmatprep.mubr.msk.f32.mxu0 %vm6104_vm1, %v6103_v0 }
  0x27   :  { %5741 = vmatmul.mubr.msk.f32.vlgmr.msra.gmra.mrb[16].mxu1 %vm78_vm0, %v31_v37  ;;  %5753 = vmatprep.subr.mxu0 %v6103_v0 }
  0x28   :  { %5749 = vmatpush3.xpose.msk.msra.mxu1 %vm78_vm0, %v65_v38  ;;  %5750 = vmatprep.mubr.msk.f32.mxu1 %vm6104_vm1, %v6103_v0 }
  0x29   :  { %5746 = vmatmul.mubr.msk.f32.vlgmr.msra.gmra.mrb[18].mxu0 %vm78_vm0, %v32_v39  ;;  %5758 = vmatprep.subr.mxu1 %v6103_v0 }
  0x2a   :  { %5754 = vmatpush3.xpose.msk.msra.mxu0 %vm78_vm0, %v66_v40  ;;  %5755 = vmatprep.mubr.msk.f32.mxu0 %vm6104_vm1, %v6103_v0 }
  0x2b   :  { %5751 = vmatmul.mubr.msk.f32.vlgmr.msra.gmra.mrb[18].mxu1 %vm78_vm0, %v33_v41  ;;  %5763 = vmatprep.subr.mxu0 %v6103_v0 }
  0x2c   :  { %5759 = vmatpush3.xpose.msk.msra.mxu1 %vm78_vm0, %v67_v42  ;;  %5760 = vmatprep.mubr.msk.f32.mxu1 %vm6104_vm1, %v6103_v0 }
  0x2d   :  { %5756 = vmatmul.mubr.msk.f32.vlgmr.msra.gmra.mrb[20].mxu0 %vm78_vm0, %v34_v43  ;;  %5768 = vmatprep.subr.mxu1 %v6103_v0 }
  0x2e   :  { %5764 = vmatpush3.xpose.msk.msra.mxu0 %vm78_vm0, %v68_v44  ;;  %5765 = vmatprep.mubr.msk.f32.mxu0 %vm6104_vm1, %v6103_v0 }
  0x2f   :  { %5761 = vmatmul.mubr.msk.f32.vlgmr.msra.gmra.mrb[20].mxu1 %vm78_vm0, %v35_v45  ;;  %5773 = vmatprep.subr.mxu0 %v6103_v0 }
  0x30   :  { %5769 = vmatpush3.xpose.msk.msra.mxu1 %vm78_vm0, %v69_v46  ;;  %5770 = vmatprep.mubr.msk.f32.mxu1 %vm6104_vm1, %v6103_v0 }
  0x31   :  { %5766 = vmatmul.mubr.msk.f32.vlgmr.msra.gmra.mrb[22].mxu0 %vm78_vm0, %v36_v47  ;;  %5778 = vmatprep.subr.mxu1 %v6103_v0 }
  0x32   :  { %5774 = vmatpush3.xpose.msk.msra.mxu0 %vm78_vm0, %v70_v48  ;;  %5775 = vmatprep.mubr.msk.f32.mxu0 %vm6104_vm1, %v6103_v0 }
  0x33   :  { %5771 = vmatmul.mubr.msk.f32.vlgmr.msra.gmra.mrb[22].mxu1 %vm78_vm0, %v37_v49  ;;  %5783 = vmatprep.subr.mxu0 %v6103_v0 }
  0x34   :  { %5779 = vmatpush3.xpose.msk.msra.mxu1 %vm78_vm0, %v71_v50  ;;  %5780 = vmatprep.mubr.msk.f32.mxu1 %vm6104_vm1, %v6103_v0 }
  0x35   :  { %5776 = vmatmul.mubr.msk.f32.vlgmr.msra.gmra.mrb[24].mxu0 %vm78_vm0, %v38_v51  ;;  %5788 = vmatprep.subr.mxu1 %v6103_v0 }
  0x36   :  { %5784 = vmatpush3.xpose.msk.msra.mxu0 %vm78_vm0, %v72_v52  ;;  %5785 = vmatprep.mubr.msk.f32.mxu0 %vm6104_vm1, %v6103_v0 }
  0x37   :  { %5781 = vmatmul.mubr.msk.f32.vlgmr.msra.gmra.mrb[24].mxu1 %vm78_vm0, %v39_v53  ;;  %5793 = vmatprep.subr.mxu0 %v6103_v0 }
  0x38   :  { %5789 = vmatpush3.xpose.msk.msra.mxu1 %vm78_vm0, %v73_v54  ;;  %5790 = vmatprep.mubr.msk.f32.mxu1 %vm6104_vm1, %v6103_v0 }
  0x39   :  { %5786 = vmatmul.mubr.msk.f32.vlgmr.msra.gmra.mrb[26].mxu0 %vm78_vm0, %v40_v55  ;;  %5798 = vmatprep.subr.mxu1 %v6103_v0 }
  0x3a   :  { %5794 = vmatpush3.xpose.msk.msra.mxu0 %vm78_vm0, %v74_v56  ;;  %5795 = vmatprep.mubr.msk.f32.mxu0 %vm6104_vm1, %v6103_v0 }
  0x3b   :  { %5791 = vmatmul.mubr.msk.f32.vlgmr.msra.gmra.mrb[26].mxu1 %vm78_vm0, %v41_v57  ;;  %5803 = vmatprep.subr.mxu0 %v6103_v0 }
  0x3c   :  { %5799 = vmatpush3.xpose.msk.msra.mxu1 %vm78_vm0, %v75_v58  ;;  %5800 = vmatprep.mubr.msk.f32.mxu1 %vm6104_vm1, %v6103_v0 }
  0x3d   :  { %5796 = vmatmul.mubr.msk.f32.vlgmr.msra.gmra.mrb[28].mxu0 %vm78_vm0, %v42_v59  ;;  %5808 = vmatprep.subr.mxu1 %v6103_v0 }
  0x3e   :  { %5804 = vmatpush3.xpose.msk.msra.mxu0 %vm78_vm0, %v76_v60  ;;  %5805 = vmatprep.mubr.msk.f32.mxu0 %vm6104_vm1, %v6103_v0 }
  0x3f   :  { %5801 = vmatmul.mubr.msk.f32.vlgmr.msra.gmra.mrb[28].mxu1 %vm78_vm0, %v43_v61  ;;  %5813 = vmatprep.subr.mxu0 %v6103_v0 }
  0x40   :  { %5809 = vmatpush3.xpose.msk.msra.mxu1 %vm78_vm0, %v77_v62  ;;  %5810 = vmatprep.mubr.msk.f32.mxu1 %vm6104_vm1, %v6103_v0 }
  0x41   :  { %5806 = vmatmul.mubr.msk.f32.vlgmr.msra.gmra.mrb[30].mxu0 %vm78_vm0, %v44_v63  ;;  %5818 = vmatprep.subr.mxu1 %v6103_v0 }
  0x42   :  { %5815 = vmatprep.mubr.msk.f32.mxu0 %vm6104_vm1, %v6103_v0 }
  0x43   :  { %5811 = vmatmul.mubr.msk.f32.vlgmr.msra.gmra.mrb[30].mxu1 %vm78_vm0, %v45_v1 }
  0x44   :  { %5820 = vmatprep.mubr.msk.f32.mxu1 %vm6104_vm1, %v6103_v0 }
  0xd8   :  { %v151_v2 = vpop.f32.mrb[0].mxu0 }
  0xd9   :  { %v6483_v3 = vmul.f32 0.5, %v151_v2  ;;  %v5657_v4 = vpop.f32.mrb[1].mxu0 }
  0xda   :  { %v227_v5 = vpop.f32.mrb[0].mxu1 }
  0xdb   :  { %v6485_v6 = vmul.f32 0.5, %v227_v5  ;;  %v2544_v7 = vsel %vm2543_vm2, %v6483_v3, -inf  ;;  %v5662_v8 = vpop.f32.mrb[1].mxu1 }
  0xdc   :  { %2545 = vmax.xlane.f32.xlu0 %v2544_v7  ;;  %v303_v9 = vpop.f32.mrb[2].mxu0 }
  0xdd   :  { %v6489_v10 = vmul.f32 0.5, %v303_v9  ;;  %v5667_v11 = vpop.f32.mrb[3].mxu0  ;;  %v2547_v12 = vsel %vm2543_vm2, %v6485_v6, -inf }
  0xde   :  { %v379_v13 = vpop.f32.mrb[2].mxu1 }
  0xdf   :  { %v6493_v14 = vmul.f32 0.5, %v379_v13  ;;  %v2550_v15 = vsel %vm2543_vm2, %v6489_v10, -inf  ;;  %v5672_v16 = vpop.f32.mrb[3].mxu1 }
  0xe0   :  { %2548 = vmax.xlane.f32.xlu0 %v2547_v12  ;;  %2551 = vmax.xlane.f32.xlu1 %v2550_v15  ;;  %v455_v17 = vpop.f32.mrb[4].mxu0 }
  0xe1   :  { %v6497_v18 = vmul.f32 0.5, %v455_v17  ;;  %v5677_v19 = vpop.f32.mrb[5].mxu0  ;;  %v2553_v20 = vsel %vm2543_vm2, %v6493_v14, -inf }
  0xe2   :  { %v531_v21 = vpop.f32.mrb[4].mxu1 }
  0xe3   :  { %v6501_v22 = vmul.f32 0.5, %v531_v21  ;;  %v2556_v23 = vsel %vm2543_vm2, %v6497_v18, -inf  ;;  %v5682_v24 = vpop.f32.mrb[5].mxu1 }
  0xe4   :  { %2554 = vmax.xlane.f32.xlu1 %v2553_v20  ;;  %2557 = vmax.xlane.f32.xlu0 %v2556_v23  ;;  %v607_v25 = vpop.f32.mrb[6].mxu0 }
  0xe5   :  { %v6505_v26 = vmul.f32 0.5, %v607_v25  ;;  %v5687_v27 = vpop.f32.mrb[7].mxu0  ;;  %v2559_v28 = vsel %vm2543_vm2, %v6501_v22, -inf }
  0xe6   :  { %v683_v29 = vpop.f32.mrb[6].mxu1 }
  0xe7   :  { %v6509_v30 = vmul.f32 0.5, %v683_v29  ;;  %v2562_v31 = vsel %vm2543_vm2, %v6505_v26, -inf  ;;  %v5692_v32 = vpop.f32.mrb[7].mxu1 }
  0xe8   :  { %2560 = vmax.xlane.f32.xlu1 %v2559_v28  ;;  %2563 = vmax.xlane.f32.xlu0 %v2562_v31  ;;  %v759_v33 = vpop.f32.mrb[8].mxu0 }
  0xe9   :  { %v6513_v34 = vmul.f32 0.5, %v759_v33  ;;  %v5697_v35 = vpop.f32.mrb[9].mxu0  ;;  %v2565_v36 = vsel %vm2543_vm2, %v6509_v30, -inf }
  0xea   :  { %v835_v37 = vpop.f32.mrb[8].mxu1 }
  0xeb   :  { %v6517_v38 = vmul.f32 0.5, %v835_v37  ;;  %v2568_v39 = vsel %vm2543_vm2, %v6513_v34, -inf  ;;  %v5702_v40 = vpop.f32.mrb[9].mxu1 }
  0xec   :  { %2566 = vmax.xlane.f32.xlu1 %v2565_v36  ;;  %2569 = vmax.xlane.f32.xlu0 %v2568_v39  ;;  %v911_v41 = vpop.f32.mrb[10].mxu0 }
  0xed   :  { %v6521_v42 = vmul.f32 0.5, %v911_v41  ;;  %v5707_v43 = vpop.f32.mrb[11].mxu0  ;;  %v2571_v44 = vsel %vm2543_vm2, %v6517_v38, -inf }
  0xee   :  { %v987_v45 = vpop.f32.mrb[10].mxu1 }
  0xef   :  { %v6525_v46 = vmul.f32 0.5, %v987_v45  ;;  %v2574_v47 = vsel %vm2543_vm2, %v6521_v42, -inf  ;;  %v5712_v48 = vpop.f32.mrb[11].mxu1 }
  0xf0   :  { %2572 = vmax.xlane.f32.xlu1 %v2571_v44  ;;  %2575 = vmax.xlane.f32.xlu0 %v2574_v47  ;;  %v1063_v49 = vpop.f32.mrb[12].mxu0 }
  0xf1   :  { %v6529_v50 = vmul.f32 0.5, %v1063_v49  ;;  %v5717_v51 = vpop.f32.mrb[13].mxu0  ;;  %v2577_v52 = vsel %vm2543_vm2, %v6525_v46, -inf }
  0xf2   :  { %v1139_v53 = vpop.f32.mrb[12].mxu1 }
  0xf3   :  { %v6533_v54 = vmul.f32 0.5, %v1139_v53  ;;  %v2580_v55 = vsel %vm2543_vm2, %v6529_v50, -inf  ;;  %v5722_v56 = vpop.f32.mrb[13].mxu1 }
  0xf4   :  { %2578 = vmax.xlane.f32.xlu1 %v2577_v52  ;;  %2581 = vmax.xlane.f32.xlu0 %v2580_v55  ;;  %v1215_v57 = vpop.f32.mrb[14].mxu0 }
  0xf5   :  { %v6537_v58 = vmul.f32 0.5, %v1215_v57  ;;  %v5727_v59 = vpop.f32.mrb[15].mxu0  ;;  %v2583_v60 = vsel %vm2543_vm2, %v6533_v54, -inf }
  0xf6   :  { %v1291_v61 = vpop.f32.mrb[14].mxu1 }
  0xf7   :  { %v6541_v62 = vmul.f32 0.5, %v1291_v61  ;;  %v2586_v63 = vsel %vm2543_vm2, %v6537_v58, -inf  ;;  %v5732_v1 = vpop.f32.mrb[15].mxu1 }
  0xf8   :  { %2584 = vmax.xlane.f32.xlu1 %v2583_v60  ;;  %2587 = vmax.xlane.f32.xlu0 %v2586_v63  ;;  %v1367_v2 = vpop.f32.mrb[16].mxu0 }
  0xf9   :  { %v6545_v4 = vmul.f32 0.5, %v1367_v2  ;;  %v5737_v5 = vpop.f32.mrb[17].mxu0  ;;  %v2589_v7 = vsel %vm2543_vm2, %v6541_v62, -inf }
  0xfa   :  { %v1443_v8 = vpop.f32.mrb[16].mxu1 }
  0xfb   :  { %v6549_v9 = vmul.f32 0.5, %v1443_v8  ;;  %v2592_v11 = vsel %vm2543_vm2, %v6545_v4, -inf  ;;  %v5742_v12 = vpop.f32.mrb[17].mxu1 }
  0xfc   :  { %2590 = vmax.xlane.f32.xlu1 %v2589_v7  ;;  %2593 = vmax.xlane.f32.xlu0 %v2592_v11  ;;  %v1519_v13 = vpop.f32.mrb[18].mxu0 }
  0xfd   :  { %v6553_v15 = vmul.f32 0.5, %v1519_v13  ;;  %v5747_v16 = vpop.f32.mrb[19].mxu0  ;;  %v2595_v17 = vsel %vm2543_vm2, %v6549_v9, -inf }
  0xfe   :  { %v1595_v19 = vpop.f32.mrb[18].mxu1 }
  0xff   :  { %v6557_v20 = vmul.f32 0.5, %v1595_v19  ;;  %v2598_v21 = vsel %vm2543_vm2, %v6553_v15, -inf  ;;  %v5752_v23 = vpop.f32.mrb[19].mxu1 }
 0x100   :  { %2596 = vmax.xlane.f32.xlu1 %v2595_v17  ;;  %2599 = vmax.xlane.f32.xlu0 %v2598_v21  ;;  %v1671_v24 = vpop.f32.mrb[20].mxu0 }
 0x101   :  { %v6561_v25 = vmul.f32 0.5, %v1671_v24  ;;  %v5757_v27 = vpop.f32.mrb[21].mxu0  ;;  %v2601_v28 = vsel %vm2543_vm2, %v6557_v20, -inf }
 0x102   :  { %v1747_v29 = vpop.f32.mrb[20].mxu1 }
 0x103   :  { %v6565_v31 = vmul.f32 0.5, %v1747_v29  ;;  %v2604_v32 = vsel %vm2543_vm2, %v6561_v25, -inf  ;;  %v5762_v33 = vpop.f32.mrb[21].mxu1 }
 0x104   :  { %2602 = vmax.xlane.f32.xlu1 %v2601_v28  ;;  %2605 = vmax.xlane.f32.xlu0 %v2604_v32  ;;  %v1823_v35 = vpop.f32.mrb[22].mxu0 }
 0x105   :  { %v6569_v36 = vmul.f32 0.5, %v1823_v35  ;;  %v5767_v37 = vpop.f32.mrb[23].mxu0  ;;  %v2607_v39 = vsel %vm2543_vm2, %v6565_v31, -inf }
 0x106   :  { %v1899_v40 = vpop.f32.mrb[22].mxu1 }
 0x107   :  { %v6573_v41 = vmul.f32 0.5, %v1899_v40  ;;  %v2610_v43 = vsel %vm2543_vm2, %v6569_v36, -inf  ;;  %v5772_v44 = vpop.f32.mrb[23].mxu1 }
 0x108   :  { %2608 = vmax.xlane.f32.xlu1 %v2607_v39  ;;  %2611 = vmax.xlane.f32.xlu0 %v2610_v43  ;;  %v1975_v45 = vpop.f32.mrb[24].mxu0 }
 0x109   :  { %v6577_v47 = vmul.f32 0.5, %v1975_v45  ;;  %v5777_v48 = vpop.f32.mrb[25].mxu0  ;;  %v2613_v49 = vsel %vm2543_vm2, %v6573_v41, -inf }
 0x10a   :  { %v2051_v51 = vpop.f32.mrb[24].mxu1 }
 0x10b   :  { %v6581_v52 = vmul.f32 0.5, %v2051_v51  ;;  %v2616_v53 = vsel %vm2543_vm2, %v6577_v47, -inf  ;;  %v5782_v55 = vpop.f32.mrb[25].mxu1 }
 0x10c   :  { %2614 = vmax.xlane.f32.xlu1 %v2613_v49  ;;  %2617 = vmax.xlane.f32.xlu0 %v2616_v53  ;;  %v2127_v56 = vpop.f32.mrb[26].mxu0 }
 0x10d   :  { %v6585_v57 = vmul.f32 0.5, %v2127_v56  ;;  %v5787_v59 = vpop.f32.mrb[27].mxu0  ;;  %v2619_v60 = vsel %vm2543_vm2, %v6581_v52, -inf }
 0x10e   :  { %v2203_v61 = vpop.f32.mrb[26].mxu1 }
 0x10f   :  { %v6589_v63 = vmul.f32 0.5, %v2203_v61  ;;  %v2622_v1 = vsel %vm2543_vm2, %v6585_v57, -inf  ;;  %v5792_v2 = vpop.f32.mrb[27].mxu1 }
 0x110   :  { %2620 = vmax.xlane.f32.xlu1 %v2619_v60  ;;  %2623 = vmax.xlane.f32.xlu0 %v2622_v1  ;;  %v2279_v5 = vpop.f32.mrb[28].mxu0 }
 0x111   :  { %v6593_v7 = vmul.f32 0.5, %v2279_v5  ;;  %v5797_v8 = vpop.f32.mrb[29].mxu0  ;;  %v2625_v11 = vsel %vm2543_vm2, %v6589_v63, -inf }
 0x112   :  { %v2355_v12 = vpop.f32.mrb[28].mxu1 }
 0x113   :  { %v6597_v13 = vmul.f32 0.5, %v2355_v12  ;;  %v2628_v16 = vsel %vm2543_vm2, %v6593_v7, -inf  ;;  %v5802_v17 = vpop.f32.mrb[29].mxu1 }
 0x114   :  { %2626 = vmax.xlane.f32.xlu1 %v2625_v11  ;;  %2629 = vmax.xlane.f32.xlu0 %v2628_v16  ;;  %v2431_v19 = vpop.f32.mrb[30].mxu0 }
 0x115   :  { %v6601_v21 = vmul.f32 0.5, %v2431_v19  ;;  %v2631_v23 = vsel %vm2543_vm2, %v6597_v13, -inf  ;;  %v5807_v24 = vpop.f32.mrb[31].mxu0 }
 0x116   :  { %v2507_v27 = vpop.f32.mrb[30].mxu1 }
 0x117   :  { %v6605_v28 = vmul.f32 0.5, %v2507_v27  ;;  %v2634_v29 = vsel %vm2543_vm2, %v6601_v21, -inf  ;;  %v5812_v32 = vpop.f32.mrb[31].mxu1 }
 0x118   :  { %2632 = vmax.xlane.f32.xlu1 %v2631_v23  ;;  %2635 = vmax.xlane.f32.xlu0 %v2634_v29 }
 0x119   :  { %v2637_v33 = vsel %vm2543_vm2, %v6605_v28, -inf }
 0x11c   :  { %2638 = vmax.xlane.f32.xlu1 %v2637_v33 }
 0x169   :  { %v2546_v35 = vpop.xlane.xlu0 %2545 }
 0x16a   :  { %v2640_v37 = vsub.f32 %v6483_v3, %v2546_v35 }
 0x16c   :  { %v2672_v39 = vmul.f32 1.442695, %v2640_v37 }
 0x16d   :  { %v2549_v40 = vpop.xlane.xlu0 %2548  ;;  %v2552_v43 = vpop.xlane.xlu1 %2551 }
 0x16e   :  { %5975 = vpow2.f32 %v2672_v39  ;;  %v2641_v44 = vsub.f32 %v6485_v6, %v2549_v40  ;;  %v2642_v45 = vsub.f32 %v6489_v10, %v2552_v43 }
 0x170   :  { %v2674_v48 = vmul.f32 1.442695, %v2641_v44  ;;  %v2676_v49 = vmul.f32 1.442695, %v2642_v45 }
 0x171   :  { %v2555_v51 = vpop.xlane.xlu1 %2554  ;;  %v2558_v53 = vpop.xlane.xlu0 %2557 }
 0x172   :  { %5977 = vpow2.f32 %v2674_v48  ;;  %v2643_v55 = vsub.f32 %v6493_v14, %v2555_v51  ;;  %v2644_v56 = vsub.f32 %v6497_v18, %v2558_v53 }
 0x173   :  { %5979 = vpow2.f32 %v2676_v49 }
 0x174   :  { %v2678_v59 = vmul.f32 1.442695, %v2643_v55  ;;  %v2680_v3 = vmul.f32 1.442695, %v2644_v56 }
 0x175   :  { %v2561_v60 = vpop.xlane.xlu1 %2560  ;;  %v2564_v61 = vpop.xlane.xlu0 %2563 }
 0x176   :  { %5981 = vpow2.f32 %v2678_v59  ;;  %v2645_v1 = vsub.f32 %v6501_v22, %v2561_v60  ;;  %v2646_v6 = vsub.f32 %v6505_v26, %v2564_v61 }
 0x177   :  { %5983 = vpow2.f32 %v2680_v3 }
 0x178   :  { %v6618_v10 = vpop.eup %5975  ;;  %v2682_v2 = vmul.f32 1.442695, %v2645_v1  ;;  %v2684_v5 = vmul.f32 1.442695, %v2646_v6 }
 0x179   :  { %v2567_v8 = vpop.xlane.xlu1 %2566  ;;  %v2570_v11 = vpop.xlane.xlu0 %2569  ;;  %v2736_v14 = vsel %vm2543_vm2, %v6618_v10, 0.0 }
 0x17a   :  { %5985 = vpow2.f32 %v2682_v2  ;;  %v2647_v18 = vsub.f32 %v6509_v30, %v2567_v8  ;;  %v2648_v12 = vsub.f32 %v6513_v34, %v2570_v11  ;;  %2737 = vadd.xlane.f32.xlu0 %v2736_v14 }
 0x17b   :  { %5987 = vpow2.f32 %v2684_v5 }
 0x17c   :  { %v6624_v22 = vpop.eup %5977  ;;  %v2686_v26 = vmul.f32 1.442695, %v2647_v18  ;;  %v2688_v16 = vmul.f32 1.442695, %v2648_v12 }
 0x17d   :  { %v6626_v17 = vpop.eup %5979  ;;  %v2573_v19 = vpop.xlane.xlu1 %2572  ;;  %v2739_v24 = vsel %vm2543_vm2, %v6624_v22, 0.0 }
 0x17e   :  { %v2576_v23 = vpop.xlane.xlu0 %2575  ;;  %5989 = vpow2.f32 %v2686_v26  ;;  %v2649_v27 = vsub.f32 %v6517_v38, %v2573_v19  ;;  %2740 = vadd.xlane.f32.xlu1 %v2739_v24  ;;  %v2742_v34 = vsel %vm2543_vm2, %v6626_v17, 0.0 }
 0x17f   :  { %v2650_v30 = vsub.f32 %v6521_v42, %v2576_v23  ;;  %5991 = vpow2.f32 %v2688_v16  ;;  %2743 = vadd.xlane.f32.xlu0 %v2742_v34 }
 0x180   :  { %v6634_v29 = vpop.eup %5981  ;;  %v2690_v32 = vmul.f32 1.442695, %v2649_v27 }
 0x181   :  { %v2692_v33 = vmul.f32 1.442695, %v2650_v30  ;;  %v6636_v35 = vpop.eup %5983  ;;  %v2579_v37 = vpop.xlane.xlu1 %2578  ;;  %v2745_v40 = vsel %vm2543_vm2, %v6634_v29, 0.0 }
 0x182   :  { %v2582_v39 = vpop.xlane.xlu0 %2581  ;;  %5993 = vpow2.f32 %v2690_v32  ;;  %v2651_v38 = vsub.f32 %v6525_v46, %v2579_v37  ;;  %2746 = vadd.xlane.f32.xlu1 %v2745_v40  ;;  %v2748_v43 = vsel %vm2543_vm2, %v6636_v35, 0.0 }
 0x183   :  { %v2652_v42 = vsub.f32 %v6529_v50, %v2582_v39  ;;  %5995 = vpow2.f32 %v2692_v33  ;;  %2749 = vadd.xlane.f32.xlu0 %v2748_v43 }
 0x184   :  { %v6644_v44 = vpop.eup %5985  ;;  %v2694_v45 = vmul.f32 1.442695, %v2651_v38 }
 0x185   :  { %v2696_v48 = vmul.f32 1.442695, %v2652_v42  ;;  %v6646_v49 = vpop.eup %5987  ;;  %v2585_v51 = vpop.xlane.xlu1 %2584  ;;  %v2751_v55 = vsel %vm2543_vm2, %v6644_v44, 0.0  ;;  %v2896_v42 = vld [vmem:[%s7183_s2] sm:$0xf] }
 0x186   :  { %v2588_v53 = vpop.xlane.xlu0 %2587  ;;  %5997 = vpow2.f32 %v2694_v45  ;;  %v2653_v46 = vsub.f32 %v6533_v54, %v2585_v51  ;;  %2752 = vadd.xlane.f32.xlu1 %v2751_v55  ;;  %v2754_v56 = vsel %vm2543_vm2, %v6646_v49, 0.0  ;;  %5814 = vmatpush3.msk.msra.mxu0 %vm2931_vm3, %v2896_v42 }
 0x187   :  { %v2654_v50 = vsub.f32 %v6537_v58, %v2588_v53  ;;  %5999 = vpow2.f32 %v2696_v48  ;;  %2755 = vadd.xlane.f32.xlu0 %v2754_v56  ;;  %5823 = vmatprep.subr.mxu0 %v6103_v0 }
 0x188   :  { %v6654_v59 = vpop.eup %5989  ;;  %v2698_v3 = vmul.f32 1.442695, %v2653_v46 }
 0x189   :  { %v2700_v60 = vmul.f32 1.442695, %v2654_v50  ;;  %v6656_v61 = vpop.eup %5991  ;;  %v2591_v1 = vpop.xlane.xlu1 %2590  ;;  %v2757_v2 = vsel %vm2543_vm2, %v6654_v59, 0.0 }
 0x18a   :  { %v2594_v6 = vpop.xlane.xlu0 %2593  ;;  %6001 = vpow2.f32 %v2698_v3  ;;  %v2655_v54 = vsub.f32 %v6541_v62, %v2591_v1  ;;  %2758 = vadd.xlane.f32.xlu1 %v2757_v2  ;;  %v2760_v5 = vsel %vm2543_vm2, %v6656_v61, 0.0 }
 0x18b   :  { %v2656_v58 = vsub.f32 %v6545_v4, %v2594_v6  ;;  %6003 = vpow2.f32 %v2700_v60  ;;  %2761 = vadd.xlane.f32.xlu0 %v2760_v5 }
 0x18c   :  { %v6664_v8 = vpop.eup %5993  ;;  %v2702_v11 = vmul.f32 1.442695, %v2655_v54 }
 0x18d   :  { %v2704_v14 = vmul.f32 1.442695, %v2656_v58  ;;  %v6666_v18 = vpop.eup %5995  ;;  %v2597_v12 = vpop.xlane.xlu1 %2596  ;;  %v2763_v16 = vsel %vm2543_vm2, %v6664_v8, 0.0 }
 0x18e   :  { %v2600_v26 = vpop.xlane.xlu0 %2599  ;;  %6005 = vpow2.f32 %v2702_v11  ;;  %v2657_v62 = vsub.f32 %v6549_v9, %v2597_v12  ;;  %2764 = vadd.xlane.f32.xlu1 %v2763_v16  ;;  %v2766_v19 = vsel %vm2543_vm2, %v6666_v18, 0.0 }
 0x18f   :  { %v2658_v4 = vsub.f32 %v6553_v15, %v2600_v26  ;;  %6007 = vpow2.f32 %v2704_v14  ;;  %2767 = vadd.xlane.f32.xlu0 %v2766_v19 }
 0x190   :  { %v6674_v23 = vpop.eup %5997  ;;  %v2706_v24 = vmul.f32 1.442695, %v2657_v62 }
 0x191   :  { %v2708_v27 = vmul.f32 1.442695, %v2658_v4  ;;  %v6676_v30 = vpop.eup %5999  ;;  %v2603_v34 = vpop.xlane.xlu1 %2602  ;;  %v2769_v33 = vsel %vm2543_vm2, %v6674_v23, 0.0 }
 0x192   :  { %v2606_v32 = vpop.xlane.xlu0 %2605  ;;  %6009 = vpow2.f32 %v2706_v24  ;;  %v2659_v9 = vsub.f32 %v6557_v20, %v2603_v34  ;;  %2770 = vadd.xlane.f32.xlu1 %v2769_v33  ;;  %v2772_v37 = vsel %vm2543_vm2, %v6676_v30, 0.0 }
 0x193   :  { %v2660_v15 = vsub.f32 %v6561_v25, %v2606_v32  ;;  %6011 = vpow2.f32 %v2708_v27  ;;  %2773 = vadd.xlane.f32.xlu0 %v2772_v37 }
 0x194   :  { %v6684_v39 = vpop.eup %6001  ;;  %v2710_v40 = vmul.f32 1.442695, %v2659_v9 }
 0x195   :  { %v2712_v38 = vmul.f32 1.442695, %v2660_v15  ;;  %v6689_v43 = vpop.eup %6003  ;;  %v2609_v45 = vpop.xlane.xlu1 %2608  ;;  %v2775_v25 = vsel %vm2543_vm2, %v6684_v39, 0.0 }
 0x196   :  { %v2612_v20 = vpop.xlane.xlu0 %2611  ;;  %6013 = vpow2.f32 %v2710_v40  ;;  %v2661_v48 = vsub.f32 %v6565_v31, %v2609_v45  ;;  %2776 = vadd.xlane.f32.xlu1 %v2775_v25  ;;  %v2778_v53 = vsel %vm2543_vm2, %v6689_v43, 0.0  ;;  %v2897_v31 = vld [vmem:[%s7183_s2 + $0x4] sm:$0xf] }
 0x197   :  { %v2662_v51 = vsub.f32 %v6569_v36, %v2612_v20  ;;  %6015 = vpow2.f32 %v2712_v38  ;;  %2779 = vadd.xlane.f32.xlu0 %v2778_v53  ;;  %5819 = vmatpush3.msk.msra.mxu1 %vm2931_vm3, %v2897_v31 }
 0x198   :  { %v6699_v55 = vpop.eup %6005  ;;  %v2714_v46 = vmul.f32 1.442695, %v2661_v48  ;;  %5828 = vmatprep.subr.mxu1 %v6103_v0 }
 0x199   :  { %v2716_v50 = vmul.f32 1.442695, %v2662_v51  ;;  %v6704_v56 = vpop.eup %6007  ;;  %v2615_v36 = vpop.xlane.xlu1 %2614  ;;  %v2781_v60 = vsel %vm2543_vm2, %v6699_v55, 0.0 }
 0x19a   :  { %v2618_v3 = vpop.xlane.xlu0 %2617  ;;  %6017 = vpow2.f32 %v2714_v46  ;;  %v2663_v1 = vsub.f32 %v6573_v41, %v2615_v36  ;;  %2782 = vadd.xlane.f32.xlu1 %v2781_v60  ;;  %v2784_v2 = vsel %vm2543_vm2, %v6704_v56, 0.0 }
 0x19b   :  { %v2664_v6 = vsub.f32 %v6577_v47, %v2618_v3  ;;  %6019 = vpow2.f32 %v2716_v50  ;;  %2785 = vadd.xlane.f32.xlu0 %v2784_v2 }
 0x19c   :  { %v6714_v54 = vpop.eup %6009  ;;  %v2718_v58 = vmul.f32 1.442695, %v2663_v1 }
 0x19d   :  { %v2720_v5 = vmul.f32 1.442695, %v2664_v6  ;;  %v6716_v11 = vpop.eup %6011  ;;  %v2621_v14 = vpop.xlane.xlu1 %2620  ;;  %v2787_v41 = vsel %vm2543_vm2, %v6714_v54, 0.0 }
 0x19e   :  { %v2624_v12 = vpop.xlane.xlu0 %2623  ;;  %6021 = vpow2.f32 %v2718_v58  ;;  %v2665_v47 = vsub.f32 %v6581_v52, %v2621_v14  ;;  %2788 = vadd.xlane.f32.xlu1 %v2787_v41  ;;  %v2790_v16 = vsel %vm2543_vm2, %v6716_v11, 0.0 }
 0x19f   :  { %v2666_v26 = vsub.f32 %v6585_v57, %v2624_v12  ;;  %6023 = vpow2.f32 %v2720_v5  ;;  %2791 = vadd.xlane.f32.xlu0 %v2790_v16 }
 0x1a0   :  { %v6724_v62 = vpop.eup %6013  ;;  %v2722_v4 = vmul.f32 1.442695, %v2665_v47 }
 0x1a1   :  { %v2724_v19 = vmul.f32 1.442695, %v2666_v26  ;;  %v6726_v24 = vpop.eup %6015  ;;  %v2627_v27 = vpop.xlane.xlu1 %2626  ;;  %v2793_v32 = vsel %vm2543_vm2, %v6724_v62, 0.0 }
 0x1a2   :  { %v2630_v34 = vpop.xlane.xlu0 %2629  ;;  %6025 = vpow2.f32 %v2722_v4  ;;  %v2667_v52 = vsub.f32 %v6589_v63, %v2627_v27  ;;  %2794 = vadd.xlane.f32.xlu1 %v2793_v32  ;;  %v2796_v33 = vsel %vm2543_vm2, %v6726_v24, 0.0 }
 0x1a3   :  { %v2668_v57 = vsub.f32 %v6593_v7, %v2630_v34  ;;  %6027 = vpow2.f32 %v2724_v19  ;;  %2797 = vadd.xlane.f32.xlu0 %v2796_v33  ;;  %v2898_v33 = vld [vmem:[%s7183_s2 + $0x8] sm:$0xf] }
 0x1a4   :  { %v6734_v9 = vpop.eup %6017  ;;  %v2726_v15 = vmul.f32 1.442695, %v2667_v52 }
 0x1a5   :  { %v2728_v37 = vmul.f32 1.442695, %v2668_v57  ;;  %v6736_v40 = vpop.eup %6019  ;;  %v2633_v38 = vpop.xlane.xlu1 %2632  ;;  %v2799_v45 = vsel %vm2543_vm2, %v6734_v9, 0.0 }
 0x1a6   :  { %v2636_v42 = vpop.xlane.xlu0 %2635  ;;  %6029 = vpow2.f32 %v2726_v15  ;;  %v2669_v63 = vsub.f32 %v6597_v13, %v2633_v38  ;;  %2800 = vadd.xlane.f32.xlu1 %v2799_v45  ;;  %v2802_v20 = vsel %vm2543_vm2, %v6736_v40, 0.0  ;;  %v2899_v45 = vld [vmem:[%s7183_s2 + $0xc] sm:$0xf] }
 0x1a7   :  { %v2670_v7 = vsub.f32 %v6601_v21, %v2636_v42  ;;  %6031 = vpow2.f32 %v2728_v37  ;;  %2803 = vadd.xlane.f32.xlu0 %v2802_v20  ;;  %v2900_v20 = vld [vmem:[%s7183_s2 + $0x10] sm:$0xf] }
 0x1a8   :  { %v6744_v25 = vpop.eup %6021  ;;  %v2730_v48 = vmul.f32 1.442695, %v2669_v63 }
 0x1a9   :  { %v2732_v51 = vmul.f32 1.442695, %v2670_v7  ;;  %v6746_v53 = vpop.eup %6023  ;;  %v2639_v46 = vpop.xlane.xlu1 %2638  ;;  %v2805_v50 = vsel %vm2543_vm2, %v6744_v25, 0.0 }
 0x1aa   :  { %6033 = vpow2.f32 %v2730_v48  ;;  %v2671_v13 = vsub.f32 %v6605_v28, %v2639_v46  ;;  %2806 = vadd.xlane.f32.xlu1 %v2805_v50  ;;  %v2808_v21 = vsel %vm2543_vm2, %v6746_v53, 0.0 }
 0x1ab   :  { %6035 = vpow2.f32 %v2732_v51  ;;  %2809 = vadd.xlane.f32.xlu0 %v2808_v21 }
 0x1ac   :  { %v6753_v31 = vpop.eup %6025  ;;  %v2734_v36 = vmul.f32 1.442695, %v2671_v13 }
 0x1ad   :  { %v6755_v3 = vpop.eup %6027  ;;  %v2811_v60 = vsel %vm2543_vm2, %v6753_v31, 0.0 }
 0x1ae   :  { %6037 = vpow2.f32 %v2734_v36  ;;  %2812 = vadd.xlane.f32.xlu1 %v2811_v60  ;;  %v2814_v1 = vsel %vm2543_vm2, %v6755_v3, 0.0 }
 0x1af   :  { %2815 = vadd.xlane.f32.xlu0 %v2814_v1  ;;  %v2903_v1 = vld [vmem:[%s7183_s2 + $0x1c] sm:$0xf] }
 0x1b0   :  { %v6761_v28 = vpop.eup %6029 }
 0x1b1   :  { %v6763_v6 = vpop.eup %6031  ;;  %v2817_v2 = vsel %vm2543_vm2, %v6761_v28, 0.0 }
 0x1b2   :  { %2818 = vadd.xlane.f32.xlu1 %v2817_v2  ;;  %v2820_v58 = vsel %vm2543_vm2, %v6763_v6, 0.0 }
 0x1b3   :  { %2821 = vadd.xlane.f32.xlu0 %v2820_v58 }
 0x1b4   :  { %v6769_v5 = vpop.eup %6033 }
 0x1b5   :  { %v6771_v14 = vpop.eup %6035  ;;  %v2823_v12 = vsel %vm2543_vm2, %v6769_v5, 0.0 }
 0x1b6   :  { %2824 = vadd.xlane.f32.xlu1 %v2823_v12  ;;  %v2826_v41 = vsel %vm2543_vm2, %v6771_v14, 0.0 }
 0x1b7   :  { %2827 = vadd.xlane.f32.xlu0 %v2826_v41 }
 0x1b8   :  { %v6777_v47 = vpop.eup %6037 }
 0x1b9   :  { %v2829_v26 = vsel %vm2543_vm2, %v6777_v47, 0.0 }
 0x1ba   :  { %2830 = vadd.xlane.f32.xlu1 %v2829_v26 }
 0x207   :  { %v2738_v16 = vpop.xlane.xlu0 %2737 }
 0x208   :  { %6039 = vrcp.f32 %v2738_v16  ;;  %v2905_v16 = vld [vmem:[%s7183_s2 + $0x24] sm:$0xf] }
 0x20b   :  { %v2741_v4 = vpop.xlane.xlu1 %2740 }
 0x20c   :  { %6041 = vrcp.f32 %v2741_v4  ;;  %v2744_v19 = vpop.xlane.xlu0 %2743 }
 0x20d   :  { %6043 = vrcp.f32 %v2744_v19 }
 0x20f   :  { %v2747_v27 = vpop.xlane.xlu1 %2746 }
 0x210   :  { %6045 = vrcp.f32 %v2747_v27  ;;  %v2750_v34 = vpop.xlane.xlu0 %2749 }
 0x211   :  { %6047 = vrcp.f32 %v2750_v34 }
 0x212   :  { %v6040_v32 = vpop.eup %6039 }
 0x213   :  { %v2864_v52 = vmul.f32 %v6040_v32, %v6618_v10  ;;  %v2753_v57 = vpop.xlane.xlu1 %2752 }
 0x214   :  { %6049 = vrcp.f32 %v2753_v57  ;;  %v2756_v15 = vpop.xlane.xlu0 %2755 }
 0x215   :  { %6051 = vrcp.f32 %v2756_v15  ;;  %5816 = vmatmul.mubr.msk.f32.vlgmr.msra.gmra.mrb[32].mxu0 %vm78_vm0, %v2864_v52  ;;  %v2907_v52 = vld [vmem:[%s7183_s2 + $0x2c] sm:$0xf] }
 0x216   :  { %v6042_v37 = vpop.eup %6041  ;;  %5824 = vmatpush3.msk.msra.mxu0 %vm2931_vm3, %v2898_v33  ;;  %5825 = vmatprep.mubr.msk.f32.mxu0 %vm6104_vm1, %v6103_v0 }
 0x217   :  { %v6044_v38 = vpop.eup %6043  ;;  %v2865_v42 = vmul.f32 %v6042_v37, %v6624_v22  ;;  %v2759_v10 = vpop.xlane.xlu1 %2758  ;;  %5833 = vmatprep.subr.mxu0 %v6103_v0 }
 0x218   :  { %v2866_v63 = vmul.f32 %v6044_v38, %v6626_v17  ;;  %6053 = vrcp.f32 %v2759_v10  ;;  %v2762_v7 = vpop.xlane.xlu0 %2761  ;;  %v2901_v17 = vld [vmem:[%s7183_s2 + $0x14] sm:$0xf] }
 0x219   :  { %6055 = vrcp.f32 %v2762_v7  ;;  %5821 = vmatmul.mubr.msk.f32.vlgmr.msra.gmra.mrb[32].mxu1 %vm78_vm0, %v2865_v42  ;;  %v2909_v42 = vld [vmem:[%s7183_s2 + $0x34] sm:$0xf] }
 0x21a   :  { %v6046_v48 = vpop.eup %6045  ;;  %5826 = vmatmul.mubr.msk.f32.vlgmr.msra.gmra.mrb[34].mxu0 %vm78_vm0, %v2866_v63  ;;  %5829 = vmatpush3.msk.msra.mxu1 %vm2931_vm3, %v2899_v45 }
 0x21b   :  { %v6048_v22 = vpop.eup %6047  ;;  %v2867_v51 = vmul.f32 %v6046_v48, %v6634_v29  ;;  %v2765_v46 = vpop.xlane.xlu1 %2764  ;;  %5830 = vmatprep.mubr.msk.f32.mxu1 %vm6104_vm1, %v6103_v0  ;;  %5834 = vmatpush3.msk.msra.mxu0 %vm2931_vm3, %v2900_v20  ;;  %v2902_v29 = vld [vmem:[%s7183_s2 + $0x18] sm:$0xf]  ;;  %v2911_v48 = vld [vmem:[%s7183_s2 + $0x3c] sm:$0xf] }
 0x21c   :  { %v2868_v50 = vmul.f32 %v6048_v22, %v6636_v35  ;;  %6057 = vrcp.f32 %v2765_v46  ;;  %v2768_v13 = vpop.xlane.xlu0 %2767  ;;  %5835 = vmatprep.mubr.msk.f32.mxu0 %vm6104_vm1, %v6103_v0  ;;  %5838 = vmatprep.subr.mxu1 %v6103_v0 }
 0x21d   :  { %6059 = vrcp.f32 %v2768_v13  ;;  %5831 = vmatmul.mubr.msk.f32.vlgmr.msra.gmra.mrb[34].mxu1 %vm78_vm0, %v2867_v51  ;;  %5843 = vmatprep.subr.mxu0 %v6103_v0  ;;  %v2913_v13 = vld [vmem:[%s7183_s2 + $0x44] sm:$0xf] }
 0x21e   :  { %v6050_v21 = vpop.eup %6049  ;;  %5836 = vmatmul.mubr.msk.f32.vlgmr.msra.gmra.mrb[36].mxu0 %vm78_vm0, %v2868_v50  ;;  %5839 = vmatpush3.msk.msra.mxu1 %vm2931_vm3, %v2901_v17 }
 0x21f   :  { %v6052_v35 = vpop.eup %6051  ;;  %v2869_v36 = vmul.f32 %v6050_v21, %v6644_v44  ;;  %v2771_v60 = vpop.xlane.xlu1 %2770  ;;  %5840 = vmatprep.mubr.msk.f32.mxu1 %vm6104_vm1, %v6103_v0  ;;  %5844 = vmatpush3.msk.msra.mxu0 %vm2931_vm3, %v2902_v29  ;;  %v2904_v44 = vld [vmem:[%s7183_s2 + $0x20] sm:$0xf] }
 0x220   :  { %v2870_v2 = vmul.f32 %v6052_v35, %v6646_v49  ;;  %6061 = vrcp.f32 %v2771_v60  ;;  %v2774_v58 = vpop.xlane.xlu0 %2773  ;;  %5845 = vmatprep.mubr.msk.f32.mxu0 %vm6104_vm1, %v6103_v0  ;;  %5848 = vmatprep.subr.mxu1 %v6103_v0 }
 0x221   :  { %6063 = vrcp.f32 %v2774_v58  ;;  %5841 = vmatmul.mubr.msk.f32.vlgmr.msra.gmra.mrb[36].mxu1 %vm78_vm0, %v2869_v36  ;;  %5853 = vmatprep.subr.mxu0 %v6103_v0 }
 0x222   :  { %v6054_v12 = vpop.eup %6053  ;;  %5846 = vmatmul.mubr.msk.f32.vlgmr.msra.gmra.mrb[38].mxu0 %vm78_vm0, %v2870_v2  ;;  %5849 = vmatpush3.msk.msra.mxu1 %vm2931_vm3, %v2903_v1  ;;  %v2915_v1 = vld [vmem:[%s7183_s2 + $0x4c] sm:$0xf] }
 0x223   :  { %v6056_v49 = vpop.eup %6055  ;;  %v2871_v41 = vmul.f32 %v6054_v12, %v6654_v59  ;;  %v2777_v26 = vpop.xlane.xlu1 %2776  ;;  %5850 = vmatprep.mubr.msk.f32.mxu1 %vm6104_vm1, %v6103_v0  ;;  %5854 = vmatpush3.msk.msra.mxu0 %vm2931_vm3, %v2904_v44  ;;  %v2906_v59 = vld [vmem:[%s7183_s2 + $0x28] sm:$0xf] }
 0x224   :  { %v2872_v4 = vmul.f32 %v6056_v49, %v6656_v61  ;;  %6065 = vrcp.f32 %v2777_v26  ;;  %v2780_v19 = vpop.xlane.xlu0 %2779  ;;  %5855 = vmatprep.mubr.msk.f32.mxu0 %vm6104_vm1, %v6103_v0  ;;  %5858 = vmatprep.subr.mxu1 %v6103_v0 }
 0x225   :  { %6067 = vrcp.f32 %v2780_v19  ;;  %5851 = vmatmul.mubr.msk.f32.vlgmr.msra.gmra.mrb[38].mxu1 %vm78_vm0, %v2871_v41  ;;  %5863 = vmatprep.subr.mxu0 %v6103_v0  ;;  %v2917_v41 = vld [vmem:[%s7183_s2 + $0x54] sm:$0xf] }
 0x226   :  { %v6058_v27 = vpop.eup %6057  ;;  %5856 = vmatmul.mubr.msk.f32.vlgmr.msra.gmra.mrb[40].mxu0 %vm78_vm0, %v2872_v4  ;;  %5859 = vmatpush3.msk.msra.mxu1 %vm2931_vm3, %v2905_v16 }
 0x227   :  { %v6060_v61 = vpop.eup %6059  ;;  %v2873_v34 = vmul.f32 %v6058_v27, %v6664_v8  ;;  %v2783_v32 = vpop.xlane.xlu1 %2782  ;;  %5860 = vmatprep.mubr.msk.f32.mxu1 %vm6104_vm1, %v6103_v0  ;;  %5864 = vmatpush3.msk.msra.mxu0 %vm2931_vm3, %v2906_v59  ;;  %v2908_v8 = vld [vmem:[%s7183_s2 + $0x30] sm:$0xf]  ;;  %v2919_v27 = vld [vmem:[%s7183_s2 + $0x5c] sm:$0xf] }
 0x228   :  { %v2874_v57 = vmul.f32 %v6060_v61, %v6666_v18  ;;  %6069 = vrcp.f32 %v2783_v32  ;;  %v2786_v33 = vpop.xlane.xlu0 %2785  ;;  %5865 = vmatprep.mubr.msk.f32.mxu0 %vm6104_vm1, %v6103_v0  ;;  %5868 = vmatprep.subr.mxu1 %v6103_v0 }
 0x229   :  { %6071 = vrcp.f32 %v2786_v33  ;;  %5861 = vmatmul.mubr.msk.f32.vlgmr.msra.gmra.mrb[40].mxu1 %vm78_vm0, %v2873_v34  ;;  %5873 = vmatprep.subr.mxu0 %v6103_v0  ;;  %v2921_v33 = vld [vmem:[%s7183_s2 + $0x64] sm:$0xf] }
 0x22a   :  { %v6062_v15 = vpop.eup %6061  ;;  %5866 = vmatmul.mubr.msk.f32.vlgmr.msra.gmra.mrb[42].mxu0 %vm78_vm0, %v2874_v57  ;;  %5869 = vmatpush3.msk.msra.mxu1 %vm2931_vm3, %v2907_v52 }
 0x22b   :  { %v6064_v18 = vpop.eup %6063  ;;  %v2875_v37 = vmul.f32 %v6062_v15, %v6674_v23  ;;  %v2789_v38 = vpop.xlane.xlu1 %2788  ;;  %5870 = vmatprep.mubr.msk.f32.mxu1 %vm6104_vm1, %v6103_v0  ;;  %5874 = vmatpush3.msk.msra.mxu0 %vm2931_vm3, %v2908_v8  ;;  %v2910_v23 = vld [vmem:[%s7183_s2 + $0x38] sm:$0xf] }
 0x22c   :  { %v2876_v10 = vmul.f32 %v6064_v18, %v6676_v30  ;;  %6073 = vrcp.f32 %v2789_v38  ;;  %v2792_v45 = vpop.xlane.xlu0 %2791  ;;  %5875 = vmatprep.mubr.msk.f32.mxu0 %vm6104_vm1, %v6103_v0  ;;  %5878 = vmatprep.subr.mxu1 %v6103_v0 }
 0x22d   :  { %6075 = vrcp.f32 %v2792_v45  ;;  %5871 = vmatmul.mubr.msk.f32.vlgmr.msra.gmra.mrb[42].mxu1 %vm78_vm0, %v2875_v37  ;;  %5883 = vmatprep.subr.mxu0 %v6103_v0 }
 0x22e   :  { %v6066_v63 = vpop.eup %6065  ;;  %5876 = vmatmul.mubr.msk.f32.vlgmr.msra.gmra.mrb[44].mxu0 %vm78_vm0, %v2876_v10  ;;  %5879 = vmatpush3.msk.msra.mxu1 %vm2931_vm3, %v2909_v42  ;;  %v2923_v42 = vld [vmem:[%s7183_s2 + $0x6c] sm:$0xf] }
 0x22f   :  { %v6068_v30 = vpop.eup %6067  ;;  %v2877_v7 = vmul.f32 %v6066_v63, %v6684_v39  ;;  %v2795_v20 = vpop.xlane.xlu1 %2794  ;;  %5880 = vmatprep.mubr.msk.f32.mxu1 %vm6104_vm1, %v6103_v0  ;;  %5884 = vmatpush3.msk.msra.mxu0 %vm2931_vm3, %v2910_v23  ;;  %v2912_v39 = vld [vmem:[%s7183_s2 + $0x40] sm:$0xf]  ;;  %v2925_v63 = vld [vmem:[%s7183_s2 + $0x74] sm:$0xf] }
 0x230   :  { %v2878_v22 = vmul.f32 %v6068_v30, %v6689_v43  ;;  %6077 = vrcp.f32 %v2795_v20  ;;  %v2798_v51 = vpop.xlane.xlu0 %2797  ;;  %5885 = vmatprep.mubr.msk.f32.mxu0 %vm6104_vm1, %v6103_v0  ;;  %5888 = vmatprep.subr.mxu1 %v6103_v0 }
 0x231   :  { %6079 = vrcp.f32 %v2798_v51  ;;  %5881 = vmatmul.mubr.msk.f32.vlgmr.msra.gmra.mrb[44].mxu1 %vm78_vm0, %v2877_v7  ;;  %5893 = vmatprep.subr.mxu0 %v6103_v0 }
 0x232   :  { %v6070_v46 = vpop.eup %6069  ;;  %5886 = vmatmul.mubr.msk.f32.vlgmr.msra.gmra.mrb[46].mxu0 %vm78_vm0, %v2878_v22  ;;  %5889 = vmatpush3.msk.msra.mxu1 %vm2931_vm3, %v2911_v48  ;;  %v2927_v48 = vld [vmem:[%s7183_s2 + $0x7c] sm:$0xf] }
 0x233   :  { %v6072_v43 = vpop.eup %6071  ;;  %v2879_v17 = vmul.f32 %v6070_v46, %v6699_v55  ;;  %v2801_v50 = vpop.xlane.xlu1 %2800  ;;  %5890 = vmatprep.mubr.msk.f32.mxu1 %vm6104_vm1, %v6103_v0  ;;  %5894 = vmatpush3.msk.msra.mxu0 %vm2931_vm3, %v2912_v39  ;;  %v2914_v55 = vld [vmem:[%s7183_s2 + $0x48] sm:$0xf] }
 0x234   :  { %v2880_v29 = vmul.f32 %v6072_v43, %v6704_v56  ;;  %6081 = vrcp.f32 %v2801_v50  ;;  %v2804_v21 = vpop.xlane.xlu0 %2803  ;;  %5895 = vmatprep.mubr.msk.f32.mxu0 %vm6104_vm1, %v6103_v0  ;;  %5898 = vmatprep.subr.mxu1 %v6103_v0 }
 0x235   :  { %6083 = vrcp.f32 %v2804_v21  ;;  %5891 = vmatmul.mubr.msk.f32.vlgmr.msra.gmra.mrb[46].mxu1 %vm78_vm0, %v2879_v17  ;;  %5903 = vmatprep.subr.mxu0 %v6103_v0 }
 0x236   :  { %v6074_v35 = vpop.eup %6073  ;;  %5896 = vmatmul.mubr.msk.f32.vlgmr.msra.gmra.mrb[48].mxu0 %vm78_vm0, %v2880_v29  ;;  %5899 = vmatpush3.msk.msra.mxu1 %vm2931_vm3, %v2913_v13 }
 0x237   :  { %v6076_v56 = vpop.eup %6075  ;;  %v2881_v36 = vmul.f32 %v6074_v35, %v6714_v54  ;;  %v2807_v60 = vpop.xlane.xlu1 %2806  ;;  %5900 = vmatprep.mubr.msk.f32.mxu1 %vm6104_vm1, %v6103_v0  ;;  %5904 = vmatpush3.msk.msra.mxu0 %vm2931_vm3, %v2914_v55  ;;  %v2916_v54 = vld [vmem:[%s7183_s2 + $0x50] sm:$0xf] }
 0x238   :  { %v2882_v2 = vmul.f32 %v6076_v56, %v6716_v11  ;;  %6085 = vrcp.f32 %v2807_v60  ;;  %v2810_v58 = vpop.xlane.xlu0 %2809  ;;  %5905 = vmatprep.mubr.msk.f32.mxu0 %vm6104_vm1, %v6103_v0  ;;  %5908 = vmatprep.subr.mxu1 %v6103_v0 }
 0x239   :  { %6087 = vrcp.f32 %v2810_v58  ;;  %5901 = vmatmul.mubr.msk.f32.vlgmr.msra.gmra.mrb[48].mxu1 %vm78_vm0, %v2881_v36  ;;  %5913 = vmatprep.subr.mxu0 %v6103_v0 }
 0x23a   :  { %v6078_v44 = vpop.eup %6077  ;;  %5906 = vmatmul.mubr.msk.f32.vlgmr.msra.gmra.mrb[50].mxu0 %vm78_vm0, %v2882_v2  ;;  %5909 = vmatpush3.msk.msra.mxu1 %vm2931_vm3, %v2915_v1 }
 0x23b   :  { %v6080_v11 = vpop.eup %6079  ;;  %v2883_v12 = vmul.f32 %v6078_v44, %v6724_v62  ;;  %v2813_v49 = vpop.xlane.xlu1 %2812  ;;  %5910 = vmatprep.mubr.msk.f32.mxu1 %vm6104_vm1, %v6103_v0  ;;  %5914 = vmatpush3.msk.msra.mxu0 %vm2931_vm3, %v2916_v54  ;;  %v2918_v62 = vld [vmem:[%s7183_s2 + $0x58] sm:$0xf] }
 0x23c   :  { %v2884_v26 = vmul.f32 %v6080_v11, %v6726_v24  ;;  %6089 = vrcp.f32 %v2813_v49  ;;  %v2816_v16 = vpop.xlane.xlu0 %2815  ;;  %5915 = vmatprep.mubr.msk.f32.mxu0 %vm6104_vm1, %v6103_v0  ;;  %5918 = vmatprep.subr.mxu1 %v6103_v0 }
 0x23d   :  { %6091 = vrcp.f32 %v2816_v16  ;;  %5911 = vmatmul.mubr.msk.f32.vlgmr.msra.gmra.mrb[50].mxu1 %vm78_vm0, %v2883_v12  ;;  %5923 = vmatprep.subr.mxu0 %v6103_v0 }
 0x23e   :  { %v6082_v4 = vpop.eup %6081  ;;  %5916 = vmatmul.mubr.msk.f32.vlgmr.msra.gmra.mrb[52].mxu0 %vm78_vm0, %v2884_v26  ;;  %5919 = vmatpush3.msk.msra.mxu1 %vm2931_vm3, %v2917_v41 }
 0x23f   :  { %v6084_v24 = vpop.eup %6083  ;;  %v2885_v19 = vmul.f32 %v6082_v4, %v6734_v9  ;;  %v2819_v59 = vpop.xlane.xlu1 %2818  ;;  %5920 = vmatprep.mubr.msk.f32.mxu1 %vm6104_vm1, %v6103_v0  ;;  %5924 = vmatpush3.msk.msra.mxu0 %vm2931_vm3, %v2918_v62  ;;  %v2920_v9 = vld [vmem:[%s7183_s2 + $0x60] sm:$0xf] }
 0x240   :  { %v2886_v61 = vmul.f32 %v6084_v24, %v6736_v40  ;;  %6093 = vrcp.f32 %v2819_v59  ;;  %v2822_v34 = vpop.xlane.xlu0 %2821  ;;  %5925 = vmatprep.mubr.msk.f32.mxu0 %vm6104_vm1, %v6103_v0  ;;  %5928 = vmatprep.subr.mxu1 %v6103_v0 }
 0x241   :  { %6095 = vrcp.f32 %v2822_v34  ;;  %5921 = vmatmul.mubr.msk.f32.vlgmr.msra.gmra.mrb[52].mxu1 %vm78_vm0, %v2885_v19  ;;  %5933 = vmatprep.subr.mxu0 %v6103_v0 }
 0x242   :  { %v6086_v32 = vpop.eup %6085  ;;  %5926 = vmatmul.mubr.msk.f32.vlgmr.msra.gmra.mrb[54].mxu0 %vm78_vm0, %v2886_v61  ;;  %5929 = vmatpush3.msk.msra.mxu1 %vm2931_vm3, %v2919_v27 }
 0x243   :  { %v6088_v40 = vpop.eup %6087  ;;  %v2887_v52 = vmul.f32 %v6086_v32, %v6744_v25  ;;  %v2825_v57 = vpop.xlane.xlu1 %2824  ;;  %5930 = vmatprep.mubr.msk.f32.mxu1 %vm6104_vm1, %v6103_v0  ;;  %5934 = vmatpush3.msk.msra.mxu0 %vm2931_vm3, %v2920_v9  ;;  %v2922_v25 = vld [vmem:[%s7183_s2 + $0x68] sm:$0xf] }
 0x244   :  { %v2888_v8 = vmul.f32 %v6088_v40, %v6746_v53  ;;  %6097 = vrcp.f32 %v2825_v57  ;;  %v2828_v15 = vpop.xlane.xlu0 %2827  ;;  %5935 = vmatprep.mubr.msk.f32.mxu0 %vm6104_vm1, %v6103_v0  ;;  %5938 = vmatprep.subr.mxu1 %v6103_v0 }
 0x245   :  { %6099 = vrcp.f32 %v2828_v15  ;;  %5931 = vmatmul.mubr.msk.f32.vlgmr.msra.gmra.mrb[54].mxu1 %vm78_vm0, %v2887_v52  ;;  %5943 = vmatprep.subr.mxu0 %v6103_v0 }
 0x246   :  { %v6090_v18 = vpop.eup %6089  ;;  %5936 = vmatmul.mubr.msk.f32.vlgmr.msra.gmra.mrb[56].mxu0 %vm78_vm0, %v2888_v8  ;;  %5939 = vmatpush3.msk.msra.mxu1 %vm2931_vm3, %v2921_v33 }
 0x247   :  { %v6092_v53 = vpop.eup %6091  ;;  %v2889_v37 = vmul.f32 %v6090_v18, %v6753_v31  ;;  %v2831_v38 = vpop.xlane.xlu1 %2830  ;;  %5940 = vmatprep.mubr.msk.f32.mxu1 %vm6104_vm1, %v6103_v0  ;;  %5944 = vmatpush3.msk.msra.mxu0 %vm2931_vm3, %v2922_v25  ;;  %v2924_v31 = vld [vmem:[%s7183_s2 + $0x70] sm:$0xf] }
 0x248   :  { %v2890_v10 = vmul.f32 %v6092_v53, %v6755_v3  ;;  %6101 = vrcp.f32 %v2831_v38  ;;  %5945 = vmatprep.mubr.msk.f32.mxu0 %vm6104_vm1, %v6103_v0  ;;  %5948 = vmatprep.subr.mxu1 %v6103_v0 }
 0x249   :  { %5941 = vmatmul.mubr.msk.f32.vlgmr.msra.gmra.mrb[56].mxu1 %vm78_vm0, %v2889_v37  ;;  %5953 = vmatprep.subr.mxu0 %v6103_v0 }
 0x24a   :  { %v6094_v45 = vpop.eup %6093  ;;  %5946 = vmatmul.mubr.msk.f32.vlgmr.msra.gmra.mrb[58].mxu0 %vm78_vm0, %v2890_v10  ;;  %5949 = vmatpush3.msk.msra.mxu1 %vm2931_vm3, %v2923_v42 }
 0x24b   :  { %v6096_v3 = vpop.eup %6095  ;;  %v2891_v23 = vmul.f32 %v6094_v45, %v6761_v28  ;;  %5950 = vmatprep.mubr.msk.f32.mxu1 %vm6104_vm1, %v6103_v0  ;;  %5954 = vmatpush3.msk.msra.mxu0 %vm2931_vm3, %v2924_v31  ;;  %v2926_v28 = vld [vmem:[%s7183_s2 + $0x78] sm:$0xf] }
 0x24c   :  { %v2892_v30 = vmul.f32 %v6096_v3, %v6763_v6  ;;  %5955 = vmatprep.mubr.msk.f32.mxu0 %vm6104_vm1, %v6103_v0  ;;  %5958 = vmatprep.subr.mxu1 %v6103_v0 }
 0x24d   :  { %5951 = vmatmul.mubr.msk.f32.vlgmr.msra.gmra.mrb[58].mxu1 %vm78_vm0, %v2891_v23  ;;  %5963 = vmatprep.subr.mxu0 %v6103_v0 }
 0x24e   :  { %v6098_v7 = vpop.eup %6097  ;;  %5956 = vmatmul.mubr.msk.f32.vlgmr.msra.gmra.mrb[60].mxu0 %vm78_vm0, %v2892_v30  ;;  %5959 = vmatpush3.msk.msra.mxu1 %vm2931_vm3, %v2925_v63 }
 0x24f   :  { %v6100_v20 = vpop.eup %6099  ;;  %v2893_v6 = vmul.f32 %v6098_v7, %v6769_v5  ;;  %5960 = vmatprep.mubr.msk.f32.mxu1 %vm6104_vm1, %v6103_v0  ;;  %5964 = vmatpush3.msk.msra.mxu0 %vm2931_vm3, %v2926_v28 }
 0x250   :  { %v2894_v22 = vmul.f32 %v6100_v20, %v6771_v14  ;;  %5965 = vmatprep.mubr.msk.f32.mxu0 %vm6104_vm1, %v6103_v0  ;;  %5968 = vmatprep.subr.mxu1 %v6103_v0 }
 0x251   :  { %5961 = vmatmul.mubr.msk.f32.vlgmr.msra.gmra.mrb[60].mxu1 %vm78_vm0, %v2893_v6 }
 0x252   :  { %v6102_v51 = vpop.eup %6101  ;;  %5966 = vmatmul.mubr.msk.f32.vlgmr.msra.gmra.mrb[62].mxu0 %vm78_vm0, %v2894_v22  ;;  %5969 = vmatpush3.msk.msra.mxu1 %vm2931_vm3, %v2927_v48 }
 0x253   :  { %v2895_v5 = vmul.f32 %v6102_v51, %v6777_v47  ;;  %5970 = vmatprep.mubr.msk.f32.mxu1 %vm6104_vm1, %v6103_v0 }
 0x255   :  { %5971 = vmatmul.mubr.msk.f32.vlgmr.msra.gmra.mrb[62].mxu1 %vm78_vm0, %v2895_v5 }
 0x2e8   :  { %v3001_v14 = vpop.f32.mrb[32].mxu0 }
 0x2e9   :  { %5361 = vst.msk [vmem:[%s7184_s3] sm:$0xf] %vm2543_vm2, %v3001_v14  ;;  %v5817_v39 = vpop.f32.mrb[33].mxu0 }
 0x2ec   :  { %v3077_v46 = vpop.f32.mrb[32].mxu1 }
 0x2ed   :  { %5362 = vst.msk [vmem:[%s7184_s3 + $0x4] sm:$0xf] %vm2543_vm2, %v3077_v46  ;;  %v3153_v43 = vpop.f32.mrb[34].mxu0  ;;  %v5822_v47 = vpop.f32.mrb[33].mxu1 }
 0x2ee   :  { %5363 = vst.msk [vmem:[%s7184_s3 + $0x8] sm:$0xf] %vm2543_vm2, %v3153_v43  ;;  %v5827_v0 = vpop.f32.mrb[35].mxu0 }
 0x2f0   :  { %v3229_v17 = vpop.f32.mrb[34].mxu1 }
 0x2f1   :  { %5364 = vst.msk [vmem:[%s7184_s3 + $0xc] sm:$0xf] %vm2543_vm2, %v3229_v17  ;;  %v3305_v50 = vpop.f32.mrb[36].mxu0  ;;  %v5832_v13 = vpop.f32.mrb[35].mxu1 }
 0x2f2   :  { %5365 = vst.msk [vmem:[%s7184_s3 + $0x10] sm:$0xf] %vm2543_vm2, %v3305_v50  ;;  %v5837_v29 = vpop.f32.mrb[37].mxu0 }
 0x2f4   :  { %v3381_v21 = vpop.f32.mrb[36].mxu1 }
 0x2f5   :  { %5366 = vst.msk [vmem:[%s7184_s3 + $0x14] sm:$0xf] %vm2543_vm2, %v3381_v21  ;;  %v3457_v55 = vpop.f32.mrb[38].mxu0  ;;  %v5842_v35 = vpop.f32.mrb[37].mxu1 }
 0x2f6   :  { %5367 = vst.msk [vmem:[%s7184_s3 + $0x18] sm:$0xf] %vm2543_vm2, %v3457_v55  ;;  %v5847_v56 = vpop.f32.mrb[39].mxu0 }
 0x2f8   :  { %v3533_v36 = vpop.f32.mrb[38].mxu1 }
 0x2f9   :  { %5368 = vst.msk [vmem:[%s7184_s3 + $0x1c] sm:$0xf] %vm2543_vm2, %v3533_v36  ;;  %v3609_v60 = vpop.f32.mrb[40].mxu0  ;;  %v5852_v1 = vpop.f32.mrb[39].mxu1 }
 0x2fa   :  { %5369 = vst.msk [vmem:[%s7184_s3 + $0x20] sm:$0xf] %vm2543_vm2, %v3609_v60  ;;  %v5857_v2 = vpop.f32.mrb[41].mxu0 }
 0x2fc   :  { %v3685_v58 = vpop.f32.mrb[40].mxu1 }
 0x2fd   :  { %5370 = vst.msk [vmem:[%s7184_s3 + $0x24] sm:$0xf] %vm2543_vm2, %v3685_v58  ;;  %v3761_v54 = vpop.f32.mrb[42].mxu0  ;;  %v5862_v44 = vpop.f32.mrb[41].mxu1 }
 0x2fe   :  { %5371 = vst.msk [vmem:[%s7184_s3 + $0x28] sm:$0xf] %vm2543_vm2, %v3761_v54  ;;  %v5867_v11 = vpop.f32.mrb[43].mxu0 }
 0x300   :  { %v3837_v12 = vpop.f32.mrb[42].mxu1 }
 0x301   :  { %5372 = vst.msk [vmem:[%s7184_s3 + $0x2c] sm:$0xf] %vm2543_vm2, %v3837_v12  ;;  %v3913_v49 = vpop.f32.mrb[44].mxu0  ;;  %v5872_v41 = vpop.f32.mrb[43].mxu1 }
 0x302   :  { %5373 = vst.msk [vmem:[%s7184_s3 + $0x30] sm:$0xf] %vm2543_vm2, %v3913_v49  ;;  %v5877_v26 = vpop.f32.mrb[45].mxu0 }
 0x304   :  { %v3989_v16 = vpop.f32.mrb[44].mxu1 }
 0x305   :  { %5374 = vst.msk [vmem:[%s7184_s3 + $0x34] sm:$0xf] %vm2543_vm2, %v3989_v16  ;;  %v4065_v62 = vpop.f32.mrb[46].mxu0  ;;  %v5882_v4 = vpop.f32.mrb[45].mxu1 }
 0x306   :  { %5375 = vst.msk [vmem:[%s7184_s3 + $0x38] sm:$0xf] %vm2543_vm2, %v4065_v62  ;;  %v5887_v24 = vpop.f32.mrb[47].mxu0 }
 0x308   :  { %v4141_v19 = vpop.f32.mrb[46].mxu1 }
 0x309   :  { %5376 = vst.msk [vmem:[%s7184_s3 + $0x3c] sm:$0xf] %vm2543_vm2, %v4141_v19  ;;  %v4217_v59 = vpop.f32.mrb[48].mxu0  ;;  %v5892_v27 = vpop.f32.mrb[47].mxu1 }
 0x30a   :  { %5377 = vst.msk [vmem:[%s7184_s3 + $0x40] sm:$0xf] %vm2543_vm2, %v4217_v59  ;;  %v5897_v61 = vpop.f32.mrb[49].mxu0 }
 0x30c   :  { %v4293_v34 = vpop.f32.mrb[48].mxu1 }
 0x30d   :  { %5378 = vst.msk [vmem:[%s7184_s3 + $0x44] sm:$0xf] %vm2543_vm2, %v4293_v34  ;;  %v4369_v9 = vpop.f32.mrb[50].mxu0  ;;  %v5902_v32 = vpop.f32.mrb[49].mxu1 }
 0x30e   :  { %5379 = vst.msk [vmem:[%s7184_s3 + $0x48] sm:$0xf] %vm2543_vm2, %v4369_v9  ;;  %v5907_v40 = vpop.f32.mrb[51].mxu0 }
 0x310   :  { %v4445_v52 = vpop.f32.mrb[50].mxu1 }
 0x311   :  { %5380 = vst.msk [vmem:[%s7184_s3 + $0x4c] sm:$0xf] %vm2543_vm2, %v4445_v52  ;;  %v4521_v57 = vpop.f32.mrb[52].mxu0  ;;  %v5912_v33 = vpop.f32.mrb[51].mxu1 }
 0x312   :  { %5381 = vst.msk [vmem:[%s7184_s3 + $0x50] sm:$0xf] %vm2543_vm2, %v4521_v57  ;;  %v5917_v8 = vpop.f32.mrb[53].mxu0 }
 0x314   :  { %v4597_v15 = vpop.f32.mrb[52].mxu1 }
 0x315   :  { %5382 = vst.msk [vmem:[%s7184_s3 + $0x54] sm:$0xf] %vm2543_vm2, %v4597_v15  ;;  %v4673_v25 = vpop.f32.mrb[54].mxu0  ;;  %v5922_v18 = vpop.f32.mrb[53].mxu1 }
 0x316   :  { %5383 = vst.msk [vmem:[%s7184_s3 + $0x58] sm:$0xf] %vm2543_vm2, %v4673_v25  ;;  %v5927_v53 = vpop.f32.mrb[55].mxu0 }
 0x318   :  { %v4749_v37 = vpop.f32.mrb[54].mxu1 }
 0x319   :  { %5384 = vst.msk [vmem:[%s7184_s3 + $0x5c] sm:$0xf] %vm2543_vm2, %v4749_v37  ;;  %v4825_v38 = vpop.f32.mrb[56].mxu0  ;;  %v5932_v42 = vpop.f32.mrb[55].mxu1 }
 0x31a   :  { %5385 = vst.msk [vmem:[%s7184_s3 + $0x60] sm:$0xf] %vm2543_vm2, %v4825_v38  ;;  %v5937_v10 = vpop.f32.mrb[57].mxu0 }
 0x31c   :  { %v4901_v31 = vpop.f32.mrb[56].mxu1 }
 0x31d   :  { %5386 = vst.msk [vmem:[%s7184_s3 + $0x64] sm:$0xf] %vm2543_vm2, %v4901_v31  ;;  %v4977_v45 = vpop.f32.mrb[58].mxu0  ;;  %v5942_v3 = vpop.f32.mrb[57].mxu1 }
 0x31e   :  { %5387 = vst.msk [vmem:[%s7184_s3 + $0x68] sm:$0xf] %vm2543_vm2, %v4977_v45  ;;  %v5947_v23 = vpop.f32.mrb[59].mxu0 }
 0x320   :  { %v5053_v63 = vpop.f32.mrb[58].mxu1 }
 0x321   :  { %5388 = vst.msk [vmem:[%s7184_s3 + $0x6c] sm:$0xf] %vm2543_vm2, %v5053_v63  ;;  %v5129_v30 = vpop.f32.mrb[60].mxu0  ;;  %v5952_v28 = vpop.f32.mrb[59].mxu1 }
 0x322   :  { %5389 = vst.msk [vmem:[%s7184_s3 + $0x70] sm:$0xf] %vm2543_vm2, %v5129_v30  ;;  %v5957_v7 = vpop.f32.mrb[61].mxu0 }
 0x324   :  { %v5205_v20 = vpop.f32.mrb[60].mxu1 }
 0x325   :  { %5390 = vst.msk [vmem:[%s7184_s3 + $0x74] sm:$0xf] %vm2543_vm2, %v5205_v20  ;;  %v5281_v6 = vpop.f32.mrb[62].mxu0  ;;  %v5962_v48 = vpop.f32.mrb[61].mxu1 }
 0x326   :  { %5391 = vst.msk [vmem:[%s7184_s3 + $0x78] sm:$0xf] %vm2543_vm2, %v5281_v6  ;;  %v5967_v22 = vpop.f32.mrb[63].mxu0 }
 0x328   :  { %v5357_v51 = vpop.f32.mrb[62].mxu1 }
 0x329   :  { %5392 = vst.msk [vmem:[%s7184_s3 + $0x7c] sm:$0xf] %vm2543_vm2, %v5357_v51  ;;  %v5972_v5 = vpop.f32.mrb[63].mxu1 }

// kernel: block_forward.16
= control target key start
LH: loop header
LB: loop body
LE: loop exit
PB: predicated region body
PF: predicated region fallthrough
CT: control target
= control target key end

     0   :  { %vm23_vm0 = vcmask 261120   ;;  %vm119_vm1 = vcmask 254976   ;;  %s214_s1 = inlined_call_operand.vmem [shape: f32[32,32], index: 1, kind: input, shape index: {}]   ;;  %s215_s0 = inlined_call_operand.vmem [shape: f32[10,32], index: 0, kind: input, shape index: {}]   ;;  %s216_s3 = inlined_call_operand.vmem [shape: f32[10,32], index: 3, kind: input, shape index: {}]   ;;  %s217_s2 = inlined_call_operand.vmem [shape: f32[1,32], index: 2, kind: input, shape index: {}]   ;;  %s218_s4 = inlined_call_operand.vmem [shape: f32[10,32], index: 4, kind: output, shape index: {}]  }
   0x1   :  { %v19_v0 = vld [vmem:[%s214_s1] sm:$0xff]  ;;  %v20_v1 = vld [vmem:[%s214_s1 + $0x8] sm:$0xff]  ;;  %v21_v2 = vld [vmem:[%s214_s1 + $0x10] sm:$0xff] }
   0x2   :  { %v145_v3 = vpack.c.bf16 %v20_v1, %v19_v0  ;;  %v22_v4 = vld [vmem:[%s214_s1 + $0x18] sm:$0xff]  ;;  %v17_v5 = vld [vmem:[%s215_s0] sm:$0xff]  ;;  %v18_v7 = vld [vmem:[%s215_s0 + $0x8] sm:$0x3] }
   0x3   :  { %v149_v6 = vpack.c.bf16 %v22_v4, %v21_v2  ;;  %142 = vmatprep.mubr.msk.f32.mxu0 %vm23_vm0, %v17_v5  ;;  %v106_v8 = vld [vmem:[%s216_s3 + $0x8] sm:$0x3]  ;;  %v105_v9 = vld [vmem:[%s216_s3] sm:$0xff] }
   0x4   :  { %146 = vmatprep.subr.bf16.mxu0 %v145_v3  ;;  %v127_v11 = vld [vmem:[%s217_s2] ss:$0 sm:$0xff] }
   0x5   :  { %148 = vmatpush3.bf16.msra.mxu0 %v145_v3 }
   0x6   :  { %150 = vmatprep.subr.bf16.mxu0 %v149_v6 }
   0x9   :  { %152 = vmatpush3.bf16.msra.mxu0 %v149_v6 }
   0xc   :  { %143 = vmatmul.mubr.msk.f32.vlgmr.msra.gmra.mrb[0].mxu0 %vm23_vm0, %v18_v7 }
  0xdf   :  { %v144_v10 = vpop.f32.mrb[0].mxu0 }
  0xe0   :  { %v108_v12 = vadd.f32 %v144_v10, %v106_v8  ;;  %v96_v13 = vpop.f32.mrb[1].mxu0 }
  0xe1   :  { %v107_v14 = vadd.f32 %v105_v9, %v96_v13 }
  0xe2   :  { %v117_v15 = vadd.f32 %v127_v11, %v108_v12 }
  0xe3   :  { %v116_v16 = vadd.f32 %v127_v11, %v107_v14 }
  0xe4   :  { %120 = vst.msk [vmem:[%s218_s4 + $0x8] sm:$0x3] %vm119_vm1, %v117_v15 }
  0xe5   :  { %118 = vst.msk [vmem:[%s218_s4] sm:$0xff] %vm23_vm0, %v116_v16 }

// kernel: block_forward.17
= control target key start
LH: loop header
LB: loop body
LE: loop exit
PB: predicated region body
PF: predicated region fallthrough
CT: control target
= control target key end

     0   :  { %vm30_vm0 = vcmask 261120   ;;  %vm34_vm1 = vcmask 254976   ;;  %s549_s0 = inlined_call_operand.vmem [shape: f32[10,32], index: 0, kind: input, shape index: {}]   ;;  %s550_s3 = inlined_call_operand.vmem [shape: f32[32,128], index: 3, kind: input, shape index: {}]   ;;  %s551_s5 = inlined_call_operand.vmem [shape: f32[128,32], index: 5, kind: input, shape index: {}]   ;;  %s552_s1 = inlined_call_operand.vmem [shape: f32[1,32], index: 1, kind: input, shape index: {}]   ;;  %s553_s2 = inlined_call_operand.vmem [shape: f32[1,32], index: 2, kind: input, shape index: {}, may-alias: {2,6}]   ;;  %s554_s4 = inlined_call_operand.vmem [shape: f32[1,128], index: 4, kind: input, shape index: {}]   ;;  %s555_s6 = inlined_call_operand.vmem [shape: f32[1,32], index: 6, kind: input, shape index: {}, may-alias: {2,6}]   ;;  %s556_s7 = inlined_call_operand.vmem [shape: f32[10,32], index: 7, kind: output, shape index: {}]  }
   0x1   :  { %v450_v0 = vld [vmem:[%s549_s0] sm:$0xff]  ;;  %v455_v1 = vld [vmem:[%s549_s0 + $0x8] sm:$0x3]  ;;  %v77_v16 = vld [vmem:[%s550_s3 + $0x10] sm:$0xff] }
   0x2   :  { %v31_v2 = vsel %vm30_vm0, %v450_v0, 0.0  ;;  %v35_v3 = vsel %vm34_vm1, %v455_v1, 0.0  ;;  %v75_v14 = vld [vmem:[%s550_s3] sm:$0xff]  ;;  %v76_v15 = vld [vmem:[%s550_s3 + $0x8] sm:$0xff]  ;;  %v78_v18 = vld [vmem:[%s550_s3 + $0x18] sm:$0xff] }
   0x3   :  { %32 = vadd.xlane.f32.xlu0 %v31_v2  ;;  %v359_v17 = vpack.c.bf16 %v76_v15, %v75_v14  ;;  %v363_v19 = vpack.c.bf16 %v78_v18, %v77_v16  ;;  %v177_v20 = vld [vmem:[%s551_s5] sm:$0xff]  ;;  %v178_v21 = vld [vmem:[%s551_s5 + $0x8] sm:$0xff]  ;;  %v179_v22 = vld [vmem:[%s551_s5 + $0x10] sm:$0xff] }
   0x4   :  { %v367_v23 = vpack.c.bf16 %v178_v21, %v177_v20  ;;  %v180_v24 = vld [vmem:[%s551_s5 + $0x18] sm:$0xff]  ;;  %v181_v26 = vld [vmem:[%s551_s5 + $0x20] sm:$0xff]  ;;  %v182_v27 = vld [vmem:[%s551_s5 + $0x28] sm:$0xff] }
   0x5   :  { %360 = vmatprep.subr.bf16.mxu0 %v359_v17  ;;  %v371_v25 = vpack.c.bf16 %v180_v24, %v179_v22  ;;  %v375_v28 = vpack.c.bf16 %v182_v27, %v181_v26  ;;  %v283_v36 = vld [vmem:[%s552_s1] ss:$0 sm:$0xff]  ;;  %v183_v45 = vld [vmem:[%s551_s5 + $0x30] sm:$0xff]  ;;  %v184_v46 = vld [vmem:[%s551_s5 + $0x38] sm:$0xff] }
   0x6   :  { %362 = vmatpush3.bf16.msra.mxu0 %v359_v17  ;;  %368 = vmatprep.subr.bf16.mxu1 %v367_v23  ;;  %v284_v38 = vld [vmem:[%s553_s2] ss:$0 sm:$0xff]  ;;  %v379_v47 = vpack.c.bf16 %v184_v46, %v183_v45  ;;  %v186_v49 = vld [vmem:[%s551_s5 + $0x48] sm:$0xff]  ;;  %v187_v51 = vld [vmem:[%s551_s5 + $0x50] sm:$0xff] }
   0x7   :  { %36 = vadd.xlane.f32.xlu0 %v35_v3  ;;  %364 = vmatprep.subr.bf16.mxu0 %v363_v19  ;;  %v185_v48 = vld [vmem:[%s551_s5 + $0x40] sm:$0xff]  ;;  %v188_v52 = vld [vmem:[%s551_s5 + $0x58] sm:$0xff]  ;;  %v190_v55 = vld [vmem:[%s551_s5 + $0x68] sm:$0xff] }
   0x8   :  { %370 = vmatpush3.bf16.msra.mxu1 %v367_v23  ;;  %v383_v50 = vpack.c.bf16 %v186_v49, %v185_v48  ;;  %v387_v53 = vpack.c.bf16 %v188_v52, %v187_v51  ;;  %v189_v54 = vld [vmem:[%s551_s5 + $0x60] sm:$0xff]  ;;  %v191_v57 = vld [vmem:[%s551_s5 + $0x70] sm:$0xff]  ;;  %v192_v58 = vld [vmem:[%s551_s5 + $0x78] sm:$0xff] }
   0x9   :  { %372 = vmatprep.subr.bf16.mxu1 %v371_v25  ;;  %v391_v56 = vpack.c.bf16 %v190_v55, %v189_v54  ;;  %v395_v59 = vpack.c.bf16 %v192_v58, %v191_v57  ;;  %v285_v60 = vld [vmem:[%s554_s4] ss:$0 sm:$0xff] }
   0xa   :  { %366 = vmatpush3.bf16.msra.mxu0 %v363_v19 }
   0xc   :  { %374 = vmatpush3.bf16.msra.mxu1 %v371_v25 }
   0xd   :  { %376 = vmatprep.subr.bf16.mxu1 %v375_v28 }
  0x10   :  { %378 = vmatpush3.bf16.msra.mxu1 %v375_v28 }
  0x11   :  { %380 = vmatprep.subr.bf16.mxu1 %v379_v47 }
  0x14   :  { %382 = vmatpush3.bf16.msra.mxu1 %v379_v47 }
  0x15   :  { %384 = vmatprep.subr.bf16.mxu1 %v383_v50 }
  0x18   :  { %386 = vmatpush3.bf16.msra.mxu1 %v383_v50 }
  0x19   :  { %388 = vmatprep.subr.bf16.mxu1 %v387_v53 }
  0x1c   :  { %390 = vmatpush3.bf16.msra.mxu1 %v387_v53 }
  0x1d   :  { %392 = vmatprep.subr.bf16.mxu1 %v391_v56 }
  0x20   :  { %394 = vmatpush3.bf16.msra.mxu1 %v391_v56 }
  0x21   :  { %396 = vmatprep.subr.bf16.mxu1 %v395_v59 }
  0x24   :  { %398 = vmatpush3.bf16.msra.mxu1 %v395_v59 }
  0x90   :  { %v33_v4 = vpop.xlane.xlu0 %32 }
  0x91   :  { %v39_v5 = vmul.f32 0.03125, %v33_v4 }
  0x93   :  { %v41_v6 = vsub.f32 %v450_v0, %v39_v5 }
  0x94   :  { %v37_v7 = vpop.xlane.xlu0 %36 }
  0x95   :  { %v40_v8 = vmul.f32 0.03125, %v37_v7  ;;  %v43_v9 = vmul.f32 %v41_v6, %v41_v6 }
  0x97   :  { %v42_v10 = vsub.f32 %v455_v1, %v40_v8  ;;  %v45_v11 = vsel %vm30_vm0, %v43_v9, 0.0 }
  0x98   :  { %46 = vadd.xlane.f32.xlu1 %v45_v11 }
  0x99   :  { %v44_v12 = vmul.f32 %v42_v10, %v42_v10 }
  0x9b   :  { %v48_v13 = vsel %vm34_vm1, %v44_v12, 0.0 }
  0x9c   :  { %49 = vadd.xlane.f32.xlu1 %v48_v13  ;;  %v288_v13 = vld [vmem:[%s555_s6] ss:$0 sm:$0xff] }
 0x125   :  { %v47_v29 = vpop.xlane.xlu1 %46 }
 0x126   :  { %v51_v30 = vmul.f32 0.03125, %v47_v29 }
 0x128   :  { %v53_v31 = vadd.f32 1e-05, %v51_v30 }
 0x129   :  { %v50_v32 = vpop.xlane.xlu1 %49 }
 0x12a   :  { %399 = vrsqrt.f32 %v53_v31  ;;  %v52_v33 = vmul.f32 0.03125, %v50_v32 }
 0x12c   :  { %v54_v34 = vadd.f32 1e-05, %v52_v33 }
 0x12e   :  { %401 = vrsqrt.f32 %v54_v34 }
 0x134   :  { %v400_v35 = vpop.eup %399 }
 0x135   :  { %v57_v37 = vmul.f32 %v400_v35, %v41_v6 }
 0x137   :  { %v65_v39 = vmul.f32 %v283_v36, %v57_v37 }
 0x138   :  { %v402_v40 = vpop.eup %401 }
 0x139   :  { %v58_v41 = vmul.f32 %v402_v40, %v42_v10  ;;  %v73_v42 = vadd.f32 %v284_v38, %v65_v39 }
 0x13b   :  { %v66_v43 = vmul.f32 %v283_v36, %v58_v41  ;;  %321 = vmatprep.mubr.msk.f32.mxu0 %vm30_vm0, %v73_v42 }
 0x13d   :  { %v74_v44 = vadd.f32 %v284_v38, %v66_v43 }
 0x13f   :  { %322 = vmatmul.mubr.msk.f32.vlgmr.msra.gmra.mrb[0].mxu0 %vm30_vm0, %v74_v44 }
 0x212   :  { %v323_v61 = vpop.f32.mrb[0].mxu0 }
 0x213   :  { %v164_v62 = vadd.f32 %v323_v61, %v285_v60  ;;  %v158_v63 = vpop.f32.mrb[1].mxu0 }
 0x214   :  { %v159_v2 = vadd.f32 %v285_v60, %v158_v63 }
 0x215   :  { %v170_v3 = vmul.f32 0.70710677, %v164_v62  ;;  %v168_v10 = vmul.f32 0.5, %v164_v62 }
 0x216   :  { %v169_v4 = vmul.f32 0.70710677, %v159_v2  ;;  %v167_v8 = vmul.f32 0.5, %v159_v2 }
 0x217   :  { %403 = verf.f32 %v170_v3 }
 0x218   :  { %405 = verf.f32 %v169_v4 }
 0x221   :  { %v404_v5 = vpop.eup %403 }
 0x222   :  { %v406_v6 = vpop.eup %405  ;;  %v174_v7 = vadd.f32 1.0, %v404_v5 }
 0x223   :  { %v173_v9 = vadd.f32 1.0, %v406_v6 }
 0x224   :  { %v176_v12 = vmul.f32 %v174_v7, %v168_v10 }
 0x225   :  { %v175_v11 = vmul.f32 %v173_v9, %v167_v8 }
 0x227   :  { %356 = vmatprep.mubr.f32.mxu1 %v175_v11 }
 0x228   :  { %357 = vmatmul.mubr.f32.vlgmr.msra.gmra.mrb[0].mxu1 %v176_v12 }
 0x2fb   :  { %v358_v14 = vpop.f32.mrb[0].mxu1 }
 0x2fc   :  { %v272_v15 = vadd.f32 %v358_v14, %v288_v13  ;;  %v266_v16 = vpop.f32.mrb[1].mxu1 }
 0x2fd   :  { %v267_v17 = vadd.f32 %v288_v13, %v266_v16 }
 0x2fe   :  { %v276_v18 = vadd.f32 %v272_v15, %v455_v1 }
 0x2ff   :  { %v275_v19 = vadd.f32 %v267_v17, %v450_v0 }
 0x300   :  { %278 = vst.msk [vmem:[%s556_s7 + $0x8] sm:$0x3] %vm34_vm1, %v276_v18 }
 0x301   :  { %277 = vst.msk [vmem:[%s556_s7] sm:$0xff] %vm30_vm0, %v275_v19 }

// kernel: block_forward.15
= control target key start
LH: loop header
LB: loop body
LE: loop exit
PB: predicated region body
PF: predicated region fallthrough
CT: control target
= control target key end

     0   :  { %vm49_vm0 = vcmask 31744   ;;  %v3356_v0 = vmov 0.0   ;;  %vm3357_vm1 = vmmov 0   ;;  %vm1554_vm4 = vcmask 36864   ;;  %s4004_s1 = inlined_call_operand.vmem [shape: f32[16,5,4], index: 1, kind: input, shape index: {}]   ;;  %s4005_s0 = inlined_call_operand.vmem [shape: f32[16,5,4], index: 0, kind: input, shape index: {}]   ;;  %s4006_s3 = inlined_call_operand.vmem [shape: f32[16,1,5], index: 3, kind: input, shape index: {}]   ;;  %s4007_s2 = inlined_call_operand.vmem [shape: f32[16,5,4], index: 2, kind: input, shape index: {}]   ;;  %s4008_s4 = inlined_call_operand.vmem [shape: f32[16,5,4], index: 4, kind: output, shape index: {}]  }
   0x1   :  { %3130 = vmatprep.subr.mxu0 %v3356_v0  ;;  %3135 = vmatprep.subr.mxu1 %v3356_v0  ;;  %v33_v1 = vld [vmem:[%s4004_s1] sm:$0x1f]  ;;  %v34_v2 = vld [vmem:[%s4004_s1 + $0x8] sm:$0x1f]  ;;  %v35_v5 = vld [vmem:[%s4004_s1 + $0x10] sm:$0x1f] }
   0x2   :  { %3131 = vmatpush3.xpose.msk.msra.mxu0 %vm49_vm0, %v33_v1  ;;  %3136 = vmatpush3.xpose.msk.msra.mxu1 %vm49_vm0, %v34_v2  ;;  %v17_v3 = vld [vmem:[%s4005_s0] sm:$0x1f]  ;;  %v18_v4 = vld [vmem:[%s4005_s0 + $0x8] sm:$0x1f]  ;;  %v36_v6 = vld [vmem:[%s4004_s1 + $0x18] sm:$0x1f] }
   0x3   :  { %3132 = vmatprep.mubr.msk.f32.mxu0 %vm3357_vm1, %v3356_v0  ;;  %3137 = vmatprep.mubr.msk.f32.mxu1 %vm3357_vm1, %v3356_v0  ;;  %v19_v7 = vld [vmem:[%s4005_s0 + $0x10] sm:$0x1f]  ;;  %v37_v8 = vld [vmem:[%s4004_s1 + $0x20] sm:$0x1f]  ;;  %v20_v9 = vld [vmem:[%s4005_s0 + $0x18] sm:$0x1f] }
   0x4   :  { %3140 = vmatprep.subr.mxu0 %v3356_v0  ;;  %3145 = vmatprep.subr.mxu1 %v3356_v0  ;;  %v38_v10 = vld [vmem:[%s4004_s1 + $0x28] sm:$0x1f]  ;;  %v21_v11 = vld [vmem:[%s4005_s0 + $0x20] sm:$0x1f]  ;;  %v39_v12 = vld [vmem:[%s4004_s1 + $0x30] sm:$0x1f] }
   0x5   :  { %3133 = vmatmul.mubr.msk.f32.vlgmr.msra.gmra.mrb[0].mxu0 %vm49_vm0, %v17_v3  ;;  %3138 = vmatmul.mubr.msk.f32.vlgmr.msra.gmra.mrb[0].mxu1 %vm49_vm0, %v18_v4  ;;  %v22_v13 = vld [vmem:[%s4005_s0 + $0x28] sm:$0x1f]  ;;  %v40_v14 = vld [vmem:[%s4004_s1 + $0x38] sm:$0x1f]  ;;  %v23_v15 = vld [vmem:[%s4005_s0 + $0x30] sm:$0x1f] }
   0x6   :  { %3141 = vmatpush3.xpose.msk.msra.mxu0 %vm49_vm0, %v35_v5  ;;  %3142 = vmatprep.mubr.msk.f32.mxu0 %vm3357_vm1, %v3356_v0  ;;  %v41_v16 = vld [vmem:[%s4004_s1 + $0x40] sm:$0x1f]  ;;  %v24_v17 = vld [vmem:[%s4005_s0 + $0x38] sm:$0x1f]  ;;  %v42_v18 = vld [vmem:[%s4004_s1 + $0x48] sm:$0x1f] }
   0x7   :  { %3150 = vmatprep.subr.mxu0 %v3356_v0  ;;  %3146 = vmatpush3.xpose.msk.msra.mxu1 %vm49_vm0, %v36_v6  ;;  %v25_v19 = vld [vmem:[%s4005_s0 + $0x40] sm:$0x1f]  ;;  %v43_v20 = vld [vmem:[%s4004_s1 + $0x50] sm:$0x1f]  ;;  %v26_v21 = vld [vmem:[%s4005_s0 + $0x48] sm:$0x1f] }
   0x8   :  { %3147 = vmatprep.mubr.msk.f32.mxu1 %vm3357_vm1, %v3356_v0  ;;  %3155 = vmatprep.subr.mxu1 %v3356_v0  ;;  %v44_v22 = vld [vmem:[%s4004_s1 + $0x58] sm:$0x1f]  ;;  %v27_v23 = vld [vmem:[%s4005_s0 + $0x50] sm:$0x1f]  ;;  %v45_v24 = vld [vmem:[%s4004_s1 + $0x60] sm:$0x1f] }
   0x9   :  { %3143 = vmatmul.mubr.msk.f32.vlgmr.msra.gmra.mrb[2].mxu0 %vm49_vm0, %v19_v7  ;;  %v28_v25 = vld [vmem:[%s4005_s0 + $0x58] sm:$0x1f]  ;;  %v46_v26 = vld [vmem:[%s4004_s1 + $0x68] sm:$0x1f]  ;;  %v29_v27 = vld [vmem:[%s4005_s0 + $0x60] sm:$0x1f] }
   0xa   :  { %3151 = vmatpush3.xpose.msk.msra.mxu0 %vm49_vm0, %v37_v8  ;;  %3152 = vmatprep.mubr.msk.f32.mxu0 %vm3357_vm1, %v3356_v0  ;;  %v47_v28 = vld [vmem:[%s4004_s1 + $0x70] sm:$0x1f]  ;;  %v30_v29 = vld [vmem:[%s4005_s0 + $0x68] sm:$0x1f]  ;;  %v3050_v30 = vld [vmem:[%s4006_s3] ss:$0 sm:$0xff] }
   0xb   :  { %3148 = vmatmul.mubr.msk.f32.vlgmr.msra.gmra.mrb[2].mxu1 %vm49_vm0, %v20_v9  ;;  %3160 = vmatprep.subr.mxu0 %v3356_v0  ;;  %v48_v31 = vld [vmem:[%s4004_s1 + $0x78] sm:$0x1f]  ;;  %v31_v32 = vld [vmem:[%s4005_s0 + $0x70] sm:$0x1f]  ;;  %v3052_v33 = vld [vmem:[%s4006_s3 + $0x2] ss:$0 sm:$0xff] }
   0xc   :  { %3156 = vmatpush3.xpose.msk.msra.mxu1 %vm49_vm0, %v38_v10  ;;  %3157 = vmatprep.mubr.msk.f32.mxu1 %vm3357_vm1, %v3356_v0  ;;  %v32_v34 = vld [vmem:[%s4005_s0 + $0x78] sm:$0x1f]  ;;  %v3051_v35 = vld [vmem:[%s4006_s3 + $0x1] ss:$0 sm:$0xff]  ;;  %v3053_v36 = vld [vmem:[%s4006_s3 + $0x3] ss:$0 sm:$0xff] }
   0xd   :  { %3153 = vmatmul.mubr.msk.f32.vlgmr.msra.gmra.mrb[4].mxu0 %vm49_vm0, %v21_v11  ;;  %3165 = vmatprep.subr.mxu1 %v3356_v0  ;;  %v3054_v37 = vld [vmem:[%s4006_s3 + $0x4] ss:$0 sm:$0xff]  ;;  %v3055_v38 = vld [vmem:[%s4006_s3 + $0x5] ss:$0 sm:$0xff]  ;;  %v3586_v39 = vld [vmem:[%s4006_s3 + $0x6] ss:$0 sm:$0xff] }
   0xe   :  { %3161 = vmatpush3.xpose.msk.msra.mxu0 %vm49_vm0, %v39_v12  ;;  %3162 = vmatprep.mubr.msk.f32.mxu0 %vm3357_vm1, %v3356_v0  ;;  %v3591_v40 = vld [vmem:[%s4006_s3 + $0x7] ss:$0 sm:$0xff]  ;;  %v3597_v41 = vld [vmem:[%s4006_s3 + $0x8] ss:$0 sm:$0xff]  ;;  %v3603_v42 = vld [vmem:[%s4006_s3 + $0x9] ss:$0 sm:$0xff] }
   0xf   :  { %3158 = vmatmul.mubr.msk.f32.vlgmr.msra.gmra.mrb[4].mxu1 %vm49_vm0, %v22_v13  ;;  %3170 = vmatprep.subr.mxu0 %v3356_v0  ;;  %v3609_v43 = vld [vmem:[%s4006_s3 + $0xa] ss:$0 sm:$0xff]  ;;  %v3615_v44 = vld [vmem:[%s4006_s3 + $0xb] ss:$0 sm:$0xff]  ;;  %v3621_v45 = vld [vmem:[%s4006_s3 + $0xc] ss:$0 sm:$0xff] }
  0x10   :  { %3166 = vmatpush3.xpose.msk.msra.mxu1 %vm49_vm0, %v40_v14  ;;  %3167 = vmatprep.mubr.msk.f32.mxu1 %vm3357_vm1, %v3356_v0  ;;  %v3627_v46 = vld [vmem:[%s4006_s3 + $0xd] ss:$0 sm:$0xff]  ;;  %v3633_v47 = vld [vmem:[%s4006_s3 + $0xe] ss:$0 sm:$0xff]  ;;  %v3639_v48 = vld [vmem:[%s4006_s3 + $0xf] ss:$0 sm:$0xff] }
  0x11   :  { %3163 = vmatmul.mubr.msk.f32.vlgmr.msra.gmra.mrb[6].mxu0 %vm49_vm0, %v23_v15  ;;  %3175 = vmatprep.subr.mxu1 %v3356_v0 }
  0x12   :  { %3171 = vmatpush3.xpose.msk.msra.mxu0 %vm49_vm0, %v41_v16  ;;  %3172 = vmatprep.mubr.msk.f32.mxu0 %vm3357_vm1, %v3356_v0 }
  0x13   :  { %3168 = vmatmul.mubr.msk.f32.vlgmr.msra.gmra.mrb[6].mxu1 %vm49_vm0, %v24_v17  ;;  %3180 = vmatprep.subr.mxu0 %v3356_v0 }
  0x14   :  { %3176 = vmatpush3.xpose.msk.msra.mxu1 %vm49_vm0, %v42_v18  ;;  %3177 = vmatprep.mubr.msk.f32.mxu1 %vm3357_vm1, %v3356_v0 }
  0x15   :  { %3173 = vmatmul.mubr.msk.f32.vlgmr.msra.gmra.mrb[8].mxu0 %vm49_vm0, %v25_v19  ;;  %3185 = vmatprep.subr.mxu1 %v3356_v0 }
  0x16   :  { %3181 = vmatpush3.xpose.msk.msra.mxu0 %vm49_vm0, %v43_v20  ;;  %3182 = vmatprep.mubr.msk.f32.mxu0 %vm3357_vm1, %v3356_v0 }
  0x17   :  { %3178 = vmatmul.mubr.msk.f32.vlgmr.msra.gmra.mrb[8].mxu1 %vm49_vm0, %v26_v21  ;;  %3190 = vmatprep.subr.mxu0 %v3356_v0 }
  0x18   :  { %3186 = vmatpush3.xpose.msk.msra.mxu1 %vm49_vm0, %v44_v22  ;;  %3187 = vmatprep.mubr.msk.f32.mxu1 %vm3357_vm1, %v3356_v0 }
  0x19   :  { %3183 = vmatmul.mubr.msk.f32.vlgmr.msra.gmra.mrb[10].mxu0 %vm49_vm0, %v27_v23  ;;  %3195 = vmatprep.subr.mxu1 %v3356_v0 }
  0x1a   :  { %3191 = vmatpush3.xpose.msk.msra.mxu0 %vm49_vm0, %v45_v24  ;;  %3192 = vmatprep.mubr.msk.f32.mxu0 %vm3357_vm1, %v3356_v0 }
  0x1b   :  { %3188 = vmatmul.mubr.msk.f32.vlgmr.msra.gmra.mrb[10].mxu1 %vm49_vm0, %v28_v25  ;;  %3200 = vmatprep.subr.mxu0 %v3356_v0 }
  0x1c   :  { %3196 = vmatpush3.xpose.msk.msra.mxu1 %vm49_vm0, %v46_v26  ;;  %3197 = vmatprep.mubr.msk.f32.mxu1 %vm3357_vm1, %v3356_v0 }
  0x1d   :  { %3193 = vmatmul.mubr.msk.f32.vlgmr.msra.gmra.mrb[12].mxu0 %vm49_vm0, %v29_v27  ;;  %3205 = vmatprep.subr.mxu1 %v3356_v0 }
  0x1e   :  { %3201 = vmatpush3.xpose.msk.msra.mxu0 %vm49_vm0, %v47_v28  ;;  %3202 = vmatprep.mubr.msk.f32.mxu0 %vm3357_vm1, %v3356_v0 }
  0x1f   :  { %3198 = vmatmul.mubr.msk.f32.vlgmr.msra.gmra.mrb[12].mxu1 %vm49_vm0, %v30_v29  ;;  %1303 = vbcast.lane.b32.xlu0 %v3050_v30, 256 }
  0x20   :  { %3206 = vmatpush3.xpose.msk.msra.mxu1 %vm49_vm0, %v48_v31  ;;  %3207 = vmatprep.mubr.msk.f32.mxu1 %vm3357_vm1, %v3356_v0 }
  0x21   :  { %3203 = vmatmul.mubr.msk.f32.vlgmr.msra.gmra.mrb[14].mxu0 %vm49_vm0, %v31_v32  ;;  %1317 = vbcast.lane.b32.xlu1 %v3052_v33, 256 }
  0x22   :  { %3210 = vmatprep.subr.mxu0 %v3356_v0  ;;  %3215 = vmatprep.subr.mxu1 %v3356_v0 }
  0x23   :  { %3208 = vmatmul.mubr.msk.f32.vlgmr.msra.gmra.mrb[14].mxu1 %vm49_vm0, %v32_v34  ;;  %1310 = vbcast.lane.b32.xlu0 %v3051_v35, 256 }
  0x24   :  { %3212 = vmatprep.mubr.msk.f32.mxu0 %vm3357_vm1, %v3356_v0  ;;  %3217 = vmatprep.mubr.msk.f32.mxu1 %vm3357_vm1, %v3356_v0 }
  0x25   :  { %1324 = vbcast.lane.b32.xlu1 %v3053_v36, 256 }
  0x27   :  { %1331 = vbcast.lane.b32.xlu0 %v3054_v37, 256 }
  0x29   :  { %1338 = vbcast.lane.b32.xlu1 %v3055_v38, 256 }
  0x2b   :  { %1345 = vbcast.lane.b32.xlu0 %v3586_v39, 256 }
  0x2d   :  { %1352 = vbcast.lane.b32.xlu1 %v3591_v40, 256 }
  0x2f   :  { %1359 = vbcast.lane.b32.xlu0 %v3597_v41, 256 }
  0x31   :  { %1366 = vbcast.lane.b32.xlu1 %v3603_v42, 256 }
  0x33   :  { %1373 = vbcast.lane.b32.xlu0 %v3609_v43, 256 }
  0x35   :  { %1380 = vbcast.lane.b32.xlu1 %v3615_v44, 256 }
  0x37   :  { %1387 = vbcast.lane.b32.xlu0 %v3621_v45, 256 }
  0x39   :  { %1394 = vbcast.lane.b32.xlu1 %v3627_v46, 256 }
  0x3b   :  { %1401 = vbcast.lane.b32.xlu0 %v3633_v47, 256 }
  0x3d   :  { %1408 = vbcast.lane.b32.xlu1 %v3639_v48, 256 }
  0x91   :  { %v1304_v49 = vpop.permute.xlu0 %1303 }
  0x92   :  { %v1506_v55 = vmul.f32 %v3050_v30, %v1304_v49 }
  0x93   :  { %v1318_v50 = vpop.permute.xlu1 %1317 }
  0x94   :  { %vm1522_vm2 = vcmp.eq.f32.partialorder %v1506_v55, 0.0  ;;  %v1508_v61 = vmul.f32 %v3052_v33, %v1318_v50 }
  0x95   :  { %v1311_v51 = vpop.permute.xlu0 %1310 }
  0x96   :  { %v1507_v56 = vmul.f32 %v3051_v35, %v1311_v51  ;;  %vm1524_vm5 = vcmp.eq.f32.partialorder %v1508_v61, 0.0 }
  0x97   :  { %v1325_v52 = vpop.permute.xlu1 %1324 }
  0x98   :  { %vm1523_vm3 = vcmp.eq.f32.partialorder %v1507_v56, 0.0  ;;  %v1509_v3 = vmul.f32 %v3053_v36, %v1325_v52 }
  0x99   :  { %v1332_v53 = vpop.permute.xlu0 %1331 }
  0x9a   :  { %v1510_v10 = vmul.f32 %v3054_v37, %v1332_v53  ;;  %vm1525_vm6 = vcmp.eq.f32.partialorder %v1509_v3, 0.0 }
  0x9b   :  { %v1339_v54 = vpop.permute.xlu1 %1338 }
  0x9c   :  { %v1511_v15 = vmul.f32 %v3055_v38, %v1339_v54  ;;  %vm1526_vm7 = vcmp.eq.f32.partialorder %v1510_v10, 0.0 }
  0x9d   :  { %v1346_v57 = vpop.permute.xlu0 %1345 }
  0x9e   :  { %v1512_v21 = vmul.f32 %v3586_v39, %v1346_v57  ;;  %vm1527_vm8 = vcmp.eq.f32.partialorder %v1511_v15, 0.0 }
  0x9f   :  { %v1353_v58 = vpop.permute.xlu1 %1352 }
  0xa0   :  { %v1513_v28 = vmul.f32 %v3591_v40, %v1353_v58  ;;  %vm1528_vm9 = vcmp.eq.f32.partialorder %v1512_v21, 0.0 }
  0xa1   :  { %v1360_v6 = vpop.permute.xlu0 %1359 }
  0xa2   :  { %v1514_v35 = vmul.f32 %v3597_v41, %v1360_v6  ;;  %vm1529_vm10 = vcmp.eq.f32.partialorder %v1513_v28, 0.0 }
  0xa3   :  { %v1367_v13 = vpop.permute.xlu1 %1366 }
  0xa4   :  { %v1515_v49 = vmul.f32 %v3603_v42, %v1367_v13  ;;  %vm1530_vm11 = vcmp.eq.f32.partialorder %v1514_v35, 0.0 }
  0xa5   :  { %v1374_v25 = vpop.permute.xlu0 %1373 }
  0xa6   :  { %v1516_v55 = vmul.f32 %v3609_v43, %v1374_v25  ;;  %vm1531_vm12 = vcmp.eq.f32.partialorder %v1515_v49, 0.0 }
  0xa7   :  { %v1381_v32 = vpop.permute.xlu1 %1380 }
  0xa8   :  { %v1517_v61 = vmul.f32 %v3615_v44, %v1381_v32  ;;  %vm1532_vm13 = vcmp.eq.f32.partialorder %v1516_v55, 0.0 }
  0xa9   :  { %v1388_v53 = vpop.permute.xlu0 %1387 }
  0xaa   :  { %v1518_v3 = vmul.f32 %v3621_v45, %v1388_v53  ;;  %vm1533_vm14 = vcmp.eq.f32.partialorder %v1517_v61, 0.0 }
  0xab   :  { %v1395_v42 = vpop.permute.xlu1 %1394 }
  0xac   :  { %vm1534_vm15 = vcmp.eq.f32.partialorder %v1518_v3, 0.0 }
  0xaf   :  { %v1409_v45 = vpop.permute.xlu1 %1408 }
  0xd8   :  { %v122_v59 = vpop.f32.mrb[0].mxu0  ;;  %v198_v60 = vpop.f32.mrb[0].mxu1 }
  0xd9   :  { %v1266_v62 = vmul.f32 0.5, %v122_v59  ;;  %v1267_v63 = vmul.f32 0.5, %v198_v60  ;;  %v3134_v1 = vpop.f32.mrb[1].mxu0  ;;  %v3139_v2 = vpop.f32.mrb[1].mxu1 }
  0xdb   :  { %v3643_v4 = vsel %vm1523_vm3, -60000.0, %v1267_v63  ;;  %v3645_v5 = vsel %vm1522_vm2, -60000.0, %v1266_v62 }
  0xdc   :  { %v274_v7 = vpop.f32.mrb[2].mxu0  ;;  %v1558_v8 = vsel %vm1554_vm4, %v3643_v4, -inf  ;;  %v1555_v9 = vsel %vm1554_vm4, %v3645_v5, -inf }
  0xdd   :  { %v1268_v11 = vmul.f32 0.5, %v274_v7  ;;  %1559 = vmax.xlane.f32.xlu1 %v1558_v8  ;;  %1556 = vmax.xlane.f32.xlu0 %v1555_v9  ;;  %v3144_v12 = vpop.f32.mrb[3].mxu0  ;;  %v1402_v9 = vpop.permute.xlu0 %1401 }
  0xde   :  { %v350_v14 = vpop.f32.mrb[2].mxu1 }
  0xdf   :  { %v1269_v16 = vmul.f32 0.5, %v350_v14  ;;  %v3149_v17 = vpop.f32.mrb[3].mxu1  ;;  %v3651_v18 = vsel %vm1524_vm5, -60000.0, %v1268_v11  ;;  %v1519_v11 = vmul.f32 %v3627_v46, %v1395_v42  ;;  %vm1751_vm5 = vcmask 1044480  }
  0xe0   :  { %v426_v19 = vpop.f32.mrb[4].mxu0  ;;  %v1561_v20 = vsel %vm1554_vm4, %v3651_v18, -inf  ;;  %v1520_v17 = vmul.f32 %v3633_v47, %v1402_v9 }
  0xe1   :  { %v1270_v22 = vmul.f32 0.5, %v426_v19  ;;  %1562 = vmax.xlane.f32.xlu0 %v1561_v20  ;;  %v3154_v23 = vpop.f32.mrb[5].mxu0  ;;  %v3656_v24 = vsel %vm1525_vm6, -60000.0, %v1269_v16  ;;  %vm1535_vm0 = vcmp.eq.f32.partialorder %v1519_v11, 0.0  ;;  %vm1747_vm6 = vcmask 39936  }
  0xe2   :  { %v502_v26 = vpop.f32.mrb[4].mxu1  ;;  %v1564_v27 = vsel %vm1554_vm4, %v3656_v24, -inf  ;;  %v1521_v23 = vmul.f32 %v3639_v48, %v1409_v45  ;;  %vm1536_vm2 = vcmp.eq.f32.partialorder %v1520_v17, 0.0 }
  0xe3   :  { %v1271_v29 = vmul.f32 0.5, %v502_v26  ;;  %v3159_v30 = vpop.f32.mrb[5].mxu1  ;;  %v3661_v31 = vsel %vm1526_vm7, -60000.0, %v1270_v22 }
  0xe4   :  { %v578_v33 = vpop.f32.mrb[6].mxu0  ;;  %v1567_v34 = vsel %vm1554_vm4, %v3661_v31, -inf  ;;  %vm1537_vm3 = vcmp.eq.f32.partialorder %v1521_v23, 0.0 }
  0xe5   :  { %v1272_v36 = vmul.f32 0.5, %v578_v33  ;;  %1565 = vmax.xlane.f32.xlu0 %v1564_v27  ;;  %1568 = vmax.xlane.f32.xlu1 %v1567_v34  ;;  %v3164_v37 = vpop.f32.mrb[7].mxu0  ;;  %v3667_v38 = vsel %vm1527_vm8, -60000.0, %v1271_v29 }
  0xe6   :  { %v654_v39 = vpop.f32.mrb[6].mxu1  ;;  %v1570_v40 = vsel %vm1554_vm4, %v3667_v38, -inf }
  0xe7   :  { %v1273_v50 = vmul.f32 0.5, %v654_v39  ;;  %v3169_v51 = vpop.f32.mrb[7].mxu1  ;;  %v3672_v52 = vsel %vm1528_vm9, -60000.0, %v1272_v36 }
  0xe8   :  { %v730_v41 = vpop.f32.mrb[8].mxu0  ;;  %v1573_v54 = vsel %vm1554_vm4, %v3672_v52, -inf }
  0xe9   :  { %v1274_v56 = vmul.f32 0.5, %v730_v41  ;;  %1571 = vmax.xlane.f32.xlu0 %v1570_v40  ;;  %1574 = vmax.xlane.f32.xlu1 %v1573_v54  ;;  %v3174_v57 = vpop.f32.mrb[9].mxu0  ;;  %v3678_v58 = vsel %vm1529_vm10, -60000.0, %v1273_v50 }
  0xea   :  { %v806_v59 = vpop.f32.mrb[8].mxu1  ;;  %v1576_v60 = vsel %vm1554_vm4, %v3678_v58, -inf }
  0xeb   :  { %v1275_v62 = vmul.f32 0.5, %v806_v59  ;;  %v3179_v63 = vpop.f32.mrb[9].mxu1  ;;  %v3684_v1 = vsel %vm1530_vm11, -60000.0, %v1274_v56 }
  0xec   :  { %v882_v43 = vpop.f32.mrb[10].mxu0  ;;  %v1579_v2 = vsel %vm1554_vm4, %v3684_v1, -inf }
  0xed   :  { %v1276_v6 = vmul.f32 0.5, %v882_v43  ;;  %1577 = vmax.xlane.f32.xlu0 %v1576_v60  ;;  %1580 = vmax.xlane.f32.xlu1 %v1579_v2  ;;  %v3184_v7 = vpop.f32.mrb[11].mxu0  ;;  %v3689_v8 = vsel %vm1531_vm12, -60000.0, %v1275_v62 }
  0xee   :  { %v958_v44 = vpop.f32.mrb[10].mxu1  ;;  %v1582_v10 = vsel %vm1554_vm4, %v3689_v8, -inf }
  0xef   :  { %v1277_v12 = vmul.f32 0.5, %v958_v44  ;;  %v3189_v13 = vpop.f32.mrb[11].mxu1  ;;  %v3695_v14 = vsel %vm1532_vm13, -60000.0, %v1276_v6 }
  0xf0   :  { %v1034_v15 = vpop.f32.mrb[12].mxu0  ;;  %v1585_v16 = vsel %vm1554_vm4, %v3695_v14, -inf }
  0xf1   :  { %v1278_v19 = vmul.f32 0.5, %v1034_v15  ;;  %1583 = vmax.xlane.f32.xlu0 %v1582_v10  ;;  %1586 = vmax.xlane.f32.xlu1 %v1585_v16  ;;  %v3194_v20 = vpop.f32.mrb[13].mxu0  ;;  %v3701_v21 = vsel %vm1533_vm14, -60000.0, %v1277_v12 }
  0xf2   :  { %v1110_v46 = vpop.f32.mrb[12].mxu1  ;;  %v1588_v22 = vsel %vm1554_vm4, %v3701_v21, -inf }
  0xf3   :  { %v1279_v25 = vmul.f32 0.5, %v1110_v46  ;;  %v3199_v26 = vpop.f32.mrb[13].mxu1  ;;  %v3706_v27 = vsel %vm1534_vm15, -60000.0, %v1278_v19 }
  0xf4   :  { %v1186_v47 = vpop.f32.mrb[14].mxu0  ;;  %v1591_v28 = vsel %vm1554_vm4, %v3706_v27, -inf }
  0xf5   :  { %v1280_v29 = vmul.f32 0.5, %v1186_v47  ;;  %1589 = vmax.xlane.f32.xlu0 %v1588_v22  ;;  %1592 = vmax.xlane.f32.xlu1 %v1591_v28  ;;  %v3710_v30 = vsel %vm1535_vm0, -60000.0, %v1279_v25  ;;  %v3204_v32 = vpop.f32.mrb[15].mxu0 }
  0xf6   :  { %v1262_v33 = vpop.f32.mrb[14].mxu1  ;;  %v1594_v48 = vsel %vm1554_vm4, %v3710_v30, -inf }
  0xf7   :  { %v1281_v34 = vmul.f32 0.5, %v1262_v33  ;;  %v3209_v35 = vpop.f32.mrb[15].mxu1  ;;  %v3714_v36 = vsel %vm1536_vm2, -60000.0, %v1280_v29 }
  0xf8   :  { %v1597_v37 = vsel %vm1554_vm4, %v3714_v36, -inf }
  0xf9   :  { %1595 = vmax.xlane.f32.xlu0 %v1594_v48  ;;  %1598 = vmax.xlane.f32.xlu1 %v1597_v37  ;;  %v3718_v39 = vsel %vm1537_vm3, -60000.0, %v1281_v34 }
  0xfa   :  { %v1600_v40 = vsel %vm1554_vm4, %v3718_v39, -inf }
  0xfd   :  { %1601 = vmax.xlane.f32.xlu0 %v1600_v40 }
 0x16a   :  { %v1560_v49 = vpop.xlane.xlu1 %1559  ;;  %v1557_v50 = vpop.xlane.xlu0 %1556 }
 0x16b   :  { %v1604_v51 = vsub.f32 %v3643_v4, %v1560_v49  ;;  %v1603_v53 = vsub.f32 %v3645_v5, %v1557_v50 }
 0x16d   :  { %v1621_v41 = vmul.f32 1.442695, %v1604_v51  ;;  %v1619_v54 = vmul.f32 1.442695, %v1603_v53 }
 0x16e   :  { %v1563_v55 = vpop.xlane.xlu0 %1562 }
 0x16f   :  { %3292 = vpow2.f32 %v1621_v41  ;;  %v1605_v56 = vsub.f32 %v3651_v18, %v1563_v55 }
 0x170   :  { %3294 = vpow2.f32 %v1619_v54 }
 0x171   :  { %v1623_v57 = vmul.f32 1.442695, %v1605_v56 }
 0x172   :  { %v1566_v42 = vpop.xlane.xlu0 %1565  ;;  %v1569_v59 = vpop.xlane.xlu1 %1568 }
 0x173   :  { %3296 = vpow2.f32 %v1623_v57  ;;  %v1606_v60 = vsub.f32 %v3656_v24, %v1566_v42  ;;  %v1607_v61 = vsub.f32 %v3661_v31, %v1569_v59 }
 0x175   :  { %v1625_v62 = vmul.f32 1.442695, %v1606_v60  ;;  %v1627_v63 = vmul.f32 1.442695, %v1607_v61  ;;  %v1731_v61 = vld [vmem:[%s4007_s2] sm:$0x1f] }
 0x176   :  { %v1572_v4 = vpop.xlane.xlu0 %1571  ;;  %v1575_v43 = vpop.xlane.xlu1 %1574  ;;  %3211 = vmatpush3.msk.msra.mxu0 %vm1751_vm5, %v1731_v61 }
 0x177   :  { %3298 = vpow2.f32 %v1625_v62  ;;  %v1608_v5 = vsub.f32 %v3667_v38, %v1572_v4  ;;  %v1609_v2 = vsub.f32 %v3672_v52, %v1575_v43  ;;  %v1732_v62 = vld [vmem:[%s4007_s2 + $0x8] sm:$0x1f]  ;;  %3220 = vmatprep.subr.mxu0 %v3356_v0 }
 0x178   :  { %3300 = vpow2.f32 %v1627_v63  ;;  %3216 = vmatpush3.msk.msra.mxu1 %vm1751_vm5, %v1732_v62 }
 0x179   :  { %v3729_v18 = vpop.eup %3292  ;;  %v1629_v3 = vmul.f32 1.442695, %v1608_v5  ;;  %v1631_v6 = vmul.f32 1.442695, %v1609_v2  ;;  %3225 = vmatprep.subr.mxu1 %v3356_v0 }
 0x17a   :  { %v3731_v7 = vpop.eup %3294  ;;  %v1578_v9 = vpop.xlane.xlu0 %1577  ;;  %v1654_v31 = vsel %vm1554_vm4, %v3729_v18, 0.0 }
 0x17b   :  { %v1581_v24 = vpop.xlane.xlu1 %1580  ;;  %3302 = vpow2.f32 %v1629_v3  ;;  %v1610_v44 = vsub.f32 %v3678_v58, %v1578_v9  ;;  %1655 = vadd.xlane.f32.xlu0 %v1654_v31  ;;  %v1651_v38 = vsel %vm1554_vm4, %v3731_v7, 0.0 }
 0x17c   :  { %v1611_v10 = vsub.f32 %v3684_v1, %v1581_v24  ;;  %3304 = vpow2.f32 %v1631_v6  ;;  %1652 = vadd.xlane.f32.xlu1 %v1651_v38 }
 0x17d   :  { %v3739_v52 = vpop.eup %3296  ;;  %v1633_v11 = vmul.f32 1.442695, %v1610_v44 }
 0x17e   :  { %v1635_v12 = vmul.f32 1.442695, %v1611_v10  ;;  %v1584_v13 = vpop.xlane.xlu0 %1583  ;;  %v1657_v15 = vsel %vm1554_vm4, %v3739_v52, 0.0 }
 0x17f   :  { %v1587_v45 = vpop.xlane.xlu1 %1586  ;;  %3306 = vpow2.f32 %v1633_v11  ;;  %v1612_v58 = vsub.f32 %v3689_v8, %v1584_v13 }
 0x180   :  { %v1613_v1 = vsub.f32 %v3695_v14, %v1587_v45  ;;  %3308 = vpow2.f32 %v1635_v12  ;;  %1658 = vadd.xlane.f32.xlu1 %v1657_v15  ;;  %v1734_v12 = vld [vmem:[%s4007_s2 + $0x18] sm:$0x1f]  ;;  %v1733_v15 = vld [vmem:[%s4007_s2 + $0x10] sm:$0x1f] }
 0x181   :  { %v3745_v16 = vpop.eup %3298  ;;  %v1637_v17 = vmul.f32 1.442695, %v1612_v58 }
 0x182   :  { %v1639_v19 = vmul.f32 1.442695, %v1613_v1  ;;  %v3747_v20 = vpop.eup %3300  ;;  %v1590_v46 = vpop.xlane.xlu0 %1589  ;;  %v1660_v23 = vsel %vm1554_vm4, %v3745_v16, 0.0 }
 0x183   :  { %v1593_v22 = vpop.xlane.xlu1 %1592  ;;  %3310 = vpow2.f32 %v1637_v17  ;;  %v1614_v25 = vsub.f32 %v3701_v21, %v1590_v46  ;;  %1661 = vadd.xlane.f32.xlu0 %v1660_v23  ;;  %v1663_v14 = vsel %vm1554_vm4, %v3747_v20, 0.0  ;;  %v1735_v17 = vld [vmem:[%s4007_s2 + $0x20] sm:$0x1f]  ;;  %v1736_v23 = vld [vmem:[%s4007_s2 + $0x28] sm:$0x1f] }
 0x184   :  { %v1615_v8 = vsub.f32 %v3706_v27, %v1593_v22  ;;  %3312 = vpow2.f32 %v1639_v19  ;;  %1664 = vadd.xlane.f32.xlu1 %v1663_v14 }
 0x185   :  { %v3755_v26 = vpop.eup %3302  ;;  %v1641_v47 = vmul.f32 1.442695, %v1614_v25 }
 0x186   :  { %v1643_v28 = vmul.f32 1.442695, %v1615_v8  ;;  %v3757_v29 = vpop.eup %3304  ;;  %v1596_v32 = vpop.xlane.xlu0 %1595  ;;  %v1666_v48 = vsel %vm1554_vm4, %v3755_v26, 0.0 }
 0x187   :  { %v1599_v33 = vpop.xlane.xlu1 %1598  ;;  %3314 = vpow2.f32 %v1641_v47  ;;  %v1616_v21 = vsub.f32 %v3710_v30, %v1596_v32  ;;  %1667 = vadd.xlane.f32.xlu0 %v1666_v48  ;;  %v1669_v34 = vsel %vm1554_vm4, %v3757_v29, 0.0  ;;  %v1738_v32 = vld [vmem:[%s4007_s2 + $0x38] sm:$0x1f] }
 0x188   :  { %v1617_v27 = vsub.f32 %v3714_v36, %v1599_v33  ;;  %3316 = vpow2.f32 %v1643_v28  ;;  %1670 = vadd.xlane.f32.xlu1 %v1669_v34 }
 0x189   :  { %v3765_v35 = vpop.eup %3306  ;;  %v1645_v37 = vmul.f32 1.442695, %v1616_v21 }
 0x18a   :  { %v1647_v40 = vmul.f32 1.442695, %v1617_v27  ;;  %v3767_v49 = vpop.eup %3308  ;;  %v1602_v50 = vpop.xlane.xlu0 %1601  ;;  %v1672_v51 = vsel %vm1554_vm4, %v3765_v35, 0.0 }
 0x18b   :  { %3318 = vpow2.f32 %v1645_v37  ;;  %v1618_v30 = vsub.f32 %v3718_v39, %v1602_v50  ;;  %1673 = vadd.xlane.f32.xlu0 %v1672_v51  ;;  %v1675_v36 = vsel %vm1554_vm4, %v3767_v49, 0.0  ;;  %v1740_v37 = vld [vmem:[%s4007_s2 + $0x48] sm:$0x1f] }
 0x18c   :  { %3320 = vpow2.f32 %v1647_v40  ;;  %1676 = vadd.xlane.f32.xlu1 %v1675_v36 }
 0x18d   :  { %v3774_v53 = vpop.eup %3310  ;;  %v1649_v41 = vmul.f32 1.442695, %v1618_v30 }
 0x18e   :  { %v3776_v54 = vpop.eup %3312  ;;  %v1678_v55 = vsel %vm1554_vm4, %v3774_v53, 0.0 }
 0x18f   :  { %3322 = vpow2.f32 %v1649_v41  ;;  %1679 = vadd.xlane.f32.xlu0 %v1678_v55  ;;  %v1681_v56 = vsel %vm1554_vm4, %v3776_v54, 0.0  ;;  %v1742_v41 = vld [vmem:[%s4007_s2 + $0x58] sm:$0x1f] }
 0x190   :  { %1682 = vadd.xlane.f32.xlu1 %v1681_v56 }
 0x191   :  { %v3782_v39 = vpop.eup %3314 }
 0x192   :  { %v3784_v57 = vpop.eup %3316  ;;  %v1684_v42 = vsel %vm1554_vm4, %v3782_v39, 0.0 }
 0x193   :  { %1685 = vadd.xlane.f32.xlu0 %v1684_v42  ;;  %v1687_v59 = vsel %vm1554_vm4, %v3784_v57, 0.0 }
 0x194   :  { %1688 = vadd.xlane.f32.xlu1 %v1687_v59  ;;  %v1744_v59 = vld [vmem:[%s4007_s2 + $0x68] sm:$0x1f] }
 0x195   :  { %v3790_v60 = vpop.eup %3318 }
 0x196   :  { %v3798_v63 = vpop.eup %3320  ;;  %v1690_v4 = vsel %vm1554_vm4, %v3790_v60, 0.0 }
 0x197   :  { %1691 = vadd.xlane.f32.xlu0 %v1690_v4  ;;  %v1693_v43 = vsel %vm1554_vm4, %v3798_v63, 0.0 }
 0x198   :  { %1694 = vadd.xlane.f32.xlu1 %v1693_v43  ;;  %v1746_v43 = vld [vmem:[%s4007_s2 + $0x78] sm:$0x1f] }
 0x199   :  { %v3808_v5 = vpop.eup %3322 }
 0x19a   :  { %v1696_v2 = vsel %vm1554_vm4, %v3808_v5, 0.0  ;;  %vm2965_vm4 = vcmask 28672  }
 0x19b   :  { %1697 = vadd.xlane.f32.xlu0 %v1696_v2 }
 0x208   :  { %v1656_v3 = vpop.xlane.xlu0 %1655 }
 0x209   :  { %3324 = vrcp.f32 %v1656_v3  ;;  %v1653_v6 = vpop.xlane.xlu1 %1652 }
 0x20a   :  { %3326 = vrcp.f32 %v1653_v6 }
 0x20d   :  { %v1659_v9 = vpop.xlane.xlu1 %1658 }
 0x20e   :  { %3328 = vrcp.f32 %v1659_v9 }
 0x210   :  { %v1662_v24 = vpop.xlane.xlu0 %1661 }
 0x211   :  { %3330 = vrcp.f32 %v1662_v24  ;;  %v1665_v31 = vpop.xlane.xlu1 %1664 }
 0x212   :  { %3332 = vrcp.f32 %v1665_v31 }
 0x213   :  { %v3325_v44 = vpop.eup %3324 }
 0x214   :  { %v3327_v10 = vpop.eup %3326  ;;  %v1716_v38 = vmul.f32 %v3325_v44, %v3729_v18  ;;  %v1668_v11 = vpop.xlane.xlu0 %1667 }
 0x215   :  { %v1715_v13 = vmul.f32 %v3327_v10, %v3731_v7  ;;  %3334 = vrcp.f32 %v1668_v11  ;;  %v1671_v45 = vpop.xlane.xlu1 %1670 }
 0x216   :  { %3336 = vrcp.f32 %v1671_v45  ;;  %3218 = vmatmul.mubr.msk.f32.vlgmr.msra.gmra.mrb[16].mxu1 %vm1747_vm6, %v1716_v38 }
 0x217   :  { %3213 = vmatmul.mubr.msk.f32.vlgmr.msra.gmra.mrb[16].mxu0 %vm1747_vm6, %v1715_v13  ;;  %3226 = vmatpush3.msk.msra.mxu1 %vm1751_vm5, %v1734_v12 }
 0x218   :  { %v3329_v18 = vpop.eup %3328  ;;  %v1674_v58 = vpop.xlane.xlu0 %1673  ;;  %3221 = vmatpush3.msk.msra.mxu0 %vm1751_vm5, %v1733_v15  ;;  %3222 = vmatprep.mubr.msk.f32.mxu0 %vm3357_vm1, %v3356_v0 }
 0x219   :  { %v1717_v7 = vmul.f32 %v3329_v18, %v3739_v52  ;;  %3338 = vrcp.f32 %v1674_v58  ;;  %v1677_v1 = vpop.xlane.xlu1 %1676  ;;  %3230 = vmatprep.subr.mxu0 %v3356_v0  ;;  %3227 = vmatprep.mubr.msk.f32.mxu1 %vm3357_vm1, %v3356_v0 }
 0x21a   :  { %3340 = vrcp.f32 %v1677_v1  ;;  %3235 = vmatprep.subr.mxu1 %v3356_v0 }
 0x21b   :  { %v3331_v19 = vpop.eup %3330  ;;  %3223 = vmatmul.mubr.msk.f32.vlgmr.msra.gmra.mrb[18].mxu0 %vm1747_vm6, %v1717_v7 }
 0x21c   :  { %v3333_v46 = vpop.eup %3332  ;;  %v1718_v52 = vmul.f32 %v3331_v19, %v3745_v16  ;;  %v1680_v22 = vpop.xlane.xlu0 %1679  ;;  %3231 = vmatpush3.msk.msra.mxu0 %vm1751_vm5, %v1735_v17  ;;  %3232 = vmatprep.mubr.msk.f32.mxu0 %vm3357_vm1, %v3356_v0  ;;  %v1737_v16 = vld [vmem:[%s4007_s2 + $0x30] sm:$0x1f] }
 0x21d   :  { %v1719_v25 = vmul.f32 %v3333_v46, %v3747_v20  ;;  %3342 = vrcp.f32 %v1680_v22  ;;  %v1683_v8 = vpop.xlane.xlu1 %1682  ;;  %3240 = vmatprep.subr.mxu0 %v3356_v0 }
 0x21e   :  { %3344 = vrcp.f32 %v1683_v8  ;;  %3228 = vmatmul.mubr.msk.f32.vlgmr.msra.gmra.mrb[18].mxu1 %vm1747_vm6, %v1718_v52 }
 0x21f   :  { %v3335_v14 = vpop.eup %3334  ;;  %3233 = vmatmul.mubr.msk.f32.vlgmr.msra.gmra.mrb[20].mxu0 %vm1747_vm6, %v1719_v25  ;;  %3236 = vmatpush3.msk.msra.mxu1 %vm1751_vm5, %v1736_v23 }
 0x220   :  { %v3337_v47 = vpop.eup %3336  ;;  %v1720_v28 = vmul.f32 %v3335_v14, %v3755_v26  ;;  %v1686_v20 = vpop.xlane.xlu0 %1685  ;;  %3237 = vmatprep.mubr.msk.f32.mxu1 %vm3357_vm1, %v3356_v0  ;;  %3241 = vmatpush3.msk.msra.mxu0 %vm1751_vm5, %v1737_v16  ;;  %v1739_v26 = vld [vmem:[%s4007_s2 + $0x40] sm:$0x1f] }
 0x221   :  { %v1721_v33 = vmul.f32 %v3337_v47, %v3757_v29  ;;  %3346 = vrcp.f32 %v1686_v20  ;;  %v1689_v48 = vpop.xlane.xlu1 %1688  ;;  %3242 = vmatprep.mubr.msk.f32.mxu0 %vm3357_vm1, %v3356_v0  ;;  %3245 = vmatprep.subr.mxu1 %v3356_v0 }
 0x222   :  { %3348 = vrcp.f32 %v1689_v48  ;;  %3238 = vmatmul.mubr.msk.f32.vlgmr.msra.gmra.mrb[20].mxu1 %vm1747_vm6, %v1720_v28  ;;  %3250 = vmatprep.subr.mxu0 %v3356_v0 }
 0x223   :  { %v3339_v21 = vpop.eup %3338  ;;  %3243 = vmatmul.mubr.msk.f32.vlgmr.msra.gmra.mrb[22].mxu0 %vm1747_vm6, %v1721_v33  ;;  %3246 = vmatpush3.msk.msra.mxu1 %vm1751_vm5, %v1738_v32 }
 0x224   :  { %v3341_v29 = vpop.eup %3340  ;;  %v1722_v27 = vmul.f32 %v3339_v21, %v3765_v35  ;;  %v1692_v34 = vpop.xlane.xlu0 %1691  ;;  %3247 = vmatprep.mubr.msk.f32.mxu1 %vm3357_vm1, %v3356_v0  ;;  %3251 = vmatpush3.msk.msra.mxu0 %vm1751_vm5, %v1739_v26  ;;  %v1741_v35 = vld [vmem:[%s4007_s2 + $0x50] sm:$0x1f] }
 0x225   :  { %v1723_v40 = vmul.f32 %v3341_v29, %v3767_v49  ;;  %3350 = vrcp.f32 %v1692_v34  ;;  %v1695_v50 = vpop.xlane.xlu1 %1694  ;;  %3252 = vmatprep.mubr.msk.f32.mxu0 %vm3357_vm1, %v3356_v0  ;;  %3255 = vmatprep.subr.mxu1 %v3356_v0 }
 0x226   :  { %3352 = vrcp.f32 %v1695_v50  ;;  %3248 = vmatmul.mubr.msk.f32.vlgmr.msra.gmra.mrb[22].mxu1 %vm1747_vm6, %v1722_v27  ;;  %3260 = vmatprep.subr.mxu0 %v3356_v0 }
 0x227   :  { %v3343_v51 = vpop.eup %3342  ;;  %3253 = vmatmul.mubr.msk.f32.vlgmr.msra.gmra.mrb[24].mxu0 %vm1747_vm6, %v1723_v40  ;;  %3256 = vmatpush3.msk.msra.mxu1 %vm1751_vm5, %v1740_v37 }
 0x228   :  { %v3345_v49 = vpop.eup %3344  ;;  %v1724_v30 = vmul.f32 %v3343_v51, %v3774_v53  ;;  %v1698_v36 = vpop.xlane.xlu0 %1697  ;;  %3257 = vmatprep.mubr.msk.f32.mxu1 %vm3357_vm1, %v3356_v0  ;;  %3261 = vmatpush3.msk.msra.mxu0 %vm1751_vm5, %v1741_v35  ;;  %v1743_v53 = vld [vmem:[%s4007_s2 + $0x60] sm:$0x1f] }
 0x229   :  { %v1725_v55 = vmul.f32 %v3345_v49, %v3776_v54  ;;  %3354 = vrcp.f32 %v1698_v36  ;;  %3262 = vmatprep.mubr.msk.f32.mxu0 %vm3357_vm1, %v3356_v0  ;;  %3265 = vmatprep.subr.mxu1 %v3356_v0 }
 0x22a   :  { %3258 = vmatmul.mubr.msk.f32.vlgmr.msra.gmra.mrb[24].mxu1 %vm1747_vm6, %v1724_v30  ;;  %3270 = vmatprep.subr.mxu0 %v3356_v0 }
 0x22b   :  { %v3347_v56 = vpop.eup %3346  ;;  %3263 = vmatmul.mubr.msk.f32.vlgmr.msra.gmra.mrb[26].mxu0 %vm1747_vm6, %v1725_v55  ;;  %3266 = vmatpush3.msk.msra.mxu1 %vm1751_vm5, %v1742_v41 }
 0x22c   :  { %v3349_v54 = vpop.eup %3348  ;;  %v1726_v42 = vmul.f32 %v3347_v56, %v3782_v39  ;;  %3267 = vmatprep.mubr.msk.f32.mxu1 %vm3357_vm1, %v3356_v0  ;;  %3271 = vmatpush3.msk.msra.mxu0 %vm1751_vm5, %v1743_v53  ;;  %v1745_v39 = vld [vmem:[%s4007_s2 + $0x70] sm:$0x1f] }
 0x22d   :  { %v1727_v61 = vmul.f32 %v3349_v54, %v3784_v57  ;;  %3272 = vmatprep.mubr.msk.f32.mxu0 %vm3357_vm1, %v3356_v0  ;;  %3275 = vmatprep.subr.mxu1 %v3356_v0 }
 0x22e   :  { %3268 = vmatmul.mubr.msk.f32.vlgmr.msra.gmra.mrb[26].mxu1 %vm1747_vm6, %v1726_v42  ;;  %3280 = vmatprep.subr.mxu0 %v3356_v0 }
 0x22f   :  { %v3351_v62 = vpop.eup %3350  ;;  %3273 = vmatmul.mubr.msk.f32.vlgmr.msra.gmra.mrb[28].mxu0 %vm1747_vm6, %v1727_v61  ;;  %3276 = vmatpush3.msk.msra.mxu1 %vm1751_vm5, %v1744_v59 }
 0x230   :  { %v3353_v4 = vpop.eup %3352  ;;  %v1728_v57 = vmul.f32 %v3351_v62, %v3790_v60  ;;  %3277 = vmatprep.mubr.msk.f32.mxu1 %vm3357_vm1, %v3356_v0  ;;  %3281 = vmatpush3.msk.msra.mxu0 %vm1751_vm5, %v1745_v39 }
 0x231   :  { %v1729_v2 = vmul.f32 %v3353_v4, %v3798_v63  ;;  %3282 = vmatprep.mubr.msk.f32.mxu0 %vm3357_vm1, %v3356_v0  ;;  %3285 = vmatprep.subr.mxu1 %v3356_v0 }
 0x232   :  { %3278 = vmatmul.mubr.msk.f32.vlgmr.msra.gmra.mrb[28].mxu1 %vm1747_vm6, %v1728_v57 }
 0x233   :  { %v3355_v3 = vpop.eup %3354  ;;  %3283 = vmatmul.mubr.msk.f32.vlgmr.msra.gmra.mrb[30].mxu0 %vm1747_vm6, %v1729_v2  ;;  %3286 = vmatpush3.msk.msra.mxu1 %vm1751_vm5, %v1746_v43 }
 0x234   :  { %v1730_v60 = vmul.f32 %v3355_v3, %v3808_v5  ;;  %3287 = vmatprep.mubr.msk.f32.mxu1 %vm3357_vm1, %v3356_v0 }
 0x236   :  { %3288 = vmatmul.mubr.msk.f32.vlgmr.msra.gmra.mrb[30].mxu1 %vm1747_vm6, %v1730_v60 }
 0x2e9   :  { %v1897_v63 = vpop.f32.mrb[16].mxu1 }
 0x2ea   :  { %v1821_v6 = vpop.f32.mrb[16].mxu0  ;;  %2967 = vst.msk [vmem:[%s4008_s4 + $0x8] sm:$0x1f] %vm2965_vm4, %v1897_v63  ;;  %v3219_v9 = vpop.f32.mrb[17].mxu1 }
 0x2eb   :  { %2966 = vst.msk [vmem:[%s4008_s4] sm:$0x1f] %vm2965_vm4, %v1821_v6  ;;  %v3214_v5 = vpop.f32.mrb[17].mxu0 }
 0x2ee   :  { %v1973_v24 = vpop.f32.mrb[18].mxu0 }
 0x2ef   :  { %2968 = vst.msk [vmem:[%s4008_s4 + $0x10] sm:$0x1f] %vm2965_vm4, %v1973_v24  ;;  %v3224_v0 = vpop.f32.mrb[19].mxu0 }
 0x2f1   :  { %v2049_v31 = vpop.f32.mrb[18].mxu1 }
 0x2f2   :  { %2969 = vst.msk [vmem:[%s4008_s4 + $0x18] sm:$0x1f] %vm2965_vm4, %v2049_v31  ;;  %v2125_v44 = vpop.f32.mrb[20].mxu0  ;;  %v3229_v10 = vpop.f32.mrb[19].mxu1 }
 0x2f3   :  { %2970 = vst.msk [vmem:[%s4008_s4 + $0x20] sm:$0x1f] %vm2965_vm4, %v2125_v44  ;;  %v3234_v38 = vpop.f32.mrb[21].mxu0 }
 0x2f5   :  { %v2201_v11 = vpop.f32.mrb[20].mxu1 }
 0x2f6   :  { %2971 = vst.msk [vmem:[%s4008_s4 + $0x28] sm:$0x1f] %vm2965_vm4, %v2201_v11  ;;  %v2277_v12 = vpop.f32.mrb[22].mxu0  ;;  %v3239_v13 = vpop.f32.mrb[21].mxu1 }
 0x2f7   :  { %2972 = vst.msk [vmem:[%s4008_s4 + $0x30] sm:$0x1f] %vm2965_vm4, %v2277_v12  ;;  %v3244_v45 = vpop.f32.mrb[23].mxu0 }
 0x2f9   :  { %v2353_v15 = vpop.f32.mrb[22].mxu1 }
 0x2fa   :  { %2973 = vst.msk [vmem:[%s4008_s4 + $0x38] sm:$0x1f] %vm2965_vm4, %v2353_v15  ;;  %v2429_v18 = vpop.f32.mrb[24].mxu0  ;;  %v3249_v58 = vpop.f32.mrb[23].mxu1 }
 0x2fb   :  { %2974 = vst.msk [vmem:[%s4008_s4 + $0x40] sm:$0x1f] %vm2965_vm4, %v2429_v18  ;;  %v3254_v7 = vpop.f32.mrb[25].mxu0 }
 0x2fd   :  { %v2505_v1 = vpop.f32.mrb[24].mxu1 }
 0x2fe   :  { %2975 = vst.msk [vmem:[%s4008_s4 + $0x48] sm:$0x1f] %vm2965_vm4, %v2505_v1  ;;  %v2581_v17 = vpop.f32.mrb[26].mxu0  ;;  %v3259_v19 = vpop.f32.mrb[25].mxu1 }
 0x2ff   :  { %2976 = vst.msk [vmem:[%s4008_s4 + $0x50] sm:$0x1f] %vm2965_vm4, %v2581_v17  ;;  %v3264_v46 = vpop.f32.mrb[27].mxu0 }
 0x301   :  { %v2657_v52 = vpop.f32.mrb[26].mxu1 }
 0x302   :  { %2977 = vst.msk [vmem:[%s4008_s4 + $0x58] sm:$0x1f] %vm2965_vm4, %v2657_v52  ;;  %v2733_v22 = vpop.f32.mrb[28].mxu0  ;;  %v3269_v23 = vpop.f32.mrb[27].mxu1 }
 0x303   :  { %2978 = vst.msk [vmem:[%s4008_s4 + $0x60] sm:$0x1f] %vm2965_vm4, %v2733_v22  ;;  %v3274_v25 = vpop.f32.mrb[29].mxu0 }
 0x305   :  { %v2809_v8 = vpop.f32.mrb[28].mxu1 }
 0x306   :  { %2979 = vst.msk [vmem:[%s4008_s4 + $0x68] sm:$0x1f] %vm2965_vm4, %v2809_v8  ;;  %v2885_v16 = vpop.f32.mrb[30].mxu0  ;;  %v3279_v14 = vpop.f32.mrb[29].mxu1 }
 0x307   :  { %2980 = vst.msk [vmem:[%s4008_s4 + $0x70] sm:$0x1f] %vm2965_vm4, %v2885_v16  ;;  %v3284_v47 = vpop.f32.mrb[31].mxu0 }
 0x309   :  { %v2961_v28 = vpop.f32.mrb[30].mxu1 }
 0x30a   :  { %2981 = vst.msk [vmem:[%s4008_s4 + $0x78] sm:$0x1f] %vm2965_vm4, %v2961_v28  ;;  %v3289_v20 = vpop.f32.mrb[31].mxu1 }

</bundles_post_ra>
